<compile_context>
chip_gen: v5e
topology: v5e:2x2
jax: 0.10.0
libtpu: 0.0.40
codegen_flags: <defaults>
</compile_context>

<pallas_src>
import functools

import jax
import jax.numpy as jnp
from jax import lax
from jax.experimental import pallas as pl
from jax.experimental.pallas import tpu as pltpu


# --------------------------------------------------------------------------- #
# Kernels
# --------------------------------------------------------------------------- #
def _conv_block_kernel(*refs, KH, KW, HO, WO, fold_dy, has_bias,
                       instance_norm, leaky_relu):
    """Fused conv(KHxKW, stride 1 on a padded / space-to-depth'd tile)
    [+ bias] [+ InstanceNorm(affine=False)] [+ LeakyReLU(0.2)].

    refs (in order):
      x_ref : (1, HO+KH-1, WO+KW-1, CI)  padded (and s2d'd for stride-2) tile
      w_ref : (KH*KW*CI, CO)             weights in im2col row order (dy,dx,ci)
      b_ref : (1, CO)                    [only when has_bias]
      o_ref : (1, HO, WO, CO)
    """
    if has_bias:
        x_ref, w_ref, b_ref, o_ref = refs
    else:
        x_ref, w_ref, o_ref = refs
        b_ref = None

    CI = x_ref.shape[-1]
    CO = o_ref.shape[-1]
    KWCI = KW * CI

    # W-direction im2col, built once: fold (KW, CI) into the contraction K
    # instead of KH*KW sublane-shifted per-tap copies + accumulator round-trips.
    xw = jnp.concatenate([x_ref[0, :, dx:dx + WO, :] for dx in range(KW)],
                         axis=-1)                          # (Hp, WO, KW*CI)

    if fold_dy:
        # Fold the KH row-taps into K as well -> a single MXU dot with
        # K = KH*KW*CI (covers the "first layer as one im2col dot" item).
        cols = jnp.concatenate([xw[dy:dy + HO] for dy in range(KH)], axis=-1)
        acc = jnp.dot(cols.reshape(HO * WO, KH * KWCI), w_ref[...],
                      preferred_element_type=jnp.float32)
    else:
        # Loop over dy only: KH dots with K = KW*CI, accumulated in a LOCAL f32
        # value (no scratch init, no per-tap VMEM read-modify-write; on v7x the
        # chained dots can stay in the MXU result buffer).
        acc = jnp.dot(xw[0:HO].reshape(HO * WO, KWCI), w_ref[0:KWCI, :],
                      preferred_element_type=jnp.float32)
        for dy in range(1, KH):
            acc = acc + jnp.dot(xw[dy:dy + HO].reshape(HO * WO, KWCI),
                                w_ref[dy * KWCI:(dy + 1) * KWCI, :],
                                preferred_element_type=jnp.float32)

    if has_bias:
        acc = acc + b_ref[...].astype(jnp.float32)

    if instance_norm:
        # InstanceNorm2d(affine=False): per-(sample, channel) stats over H*W,
        # single pass in f32; variance clamped at 0 before rsqrt (review note).
        inv_n = jnp.float32(1.0 / (HO * WO))
        mean = jnp.sum(acc, axis=0, keepdims=True) * inv_n
        mean_sq = jnp.sum(acc * acc, axis=0, keepdims=True) * inv_n
        var = jnp.maximum(mean_sq - mean * mean, 0.0)
        acc = (acc - mean) * lax.rsqrt(var + 1e-5)

    if leaky_relu:
        acc = jnp.maximum(acc, 0.2 * acc)                  # LeakyReLU(0.2)

    o_ref[...] = acc.reshape(1, HO, WO, CO).astype(o_ref.dtype)


def _head_kernel(x_ref, w_ref, b_ref, o_ref, *, KH, KW, HO, WO):
    """Final CO=1 conv as VPU multiply + lane (XLU) reduction.

    Review item: never run an MXU matmul with CO=1 nor store a last-dim-1
    block; the output block is (1, HO, WO) so WO sits on the lane axis.
      x_ref : (1, HO+KH-1, WO+KW-1, CI)
      w_ref : (1, 1, KH*KW*CI)  f32
      b_ref : (1, 1)            f32
      o_ref : (1, HO, WO)       f32
    """
    xw = jnp.concatenate([x_ref[0, :, dx:dx + WO, :] for dx in range(KW)],
                         axis=-1)
    cols = jnp.concatenate([xw[dy:dy + HO] for dy in range(KH)], axis=-1)
    prod = cols.astype(jnp.float32) * w_ref[...]           # (HO, WO, K) f32
    out = jnp.sum(prod, axis=-1) + b_ref[...]              # (HO, WO)
    o_ref[...] = out.reshape(1, HO, WO).astype(o_ref.dtype)


# --------------------------------------------------------------------------- #
# Per-layer wrappers
# --------------------------------------------------------------------------- #
def _conv_layer(x, w2d, b, *, stride, instance_norm, leaky_relu, out_dtype):
    """One discriminator conv layer.  x: (N, H, W, CI) NHWC."""
    N, H, W, CI = x.shape
    # Zero padding = 1.  For stride-2 layers, pad + space-to-depth (a stride-2
    # 4x4 conv becomes a stride-1 2x2 conv over 4*CI channels) are applied in
    # one expression so XLA emits a single relayout copy of the bf16 activation.
    xp = jnp.pad(x, ((0, 0), (1, 1), (1, 1), (0, 0)))
    if stride == 2:
        assert H % 2 == 0 and W % 2 == 0
        Hp0, Wp0 = H + 2, W + 2
        xp = (xp.reshape(N, Hp0 // 2, 2, Wp0 // 2, 2, CI)
                .transpose(0, 1, 3, 2, 4, 5)
                .reshape(N, Hp0 // 2, Wp0 // 2, 4 * CI))
        KH = KW = 2
    else:
        KH = KW = 4
    _, Hp, Wp, CIK = xp.shape
    HO, WO = Hp - KH + 1, Wp - KW + 1
    K = KH * KW * CIK
    CO = w2d.shape[-1]
    assert w2d.shape == (K, CO)

    fold_dy = K <= 2048          # single MXU dot whenever the im2col K is modest
    has_bias = b is not None

    kernel = functools.partial(
        _conv_block_kernel, KH=KH, KW=KW, HO=HO, WO=WO, fold_dy=fold_dy,
        has_bias=has_bias, instance_norm=instance_norm, leaky_relu=leaky_relu)

    # Grid-invariant weight/bias blocks are not re-fetched across grid steps.
    # TODO(synk): request pl.Buffered(1) on them to also drop the second
    #             (unused) pipeline buffer and free VMEM for larger tiles.
    in_specs = [pl.BlockSpec((1, Hp, Wp, CIK), lambda n: (n, 0, 0, 0)),
                pl.BlockSpec((K, CO), lambda n: (0, 0))]
    args = [xp, w2d]
    if has_bias:                  # bias only declared/DMA'd when actually used
        in_specs.append(pl.BlockSpec((1, CO), lambda n: (0, 0)))
        args.append(b)

    act_bytes = jnp.dtype(x.dtype).itemsize
    in_blk = Hp * Wp * CIK * act_bytes
    out_blk = HO * WO * CO * jnp.dtype(out_dtype).itemsize
    w_bytes = K * CO * jnp.dtype(w2d.dtype).itemsize
    cols_bytes = HO * WO * K * act_bytes          # in-kernel im2col value
    acc_bytes = HO * WO * CO * 4                  # f32 accumulator value
    # Sized from the double-buffered blocks + in-kernel values with headroom;
    # clamped to [32 MiB, 64 MiB] (v7x physical VMEM is 64 MiB per TensorCore).
    vmem_limit = int(min(max(2 * (in_blk + out_blk) + w_bytes
                             + 2 * (cols_bytes + acc_bytes) + (8 << 20),
                             32 << 20), 64 << 20))

    cost = pl.CostEstimate(
        flops=2 * N * HO * WO * K * CO,
        transcendentals=0,
        bytes_accessed=N * (in_blk + out_blk) + w_bytes)

    return pl.pallas_call(
        kernel,
        out_shape=jax.ShapeDtypeStruct((N, HO, WO, CO), out_dtype),
        grid=(N,),
        in_specs=in_specs,
        out_specs=pl.BlockSpec((1, HO, WO, CO), lambda n: (n, 0, 0, 0)),
        compiler_params=pltpu.CompilerParams(
            dimension_semantics=("parallel",),     # batch axis is independent
            vmem_limit_bytes=vmem_limit),
        cost_estimate=cost,
    )(*args)


def _head_layer(x, w, b):
    """Final conv to 1 channel, lane-dense (N, HO, WO) f32 output."""
    N, H, W, CI = x.shape
    xp = jnp.pad(x, ((0, 0), (1, 1), (1, 1), (0, 0)))
    KH = KW = 4
    Hp, Wp = H + 2, W + 2
    HO, WO = Hp - KH + 1, Wp - KW + 1
    K = KH * KW * CI
    assert w.shape == (1, 1, K) and b.shape == (1, 1)

    kernel = functools.partial(_head_kernel, KH=KH, KW=KW, HO=HO, WO=WO)

    act_bytes = jnp.dtype(x.dtype).itemsize
    in_blk = Hp * Wp * CI * act_bytes
    out_blk = HO * WO * 4
    cols_bytes = HO * WO * K * 4
    vmem_limit = int(min(max(2 * (in_blk + out_blk) + K * 4 + 2 * cols_bytes
                             + (8 << 20), 32 << 20), 64 << 20))
    cost = pl.CostEstimate(flops=2 * N * HO * WO * K, transcendentals=0,
                           bytes_accessed=N * (in_blk + out_blk) + K * 4)

    return pl.pallas_call(
        kernel,
        out_shape=jax.ShapeDtypeStruct((N, HO, WO), jnp.float32),
        grid=(N,),
        in_specs=[pl.BlockSpec((1, Hp, Wp, CI), lambda n: (n, 0, 0, 0)),
                  pl.BlockSpec((1, 1, K), lambda n: (0, 0, 0)),
                  pl.BlockSpec((1, 1), lambda n: (0, 0))],
        out_specs=pl.BlockSpec((1, HO, WO), lambda n: (n, 0, 0)),
        compiler_params=pltpu.CompilerParams(
            dimension_semantics=("parallel",),
            vmem_limit_bytes=vmem_limit),
        cost_estimate=cost,
    )(xp, w, b)


# --------------------------------------------------------------------------- #
# Parameter construction + forward
# --------------------------------------------------------------------------- #
def build_discriminator(key, input_nc, ndf=64, n_layers=3,
                        param_dtype=jnp.bfloat16):
    """Synthetic parameters + static per-layer config.

    Weights/activations are bf16 (param_dtype) with f32 MXU accumulation and
    f32 InstanceNorm stats.  Weights are pre-flattened ONCE into the im2col row
    order (dy, dx, ci) the kernel consumes — (K, CO) 2-D — with the stride-2
    space-to-depth rearrangement pre-applied.  Biases immediately followed by
    affine-free InstanceNorm are cancelled and not materialized.  The CO=1 head
    weight is kept f32 (tiny) as a (1, 1, K) row vector for the VPU/XLU path.
    """
    # (cin, cout, stride, instance_norm, leaky_relu, bias)
    cfg = [(input_nc, ndf, 2, False, True, True)]
    nf_mult = 1
    for n in range(1, n_layers):
        nf_prev, nf_mult = nf_mult, min(2 ** n, 8)
        cfg.append((ndf * nf_prev, ndf * nf_mult, 2, True, True, False))
    nf_prev, nf_mult = nf_mult, min(2 ** n_layers, 8)
    cfg.append((ndf * nf_prev, ndf * nf_mult, 1, True, True, False))
    head_cin = ndf * nf_mult

    static_cfg, params = [], []
    for (cin, cout, stride, norm, act, bias) in cfg:
        key, kw_, kb_ = jax.random.split(key, 3)
        w = 0.1 * jax.random.normal(kw_, (4, 4, cin, cout), jnp.float32)
        if stride == 2:
            # Pre-apply the space-to-depth rearrangement: channel groups are
            # (qh, qw, ci), matching the activation s2d layout in _conv_layer.
            w = (w.reshape(2, 2, 2, 2, cin, cout)
                   .transpose(0, 2, 1, 3, 4, 5)
                   .reshape(2, 2, 4 * cin, cout))
        w2d = w.reshape(-1, cout).astype(param_dtype)    # (KH*KW*CIK, CO)
        b = (0.1 * jax.random.normal(kb_, (1, cout), jnp.float32)
             if bias else None)
        params.append((w2d, b))
        static_cfg.append((stride, norm, act))

    key, kw_, kb_ = jax.random.split(key, 3)
    wh = 0.1 * jax.random.normal(kw_, (4, 4, head_cin, 1), jnp.float32)
    head_w = wh.reshape(1, 1, 4 * 4 * head_cin)          # (1, 1, K), f32
    head_b = 0.1 * jax.random.normal(kb_, (1, 1), jnp.float32)
    return tuple(static_cfg), params, (head_w, head_b)


def nlayer_discriminator(x_nchw, params, head_params, static_cfg,
                         act_dtype=jnp.bfloat16):
    """PatchGAN discriminator forward.  NCHW in / NCHW out (PyTorch
    convention); internally NHWC/bf16 so channels sit on the TPU lane axis."""
    x = jnp.transpose(x_nchw, (0, 2, 3, 1)).astype(act_dtype)   # NCHW -> NHWC
    for (w2d, b), (stride, norm, act) in zip(params, static_cfg):
        x = _conv_layer(x, w2d, b, stride=stride, instance_norm=norm,
                        leaky_relu=act, out_dtype=act_dtype)
    head_w, head_b = head_params
    out = _head_layer(x, head_w, head_b)        # (N, HO, WO) f32, lane-dense
    return out[:, None, :, :]                   # NCHW (N, 1, HO, WO)


if __name__ == "__main__":
    key = jax.random.PRNGKey(0)
    kx, kp = jax.random.split(key)

    # Small test shapes: 32x32 input so that 3 stride-2 convs + 2 stride-1
    # k=4 convs all have valid (>=1) output spatial extents.
    N, C, H, W = 2, 4, 32, 32
    x = jax.random.normal(kx, (N, C, H, W), jnp.float32)

    static_cfg, params, head_params = build_discriminator(
        kp, input_nc=C, ndf=8, n_layers=3)

    fwd = jax.jit(functools.partial(nlayer_discriminator,
                                    static_cfg=static_cfg))
    out = fwd(x, params, head_params)
    jax.block_until_ready(out)

    # PatchGAN output: (N, 1, 2, 2) for a 32x32 input with n_layers=3.
    assert out.shape == (N, 1, 2, 2) and out.dtype == jnp.float32
    assert bool(jnp.all(jnp.isfinite(out)))
    print("KERNEL_OK")
</pallas_src>

<mosaic_0001>
module attributes {stable_mosaic.version = 11 : i64} {
  func.func @_conv_block_kernel(%arg0: i32, %arg1: memref<1x17x17x16xbf16, #tpu.memory_space<vmem>>, %arg2: memref<64x8xbf16, #tpu.memory_space<vmem>>, %arg3: memref<1x8xf32, #tpu.memory_space<vmem>>, %arg4: memref<1x16x16x8xbf16, #tpu.memory_space<vmem>>) attributes {dimension_semantics = [#tpu.dimension_semantics<parallel>], iteration_bounds = array<i64: 2>, scalar_prefetch = 0 : i64, scratch_operands = 0 : i64, tpu.core_type = #tpu.core_type<tc>, window_params = [{transform_indices = @transform_0, window_bounds = array<i64: 1, 17, 17, 16>}, {pipeline_mode = #tpu.pipeline_mode<synchronous>, transform_indices = @transform_1, window_bounds = array<i64: 64, 8>}, {pipeline_mode = #tpu.pipeline_mode<synchronous>, transform_indices = @transform_2, window_bounds = array<i64: 1, 8>}, {transform_indices = @transform_3, window_bounds = array<i64: 1, 16, 16, 8>}]} {
    %c0 = arith.constant 0 : index
    %c0_0 = arith.constant 0 : index
    %c0_1 = arith.constant 0 : index
    %c0_2 = arith.constant 0 : index
    %0 = vector.load %arg1[%c0, %c0_0, %c0_1, %c0_2] : memref<1x17x17x16xbf16, #tpu.memory_space<vmem>>, vector<1x17x16x16xbf16>
    %1 = vector.shape_cast %0 : vector<1x17x16x16xbf16> to vector<17x16x16xbf16>
    %c0_3 = arith.constant 0 : index
    %c0_4 = arith.constant 0 : index
    %c1 = arith.constant 1 : index
    %c0_5 = arith.constant 0 : index
    %2 = vector.load %arg1[%c0_3, %c0_4, %c1, %c0_5] : memref<1x17x17x16xbf16, #tpu.memory_space<vmem>>, vector<1x17x16x16xbf16>
    %3 = vector.shape_cast %2 : vector<1x17x16x16xbf16> to vector<17x16x16xbf16>
    %4 = tpu.concatenate %1, %3 in 2 : vector<17x16x16xbf16>, vector<17x16x16xbf16> -> vector<17x16x32xbf16>
    %5 = vector.extract_strided_slice %4 {offsets = [0, 0, 0], sizes = [16, 16, 32], strides = [1, 1, 1]} : vector<17x16x32xbf16> to vector<16x16x32xbf16>
    %6 = vector.extract_strided_slice %4 {offsets = [1, 0, 0], sizes = [16, 16, 32], strides = [1, 1, 1]} : vector<17x16x32xbf16> to vector<16x16x32xbf16>
    %7 = tpu.concatenate %5, %6 in 2 : vector<16x16x32xbf16>, vector<16x16x32xbf16> -> vector<16x16x64xbf16>
    %8 = vector.shape_cast %7 : vector<16x16x64xbf16> to vector<256x64xbf16>
    %c0_6 = arith.constant 0 : index
    %c0_7 = arith.constant 0 : index
    %9 = vector.load %arg2[%c0_6, %c0_7] : memref<64x8xbf16, #tpu.memory_space<vmem>>, vector<64x8xbf16>
    %cst = arith.constant dense<0.000000e+00> : vector<256x8xf32>
    %10 = tpu.matmul %8, %9, %cst {dimension_numbers = #tpu.dot_dimension_numbers<[1], [0], [0], [1], [0, 0, 1, 1], [], []>} : vector<256x64xbf16>, vector<64x8xbf16>, vector<256x8xf32> -> vector<256x8xf32>
    %c0_8 = arith.constant 0 : index
    %c0_9 = arith.constant 0 : index
    %11 = vector.load %arg3[%c0_8, %c0_9] : memref<1x8xf32, #tpu.memory_space<vmem>>, vector<1x8xf32>
    %12 = vector.broadcast %11 : vector<1x8xf32> to vector<256x8xf32>
    %13 = arith.addf %10, %12 : vector<256x8xf32>
    %cst_10 = arith.constant 2.000000e-01 : f32
    %14 = vector.broadcast %cst_10 : f32 to vector<256x8xf32>
    %15 = arith.mulf %14, %13 : vector<256x8xf32>
    %16 = arith.maximumf %13, %15 : vector<256x8xf32>
    %17 = vector.shape_cast %16 : vector<256x8xf32> to vector<1x16x16x8xf32>
    %18 = arith.truncf %17 : vector<1x16x16x8xf32> to vector<1x16x16x8xbf16>
    %c0_11 = arith.constant 0 : index
    %c0_12 = arith.constant 0 : index
    %c0_13 = arith.constant 0 : index
    %c0_14 = arith.constant 0 : index
    %19 = vector.load %arg4[%c0_11, %c0_12, %c0_13, %c0_14] : memref<1x16x16x8xbf16, #tpu.memory_space<vmem>>, vector<1x16x16x8xbf16>
    tpu.vector_store %arg4[%c0_11, %c0_12, %c0_13, %c0_14], %18 {strides = array<i32>} : memref<1x16x16x8xbf16, #tpu.memory_space<vmem>>, vector<1x16x16x8xbf16>,
    return
  }
  func.func @transform_0(%arg0: i32) -> (i32, i32, i32, i32) {
    %c0_i32 = arith.constant 0 : i32
    %c0_i32_0 = arith.constant 0 : i32
    %c0_i32_1 = arith.constant 0 : i32
    %c0_i32_2 = arith.constant 0 : i32
    return %arg0, %c0_i32, %c0_i32_0, %c0_i32_1 : i32, i32, i32, i32
  }
  func.func @transform_1(%arg0: i32) -> (i32, i32) {
    %c0_i32 = arith.constant 0 : i32
    %c0_i32_0 = arith.constant 0 : i32
    %c0_i32_1 = arith.constant 0 : i32
    return %c0_i32, %c0_i32_0 : i32, i32
  }
  func.func @transform_2(%arg0: i32) -> (i32, i32) {
    %c0_i32 = arith.constant 0 : i32
    %c0_i32_0 = arith.constant 0 : i32
    %c0_i32_1 = arith.constant 0 : i32
    return %c0_i32, %c0_i32_0 : i32, i32
  }
  func.func @transform_3(%arg0: i32) -> (i32, i32, i32, i32) {
    %c0_i32 = arith.constant 0 : i32
    %c0_i32_0 = arith.constant 0 : i32
    %c0_i32_1 = arith.constant 0 : i32
    %c0_i32_2 = arith.constant 0 : i32
    return %arg0, %c0_i32, %c0_i32_0, %c0_i32_1 : i32, i32, i32, i32
  }
}

module attributes {stable_mosaic.version = 11 : i64} {
  func.func @_conv_block_kernel(%arg0: i32, %arg1: memref<1x9x9x32xbf16, #tpu.memory_space<vmem>>, %arg2: memref<128x16xbf16, #tpu.memory_space<vmem>>, %arg3: memref<1x8x8x16xbf16, #tpu.memory_space<vmem>>) attributes {dimension_semantics = [#tpu.dimension_semantics<parallel>], iteration_bounds = array<i64: 2>, scalar_prefetch = 0 : i64, scratch_operands = 0 : i64, tpu.core_type = #tpu.core_type<tc>, window_params = [{transform_indices = @transform_0, window_bounds = array<i64: 1, 9, 9, 32>}, {pipeline_mode = #tpu.pipeline_mode<synchronous>, transform_indices = @transform_1, window_bounds = array<i64: 128, 16>}, {transform_indices = @transform_2, window_bounds = array<i64: 1, 8, 8, 16>}]} {
    %c0 = arith.constant 0 : index
    %c0_0 = arith.constant 0 : index
    %c0_1 = arith.constant 0 : index
    %c0_2 = arith.constant 0 : index
    %0 = vector.load %arg1[%c0, %c0_0, %c0_1, %c0_2] : memref<1x9x9x32xbf16, #tpu.memory_space<vmem>>, vector<1x9x8x32xbf16>
    %1 = vector.shape_cast %0 : vector<1x9x8x32xbf16> to vector<9x8x32xbf16>
    %c0_3 = arith.constant 0 : index
    %c0_4 = arith.constant 0 : index
    %c1 = arith.constant 1 : index
    %c0_5 = arith.constant 0 : index
    %2 = vector.load %arg1[%c0_3, %c0_4, %c1, %c0_5] : memref<1x9x9x32xbf16, #tpu.memory_space<vmem>>, vector<1x9x8x32xbf16>
    %3 = vector.shape_cast %2 : vector<1x9x8x32xbf16> to vector<9x8x32xbf16>
    %4 = tpu.concatenate %1, %3 in 2 : vector<9x8x32xbf16>, vector<9x8x32xbf16> -> vector<9x8x64xbf16>
    %5 = vector.extract_strided_slice %4 {offsets = [0, 0, 0], sizes = [8, 8, 64], strides = [1, 1, 1]} : vector<9x8x64xbf16> to vector<8x8x64xbf16>
    %6 = vector.extract_strided_slice %4 {offsets = [1, 0, 0], sizes = [8, 8, 64], strides = [1, 1, 1]} : vector<9x8x64xbf16> to vector<8x8x64xbf16>
    %7 = tpu.concatenate %5, %6 in 2 : vector<8x8x64xbf16>, vector<8x8x64xbf16> -> vector<8x8x128xbf16>
    %8 = vector.shape_cast %7 : vector<8x8x128xbf16> to vector<64x128xbf16>
    %c0_6 = arith.constant 0 : index
    %c0_7 = arith.constant 0 : index
    %9 = vector.load %arg2[%c0_6, %c0_7] : memref<128x16xbf16, #tpu.memory_space<vmem>>, vector<128x16xbf16>
    %cst = arith.constant dense<0.000000e+00> : vector<64x16xf32>
    %10 = tpu.matmul %8, %9, %cst {dimension_numbers = #tpu.dot_dimension_numbers<[1], [0], [0], [1], [0, 0, 1, 1], [], []>} : vector<64x128xbf16>, vector<128x16xbf16>, vector<64x16xf32> -> vector<64x16xf32>
    %cst_8 = arith.constant dense<0.000000e+00> : vector<16xf32>
    %11 = vector.multi_reduction <add>, %10, %cst_8 [0] : vector<64x16xf32> to vector<16xf32>
    %12 = vector.shape_cast %11 : vector<16xf32> to vector<1x16xf32>
    %cst_9 = arith.constant 1.562500e-02 : f32
    %13 = vector.broadcast %cst_9 : f32 to vector<1x16xf32>
    %14 = arith.mulf %12, %13 : vector<1x16xf32>
    %15 = arith.mulf %10, %10 : vector<64x16xf32>
    %cst_10 = arith.constant dense<0.000000e+00> : vector<16xf32>
    %16 = vector.multi_reduction <add>, %15, %cst_10 [0] : vector<64x16xf32> to vector<16xf32>
    %17 = vector.shape_cast %16 : vector<16xf32> to vector<1x16xf32>
    %cst_11 = arith.constant 1.562500e-02 : f32
    %18 = vector.broadcast %cst_11 : f32 to vector<1x16xf32>
    %19 = arith.mulf %17, %18 : vector<1x16xf32>
    %20 = arith.mulf %14, %14 : vector<1x16xf32>
    %21 = arith.subf %19, %20 : vector<1x16xf32>
    %cst_12 = arith.constant 0.000000e+00 : f32
    %22 = vector.broadcast %cst_12 : f32 to vector<1x16xf32>
    %23 = arith.maximumf %21, %22 : vector<1x16xf32>
    %24 = vector.broadcast %14 : vector<1x16xf32> to vector<64x16xf32>
    %25 = arith.subf %10, %24 : vector<64x16xf32>
    %cst_13 = arith.constant 9.99999974E-6 : f32
    %26 = vector.broadcast %cst_13 : f32 to vector<1x16xf32>
    %27 = arith.addf %23, %26 : vector<1x16xf32>
    %28 = math.rsqrt %27 : vector<1x16xf32>
    %29 = vector.broadcast %28 : vector<1x16xf32> to vector<64x16xf32>
    %30 = arith.mulf %25, %29 : vector<64x16xf32>
    %cst_14 = arith.constant 2.000000e-01 : f32
    %31 = vector.broadcast %cst_14 : f32 to vector<64x16xf32>
    %32 = arith.mulf %31, %30 : vector<64x16xf32>
    %33 = arith.maximumf %30, %32 : vector<64x16xf32>
    %34 = vector.shape_cast %33 : vector<64x16xf32> to vector<1x8x8x16xf32>
    %35 = arith.truncf %34 : vector<1x8x8x16xf32> to vector<1x8x8x16xbf16>
    %c0_15 = arith.constant 0 : index
    %c0_16 = arith.constant 0 : index
    %c0_17 = arith.constant 0 : index
    %c0_18 = arith.constant 0 : index
    %36 = vector.load %arg3[%c0_15, %c0_16, %c0_17, %c0_18] : memref<1x8x8x16xbf16, #tpu.memory_space<vmem>>, vector<1x8x8x16xbf16>
    tpu.vector_store %arg3[%c0_15, %c0_16, %c0_17, %c0_18], %35 {strides = array<i32>} : memref<1x8x8x16xbf16, #tpu.memory_space<vmem>>, vector<1x8x8x16xbf16>,
    return
  }
  func.func @transform_0(%arg0: i32) -> (i32, i32, i32, i32) {
    %c0_i32 = arith.constant 0 : i32
    %c0_i32_0 = arith.constant 0 : i32
    %c0_i32_1 = arith.constant 0 : i32
    %c0_i32_2 = arith.constant 0 : i32
    return %arg0, %c0_i32, %c0_i32_0, %c0_i32_1 : i32, i32, i32, i32
  }
  func.func @transform_1(%arg0: i32) -> (i32, i32) {
    %c0_i32 = arith.constant 0 : i32
    %c0_i32_0 = arith.constant 0 : i32
    %c0_i32_1 = arith.constant 0 : i32
    return %c0_i32, %c0_i32_0 : i32, i32
  }
  func.func @transform_2(%arg0: i32) -> (i32, i32, i32, i32) {
    %c0_i32 = arith.constant 0 : i32
    %c0_i32_0 = arith.constant 0 : i32
    %c0_i32_1 = arith.constant 0 : i32
    %c0_i32_2 = arith.constant 0 : i32
    return %arg0, %c0_i32, %c0_i32_0, %c0_i32_1 : i32, i32, i32, i32
  }
}

module attributes {stable_mosaic.version = 11 : i64} {
  func.func @_conv_block_kernel(%arg0: i32, %arg1: memref<1x5x5x64xbf16, #tpu.memory_space<vmem>>, %arg2: memref<256x32xbf16, #tpu.memory_space<vmem>>, %arg3: memref<1x4x4x32xbf16, #tpu.memory_space<vmem>>) attributes {dimension_semantics = [#tpu.dimension_semantics<parallel>], iteration_bounds = array<i64: 2>, scalar_prefetch = 0 : i64, scratch_operands = 0 : i64, tpu.core_type = #tpu.core_type<tc>, window_params = [{transform_indices = @transform_0, window_bounds = array<i64: 1, 5, 5, 64>}, {pipeline_mode = #tpu.pipeline_mode<synchronous>, transform_indices = @transform_1, window_bounds = array<i64: 256, 32>}, {transform_indices = @transform_2, window_bounds = array<i64: 1, 4, 4, 32>}]} {
    %c0 = arith.constant 0 : index
    %c0_0 = arith.constant 0 : index
    %c0_1 = arith.constant 0 : index
    %c0_2 = arith.constant 0 : index
    %0 = vector.load %arg1[%c0, %c0_0, %c0_1, %c0_2] : memref<1x5x5x64xbf16, #tpu.memory_space<vmem>>, vector<1x5x4x64xbf16>
    %1 = vector.shape_cast %0 : vector<1x5x4x64xbf16> to vector<5x4x64xbf16>
    %c0_3 = arith.constant 0 : index
    %c0_4 = arith.constant 0 : index
    %c1 = arith.constant 1 : index
    %c0_5 = arith.constant 0 : index
    %2 = vector.load %arg1[%c0_3, %c0_4, %c1, %c0_5] : memref<1x5x5x64xbf16, #tpu.memory_space<vmem>>, vector<1x5x4x64xbf16>
    %3 = vector.shape_cast %2 : vector<1x5x4x64xbf16> to vector<5x4x64xbf16>
    %4 = tpu.concatenate %1, %3 in 2 : vector<5x4x64xbf16>, vector<5x4x64xbf16> -> vector<5x4x128xbf16>
    %5 = vector.extract_strided_slice %4 {offsets = [0, 0, 0], sizes = [4, 4, 128], strides = [1, 1, 1]} : vector<5x4x128xbf16> to vector<4x4x128xbf16>
    %6 = vector.extract_strided_slice %4 {offsets = [1, 0, 0], sizes = [4, 4, 128], strides = [1, 1, 1]} : vector<5x4x128xbf16> to vector<4x4x128xbf16>
    %7 = tpu.concatenate %5, %6 in 2 : vector<4x4x128xbf16>, vector<4x4x128xbf16> -> vector<4x4x256xbf16>
    %8 = vector.shape_cast %7 : vector<4x4x256xbf16> to vector<16x256xbf16>
    %c0_6 = arith.constant 0 : index
    %c0_7 = arith.constant 0 : index
    %9 = vector.load %arg2[%c0_6, %c0_7] : memref<256x32xbf16, #tpu.memory_space<vmem>>, vector<256x32xbf16>
    %cst = arith.constant dense<0.000000e+00> : vector<16x32xf32>
    %10 = tpu.matmul %8, %9, %cst {dimension_numbers = #tpu.dot_dimension_numbers<[1], [0], [0], [1], [0, 0, 1, 1], [], []>} : vector<16x256xbf16>, vector<256x32xbf16>, vector<16x32xf32> -> vector<16x32xf32>
    %cst_8 = arith.constant dense<0.000000e+00> : vector<32xf32>
    %11 = vector.multi_reduction <add>, %10, %cst_8 [0] : vector<16x32xf32> to vector<32xf32>
    %12 = vector.shape_cast %11 : vector<32xf32> to vector<1x32xf32>
    %cst_9 = arith.constant 6.250000e-02 : f32
    %13 = vector.broadcast %cst_9 : f32 to vector<1x32xf32>
    %14 = arith.mulf %12, %13 : vector<1x32xf32>
    %15 = arith.mulf %10, %10 : vector<16x32xf32>
    %cst_10 = arith.constant dense<0.000000e+00> : vector<32xf32>
    %16 = vector.multi_reduction <add>, %15, %cst_10 [0] : vector<16x32xf32> to vector<32xf32>
    %17 = vector.shape_cast %16 : vector<32xf32> to vector<1x32xf32>
    %cst_11 = arith.constant 6.250000e-02 : f32
    %18 = vector.broadcast %cst_11 : f32 to vector<1x32xf32>
    %19 = arith.mulf %17, %18 : vector<1x32xf32>
    %20 = arith.mulf %14, %14 : vector<1x32xf32>
    %21 = arith.subf %19, %20 : vector<1x32xf32>
    %cst_12 = arith.constant 0.000000e+00 : f32
    %22 = vector.broadcast %cst_12 : f32 to vector<1x32xf32>
    %23 = arith.maximumf %21, %22 : vector<1x32xf32>
    %24 = vector.broadcast %14 : vector<1x32xf32> to vector<16x32xf32>
    %25 = arith.subf %10, %24 : vector<16x32xf32>
    %cst_13 = arith.constant 9.99999974E-6 : f32
    %26 = vector.broadcast %cst_13 : f32 to vector<1x32xf32>
    %27 = arith.addf %23, %26 : vector<1x32xf32>
    %28 = math.rsqrt %27 : vector<1x32xf32>
    %29 = vector.broadcast %28 : vector<1x32xf32> to vector<16x32xf32>
    %30 = arith.mulf %25, %29 : vector<16x32xf32>
    %cst_14 = arith.constant 2.000000e-01 : f32
    %31 = vector.broadcast %cst_14 : f32 to vector<16x32xf32>
    %32 = arith.mulf %31, %30 : vector<16x32xf32>
    %33 = arith.maximumf %30, %32 : vector<16x32xf32>
    %34 = vector.shape_cast %33 : vector<16x32xf32> to vector<1x4x4x32xf32>
    %35 = arith.truncf %34 : vector<1x4x4x32xf32> to vector<1x4x4x32xbf16>
    %c0_15 = arith.constant 0 : index
    %c0_16 = arith.constant 0 : index
    %c0_17 = arith.constant 0 : index
    %c0_18 = arith.constant 0 : index
    %36 = vector.load %arg3[%c0_15, %c0_16, %c0_17, %c0_18] : memref<1x4x4x32xbf16, #tpu.memory_space<vmem>>, vector<1x4x4x32xbf16>
    tpu.vector_store %arg3[%c0_15, %c0_16, %c0_17, %c0_18], %35 {strides = array<i32>} : memref<1x4x4x32xbf16, #tpu.memory_space<vmem>>, vector<1x4x4x32xbf16>,
    return
  }
  func.func @transform_0(%arg0: i32) -> (i32, i32, i32, i32) {
    %c0_i32 = arith.constant 0 : i32
    %c0_i32_0 = arith.constant 0 : i32
    %c0_i32_1 = arith.constant 0 : i32
    %c0_i32_2 = arith.constant 0 : i32
    return %arg0, %c0_i32, %c0_i32_0, %c0_i32_1 : i32, i32, i32, i32
  }
  func.func @transform_1(%arg0: i32) -> (i32, i32) {
    %c0_i32 = arith.constant 0 : i32
    %c0_i32_0 = arith.constant 0 : i32
    %c0_i32_1 = arith.constant 0 : i32
    return %c0_i32, %c0_i32_0 : i32, i32
  }
  func.func @transform_2(%arg0: i32) -> (i32, i32, i32, i32) {
    %c0_i32 = arith.constant 0 : i32
    %c0_i32_0 = arith.constant 0 : i32
    %c0_i32_1 = arith.constant 0 : i32
    %c0_i32_2 = arith.constant 0 : i32
    return %arg0, %c0_i32, %c0_i32_0, %c0_i32_1 : i32, i32, i32, i32
  }
}

module attributes {stable_mosaic.version = 11 : i64} {
  func.func @_conv_block_kernel(%arg0: i32, %arg1: memref<1x6x6x32xbf16, #tpu.memory_space<vmem>>, %arg2: memref<512x64xbf16, #tpu.memory_space<vmem>>, %arg3: memref<1x3x3x64xbf16, #tpu.memory_space<vmem>>) attributes {dimension_semantics = [#tpu.dimension_semantics<parallel>], iteration_bounds = array<i64: 2>, scalar_prefetch = 0 : i64, scratch_operands = 0 : i64, tpu.core_type = #tpu.core_type<tc>, window_params = [{transform_indices = @transform_0, window_bounds = array<i64: 1, 6, 6, 32>}, {pipeline_mode = #tpu.pipeline_mode<synchronous>, transform_indices = @transform_1, window_bounds = array<i64: 512, 64>}, {transform_indices = @transform_2, window_bounds = array<i64: 1, 3, 3, 64>}]} {
    %c0 = arith.constant 0 : index
    %c0_0 = arith.constant 0 : index
    %c0_1 = arith.constant 0 : index
    %c0_2 = arith.constant 0 : index
    %0 = vector.load %arg1[%c0, %c0_0, %c0_1, %c0_2] : memref<1x6x6x32xbf16, #tpu.memory_space<vmem>>, vector<1x6x3x32xbf16>
    %1 = vector.shape_cast %0 : vector<1x6x3x32xbf16> to vector<6x3x32xbf16>
    %c0_3 = arith.constant 0 : index
    %c0_4 = arith.constant 0 : index
    %c1 = arith.constant 1 : index
    %c0_5 = arith.constant 0 : index
    %2 = vector.load %arg1[%c0_3, %c0_4, %c1, %c0_5] : memref<1x6x6x32xbf16, #tpu.memory_space<vmem>>, vector<1x6x3x32xbf16>
    %3 = vector.shape_cast %2 : vector<1x6x3x32xbf16> to vector<6x3x32xbf16>
    %c0_6 = arith.constant 0 : index
    %c0_7 = arith.constant 0 : index
    %c2 = arith.constant 2 : index
    %c0_8 = arith.constant 0 : index
    %4 = vector.load %arg1[%c0_6, %c0_7, %c2, %c0_8] : memref<1x6x6x32xbf16, #tpu.memory_space<vmem>>, vector<1x6x3x32xbf16>
    %5 = vector.shape_cast %4 : vector<1x6x3x32xbf16> to vector<6x3x32xbf16>
    %c0_9 = arith.constant 0 : index
    %c0_10 = arith.constant 0 : index
    %c3 = arith.constant 3 : index
    %c0_11 = arith.constant 0 : index
    %6 = vector.load %arg1[%c0_9, %c0_10, %c3, %c0_11] : memref<1x6x6x32xbf16, #tpu.memory_space<vmem>>, vector<1x6x3x32xbf16>
    %7 = vector.shape_cast %6 : vector<1x6x3x32xbf16> to vector<6x3x32xbf16>
    %8 = tpu.concatenate %1, %3, %5, %7 in 2 : vector<6x3x32xbf16>, vector<6x3x32xbf16>, vector<6x3x32xbf16>, vector<6x3x32xbf16> -> vector<6x3x128xbf16>
    %9 = vector.extract_strided_slice %8 {offsets = [0, 0, 0], sizes = [3, 3, 128], strides = [1, 1, 1]} : vector<6x3x128xbf16> to vector<3x3x128xbf16>
    %10 = vector.extract_strided_slice %8 {offsets = [1, 0, 0], sizes = [3, 3, 128], strides = [1, 1, 1]} : vector<6x3x128xbf16> to vector<3x3x128xbf16>
    %11 = vector.extract_strided_slice %8 {offsets = [2, 0, 0], sizes = [3, 3, 128], strides = [1, 1, 1]} : vector<6x3x128xbf16> to vector<3x3x128xbf16>
    %12 = vector.extract_strided_slice %8 {offsets = [3, 0, 0], sizes = [3, 3, 128], strides = [1, 1, 1]} : vector<6x3x128xbf16> to vector<3x3x128xbf16>
    %13 = tpu.concatenate %9, %10, %11, %12 in 2 : vector<3x3x128xbf16>, vector<3x3x128xbf16>, vector<3x3x128xbf16>, vector<3x3x128xbf16> -> vector<3x3x512xbf16>
    %14 = vector.shape_cast %13 : vector<3x3x512xbf16> to vector<9x512xbf16>
    %c0_12 = arith.constant 0 : index
    %c0_13 = arith.constant 0 : index
    %15 = vector.load %arg2[%c0_12, %c0_13] : memref<512x64xbf16, #tpu.memory_space<vmem>>, vector<512x64xbf16>
    %cst = arith.constant dense<0.000000e+00> : vector<9x64xf32>
    %16 = tpu.matmul %14, %15, %cst {dimension_numbers = #tpu.dot_dimension_numbers<[1], [0], [0], [1], [0, 0, 1, 1], [], []>} : vector<9x512xbf16>, vector<512x64xbf16>, vector<9x64xf32> -> vector<9x64xf32>
    %cst_14 = arith.constant dense<0.000000e+00> : vector<64xf32>
    %17 = vector.multi_reduction <add>, %16, %cst_14 [0] : vector<9x64xf32> to vector<64xf32>
    %18 = vector.shape_cast %17 : vector<64xf32> to vector<1x64xf32>
    %cst_15 = arith.constant 0.111111112 : f32
    %19 = vector.broadcast %cst_15 : f32 to vector<1x64xf32>
    %20 = arith.mulf %18, %19 : vector<1x64xf32>
    %21 = arith.mulf %16, %16 : vector<9x64xf32>
    %cst_16 = arith.constant dense<0.000000e+00> : vector<64xf32>
    %22 = vector.multi_reduction <add>, %21, %cst_16 [0] : vector<9x64xf32> to vector<64xf32>
    %23 = vector.shape_cast %22 : vector<64xf32> to vector<1x64xf32>
    %cst_17 = arith.constant 0.111111112 : f32
    %24 = vector.broadcast %cst_17 : f32 to vector<1x64xf32>
    %25 = arith.mulf %23, %24 : vector<1x64xf32>
    %26 = arith.mulf %20, %20 : vector<1x64xf32>
    %27 = arith.subf %25, %26 : vector<1x64xf32>
    %cst_18 = arith.constant 0.000000e+00 : f32
    %28 = vector.broadcast %cst_18 : f32 to vector<1x64xf32>
    %29 = arith.maximumf %27, %28 : vector<1x64xf32>
    %30 = vector.broadcast %20 : vector<1x64xf32> to vector<9x64xf32>
    %31 = arith.subf %16, %30 : vector<9x64xf32>
    %cst_19 = arith.constant 9.99999974E-6 : f32
    %32 = vector.broadcast %cst_19 : f32 to vector<1x64xf32>
    %33 = arith.addf %29, %32 : vector<1x64xf32>
    %34 = math.rsqrt %33 : vector<1x64xf32>
    %35 = vector.broadcast %34 : vector<1x64xf32> to vector<9x64xf32>
    %36 = arith.mulf %31, %35 : vector<9x64xf32>
    %cst_20 = arith.constant 2.000000e-01 : f32
    %37 = vector.broadcast %cst_20 : f32 to vector<9x64xf32>
    %38 = arith.mulf %37, %36 : vector<9x64xf32>
    %39 = arith.maximumf %36, %38 : vector<9x64xf32>
    %40 = vector.shape_cast %39 : vector<9x64xf32> to vector<1x3x3x64xf32>
    %41 = arith.truncf %40 : vector<1x3x3x64xf32> to vector<1x3x3x64xbf16>
    %c0_21 = arith.constant 0 : index
    %c0_22 = arith.constant 0 : index
    %c0_23 = arith.constant 0 : index
    %c0_24 = arith.constant 0 : index
    %42 = vector.load %arg3[%c0_21, %c0_22, %c0_23, %c0_24] : memref<1x3x3x64xbf16, #tpu.memory_space<vmem>>, vector<1x3x3x64xbf16>
    tpu.vector_store %arg3[%c0_21, %c0_22, %c0_23, %c0_24], %41 {strides = array<i32>} : memref<1x3x3x64xbf16, #tpu.memory_space<vmem>>, vector<1x3x3x64xbf16>,
    return
  }
  func.func @transform_0(%arg0: i32) -> (i32, i32, i32, i32) {
    %c0_i32 = arith.constant 0 : i32
    %c0_i32_0 = arith.constant 0 : i32
    %c0_i32_1 = arith.constant 0 : i32
    %c0_i32_2 = arith.constant 0 : i32
    return %arg0, %c0_i32, %c0_i32_0, %c0_i32_1 : i32, i32, i32, i32
  }
  func.func @transform_1(%arg0: i32) -> (i32, i32) {
    %c0_i32 = arith.constant 0 : i32
    %c0_i32_0 = arith.constant 0 : i32
    %c0_i32_1 = arith.constant 0 : i32
    return %c0_i32, %c0_i32_0 : i32, i32
  }
  func.func @transform_2(%arg0: i32) -> (i32, i32, i32, i32) {
    %c0_i32 = arith.constant 0 : i32
    %c0_i32_0 = arith.constant 0 : i32
    %c0_i32_1 = arith.constant 0 : i32
    %c0_i32_2 = arith.constant 0 : i32
    return %arg0, %c0_i32, %c0_i32_0, %c0_i32_1 : i32, i32, i32, i32
  }
}

module attributes {stable_mosaic.version = 11 : i64} {
  func.func @_head_kernel(%arg0: i32, %arg1: memref<1x5x5x64xbf16, #tpu.memory_space<vmem>>, %arg2: memref<1x1x1024xf32, #tpu.memory_space<vmem>>, %arg3: memref<1x1xf32, #tpu.memory_space<vmem>>, %arg4: memref<1x2x2xf32, #tpu.memory_space<vmem>>) attributes {dimension_semantics = [#tpu.dimension_semantics<parallel>], iteration_bounds = array<i64: 2>, scalar_prefetch = 0 : i64, scratch_operands = 0 : i64, tpu.core_type = #tpu.core_type<tc>, window_params = [{transform_indices = @transform_0, window_bounds = array<i64: 1, 5, 5, 64>}, {pipeline_mode = #tpu.pipeline_mode<synchronous>, transform_indices = @transform_1, window_bounds = array<i64: 1, 1, 1024>}, {pipeline_mode = #tpu.pipeline_mode<synchronous>, transform_indices = @transform_2, window_bounds = array<i64: 1, 1>}, {transform_indices = @transform_3, window_bounds = array<i64: 1, 2, 2>}]} {
    %c0 = arith.constant 0 : index
    %c0_0 = arith.constant 0 : index
    %c0_1 = arith.constant 0 : index
    %c0_2 = arith.constant 0 : index
    %0 = vector.load %arg1[%c0, %c0_0, %c0_1, %c0_2] : memref<1x5x5x64xbf16, #tpu.memory_space<vmem>>, vector<1x5x2x64xbf16>
    %1 = vector.shape_cast %0 : vector<1x5x2x64xbf16> to vector<5x2x64xbf16>
    %c0_3 = arith.constant 0 : index
    %c0_4 = arith.constant 0 : index
    %c1 = arith.constant 1 : index
    %c0_5 = arith.constant 0 : index
    %2 = vector.load %arg1[%c0_3, %c0_4, %c1, %c0_5] : memref<1x5x5x64xbf16, #tpu.memory_space<vmem>>, vector<1x5x2x64xbf16>
    %3 = vector.shape_cast %2 : vector<1x5x2x64xbf16> to vector<5x2x64xbf16>
    %c0_6 = arith.constant 0 : index
    %c0_7 = arith.constant 0 : index
    %c2 = arith.constant 2 : index
    %c0_8 = arith.constant 0 : index
    %4 = vector.load %arg1[%c0_6, %c0_7, %c2, %c0_8] : memref<1x5x5x64xbf16, #tpu.memory_space<vmem>>, vector<1x5x2x64xbf16>
    %5 = vector.shape_cast %4 : vector<1x5x2x64xbf16> to vector<5x2x64xbf16>
    %c0_9 = arith.constant 0 : index
    %c0_10 = arith.constant 0 : index
    %c3 = arith.constant 3 : index
    %c0_11 = arith.constant 0 : index
    %6 = vector.load %arg1[%c0_9, %c0_10, %c3, %c0_11] : memref<1x5x5x64xbf16, #tpu.memory_space<vmem>>, vector<1x5x2x64xbf16>
    %7 = vector.shape_cast %6 : vector<1x5x2x64xbf16> to vector<5x2x64xbf16>
    %8 = tpu.concatenate %1, %3, %5, %7 in 2 : vector<5x2x64xbf16>, vector<5x2x64xbf16>, vector<5x2x64xbf16>, vector<5x2x64xbf16> -> vector<5x2x256xbf16>
    %9 = vector.extract_strided_slice %8 {offsets = [0, 0, 0], sizes = [2, 2, 256], strides = [1, 1, 1]} : vector<5x2x256xbf16> to vector<2x2x256xbf16>
    %10 = vector.extract_strided_slice %8 {offsets = [1, 0, 0], sizes = [2, 2, 256], strides = [1, 1, 1]} : vector<5x2x256xbf16> to vector<2x2x256xbf16>
    %11 = vector.extract_strided_slice %8 {offsets = [2, 0, 0], sizes = [2, 2, 256], strides = [1, 1, 1]} : vector<5x2x256xbf16> to vector<2x2x256xbf16>
    %12 = vector.extract_strided_slice %8 {offsets = [3, 0, 0], sizes = [2, 2, 256], strides = [1, 1, 1]} : vector<5x2x256xbf16> to vector<2x2x256xbf16>
    %13 = tpu.concatenate %9, %10, %11, %12 in 2 : vector<2x2x256xbf16>, vector<2x2x256xbf16>, vector<2x2x256xbf16>, vector<2x2x256xbf16> -> vector<2x2x1024xbf16>
    %14 = arith.extf %13 : vector<2x2x1024xbf16> to vector<2x2x1024xf32>
    %c0_12 = arith.constant 0 : index
    %c0_13 = arith.constant 0 : index
    %c0_14 = arith.constant 0 : index
    %15 = vector.load %arg2[%c0_12, %c0_13, %c0_14] : memref<1x1x1024xf32, #tpu.memory_space<vmem>>, vector<1x1x1024xf32>
    %16 = vector.broadcast %15 : vector<1x1x1024xf32> to vector<2x2x1024xf32>
    %17 = arith.mulf %14, %16 : vector<2x2x1024xf32>
    %cst = arith.constant dense<0.000000e+00> : vector<2x2xf32>
    %18 = vector.multi_reduction <add>, %17, %cst [2] : vector<2x2x1024xf32> to vector<2x2xf32>
    %c0_15 = arith.constant 0 : index
    %c0_16 = arith.constant 0 : index
    %19 = vector.load %arg3[%c0_15, %c0_16] : memref<1x1xf32, #tpu.memory_space<vmem>>, vector<1x1xf32>
    %20 = vector.broadcast %19 : vector<1x1xf32> to vector<2x2xf32>
    %21 = arith.addf %18, %20 : vector<2x2xf32>
    %22 = vector.shape_cast %21 : vector<2x2xf32> to vector<1x2x2xf32>
    %c0_17 = arith.constant 0 : index
    %c0_18 = arith.constant 0 : index
    %c0_19 = arith.constant 0 : index
    %23 = vector.load %arg4[%c0_17, %c0_18, %c0_19] : memref<1x2x2xf32, #tpu.memory_space<vmem>>, vector<1x2x2xf32>
    tpu.vector_store %arg4[%c0_17, %c0_18, %c0_19], %22 {strides = array<i32>} : memref<1x2x2xf32, #tpu.memory_space<vmem>>, vector<1x2x2xf32>,
    return
  }
  func.func @transform_0(%arg0: i32) -> (i32, i32, i32, i32) {
    %c0_i32 = arith.constant 0 : i32
    %c0_i32_0 = arith.constant 0 : i32
    %c0_i32_1 = arith.constant 0 : i32
    %c0_i32_2 = arith.constant 0 : i32
    return %arg0, %c0_i32, %c0_i32_0, %c0_i32_1 : i32, i32, i32, i32
  }
  func.func @transform_1(%arg0: i32) -> (i32, i32, i32) {
    %c0_i32 = arith.constant 0 : i32
    %c0_i32_0 = arith.constant 0 : i32
    %c0_i32_1 = arith.constant 0 : i32
    %c0_i32_2 = arith.constant 0 : i32
    return %c0_i32, %c0_i32_0, %c0_i32_1 : i32, i32, i32
  }
  func.func @transform_2(%arg0: i32) -> (i32, i32) {
    %c0_i32 = arith.constant 0 : i32
    %c0_i32_0 = arith.constant 0 : i32
    %c0_i32_1 = arith.constant 0 : i32
    return %c0_i32, %c0_i32_0 : i32, i32
  }
  func.func @transform_3(%arg0: i32) -> (i32, i32, i32) {
    %c0_i32 = arith.constant 0 : i32
    %c0_i32_0 = arith.constant 0 : i32
    %c0_i32_1 = arith.constant 0 : i32
    return %arg0, %c0_i32, %c0_i32_0 : i32, i32, i32
  }
}

</mosaic_0001>

<bundles_post_ra>
// kernel: nlayer_discriminator.5
= control target key start
LH: loop header
LB: loop body
LE: loop exit
PB: predicated region body
PF: predicated region fallthrough
CT: control target
= control target key end

     0   :  { %s1242_s12 = smov 0   ;;  %s1638_s0 = inlined_call_operand.vmem [shape: bf16[2,17,17,16], index: 0, kind: input, shape index: {}]   ;;  %s1639_s1 = inlined_call_operand.vmem [shape: bf16[64,8], index: 1, kind: input, shape index: {}]   ;;  %s1640_s2 = inlined_call_operand.vmem [shape: f32[1,8], index: 2, kind: input, shape index: {}]   ;;  %s1641_s3 = inlined_call_operand.vmem [shape: bf16[2,16,16,8], index: 3, kind: output, shape index: {}]  }
   0x1 LB: > { %s1056_s13 = sadd.s32 4294967295, %s1218_s12   ;;  %p1060_p0 = scmp.ge.s32.totalorder %s1218_s12, 1  ;;  %s1218_s12 = sphi %s1242_s12, %s13_s12  }
   0x2   : > { %p137_p1 = scmp.lt.s32.totalorder %s1218_s12, 3 }
   0x4   : > { %p138_p2 = pnand %p1060_p0, %p137_p1 }
   0x5   : > { %p161_p3 = scmp.lt.s32.totalorder (!%p138_p2), %s1056_s13, 1  ;;  %s1220_s18 = smov (!%p138_p2), 16  }
   0x6   : > { %141 = sbr.rel (%p138_p2) target bundleno = 506 (0x1fa), region = 32  ;;  %s1221_s19 = smov (!%p138_p2), 32  }
   0xb   : > { %s1643_s13 = smov (!%p161_p3, %s1056_s13), 1  ;;  %vm359_vm0 = vsmask.f32 7424  ;;  %vm598_vm1 = vcmask 130048   ;;  %vm681_vm2 = vcmask 261120   ;;  %vm750_vm3 = vcmask 523264  }
   0xc   : > { %s1200_s14 = smul.u32 204, %s1643_s13  ;;  %s1166_s30 = sshll.u32 %s1643_s13, 7  ;;  %vm968_vm4 = vcmask 60416  }
   0xd   : > { %s1538_s6 = scalar_lea.vmem %s1641_s3, %s1166_s30 }
   0xe   : > { %s1256_s17 = scalar_lea.vmem %s1638_s0, %s1200_s14 }
   0xf   : > { %v1259_v0 = vld [vmem:[%s1256_s17 + $0x6c] sm:$0xff]  ;;  %v215_v1 = vld [vmem:[%s1256_s17 + $0x74] sm:$0x1]  ;;  %v1267_v5 = vld [vmem:[%s1256_s17 + $0x9c] sm:$0xff] }
  0x10   : > { %v1263_v2 = vld [vmem:[%s1256_s17 + $0xc] sm:$0xff]  ;;  %v334_v3 = vunpack.c.l.b16 %v215_v1  ;;  %v207_v4 = vld [vmem:[%s1256_s17 + $0x14] sm:$0x1]  ;;  %v219_v6 = vld [vmem:[%s1256_s17 + $0xa4] sm:$0x1]  ;;  %v469_v7 = vshrl.u32 %v1259_v0, 16 }
  0x11   : > { %v471_v8 = vshll.u32 %v1259_v0, 16  ;;  %v326_v9 = vunpack.c.l.b16 %v207_v4  ;;  %v211_v10 = vld [vmem:[%s1256_s17 + $0x44] sm:$0x1]  ;;  %v373_v12 = vshrl.u32 %v1263_v2, 16  ;;  %v375_v13 = vshll.u32 %v1263_v2, 16  ;;  %v1276_v15 = vld [vmem:[%s1256_s17 + $0x3c] sm:$0xff] }
  0x12   : > { %v351_v11 = vpack.c.b16 %v334_v3, %v334_v3  ;;  %v338_v14 = vunpack.c.l.b16 %v219_v6  ;;  %v519_v18 = vshll.u32 %v1267_v5, 16  ;;  %v330_v19 = vunpack.c.l.b16 %v211_v10  ;;  %v208_v24 = vld [vmem:[%s1256_s17 + $0x20] sm:$0x1]  ;;  %v1282_v29 = vld [vmem:[%s1256_s17 + $0x18] sm:$0xff]  ;;  %v1287_v38 = vld [vmem:[%s1256_s17 + $0x48] sm:$0xff] }
  0x13   : > { %v473_v16 = vrot.slane %v471_v8, 1  ;;  %v343_v17 = vpack.c.b16 %v326_v9, %v326_v9  ;;  %v377_v21 = vrot.slane %v375_v13, 1  ;;  %v517_v23 = vshrl.u32 %v1267_v5, 16  ;;  %v212_v39 = vld [vmem:[%s1256_s17 + $0x50] sm:$0x1]  ;;  %v1299_v53 = vld [vmem:[%s1256_s17 + $0xb4] sm:$0xff] }
  0x14   : > { %v476_v20 = vshll.u32 %v351_v11, 16  ;;  %v355_v22 = vpack.c.b16 %v338_v14, %v338_v14  ;;  %v521_v27 = vrot.slane %v519_v18, 1  ;;  %v347_v28 = vpack.c.b16 %v330_v19, %v330_v19  ;;  %v221_v47 = vld [vmem:[%s1256_s17 + $0xbc] sm:$0x1]  ;;  %v209_v54 = vld [vmem:[%s1256_s17 + $0x2c] sm:$0x1] }
  0x15   : > { %v474_v25 = vor.u32 %v473_v16, %v469_v7  ;;  %v380_v26 = vshll.u32 %v343_v17, 16  ;;  %v378_v31 = vor.u32 %v377_v21, %v373_v12  ;;  %v423_v33 = vshll.u32 %v1276_v15, 16  ;;  %v1304_v60 = vld [vmem:[%s1256_s17 + $0x24] sm:$0xff]  ;;  %v1307_v61 = vld [vmem:[%s1256_s17 + $0x78] sm:$0xff]  ;;  %v216_v62 = vld [vmem:[%s1256_s17 + $0x80] sm:$0x1] }
  0x16   : > { %v478_v30 = vrot.slane %v476_v20, 1  ;;  %v524_v32 = vshll.u32 %v355_v22, 16  ;;  %v421_v35 = vshrl.u32 %v1276_v15, 16  ;;  %v428_v36 = vshll.u32 %v347_v28, 16  ;;  %v1318_v16 = vld [vmem:[%s1256_s17 + $0xa8] sm:$0xff] }
  0x17   : > { %v382_v34 = vrot.slane %v380_v26, 1  ;;  %v327_v37 = vunpack.c.l.b16 %v208_v24  ;;  %v522_v41 = vor.u32 %v521_v27, %v517_v23  ;;  %v425_v42 = vrot.slane %v423_v33, 1  ;;  %v220_v21 = vld [vmem:[%s1256_s17 + $0xb0] sm:$0x1] }
  0x18   : > { %v479_v40 = vsel %vm359_vm0, %v474_v25, %v478_v30  ;;  %v526_v44 = vrot.slane %v524_v32, 1  ;;  %v387_v46 = vshll.u32 %v1282_v29, 16  ;;  %v331_v48 = vunpack.c.l.b16 %v212_v39  ;;  %v218_v25 = vld [vmem:[%s1256_s17 + $0x98] sm:$0x1] }
  0x19   : > { %582 = vrot.lane.b32.xlu0 %v479_v40, %s1220_s18  ;;  %v383_v43 = vsel %vm359_vm0, %v378_v31, %v382_v34  ;;  %v344_v45 = vpack.c.b16 %v327_v37, %v327_v37  ;;  %v426_v49 = vor.u32 %v425_v42, %v421_v35  ;;  %v430_v50 = vrot.slane %v428_v36, 1  ;;  %v214_v31 = vld [vmem:[%s1256_s17 + $0x68] sm:$0x1]  ;;  %v1329_v36 = vld [vmem:[%s1256_s17 + $0x60] sm:$0xff] }
  0x1a   : > { %566 = vrot.lane.b32.xlu1 %v383_v43, %s1220_s18  ;;  %v385_v51 = vshrl.u32 %v1282_v29, 16  ;;  %v435_v52 = vshll.u32 %v1287_v38, 16  ;;  %v389_v55 = vrot.slane %v387_v46, 1  ;;  %v348_v57 = vpack.c.b16 %v331_v48, %v331_v48  ;;  %v1334_v42 = vld [vmem:[%s1256_s17 + $0x84] sm:$0xff]  ;;  %v217_v43 = vld [vmem:[%s1256_s17 + $0x8c] sm:$0x1] }
  0x1b   : > { %v392_v56 = vshll.u32 %v344_v45, 16  ;;  %v340_v58 = vunpack.c.l.b16 %v221_v47  ;;  %v527_v59 = vsel %vm359_vm0, %v522_v41, %v526_v44  ;;  %v433_v63 = vshrl.u32 %v1287_v38, 16  ;;  %v1338_v44 = vld [vmem:[%s1256_s17 + $0x90] sm:$0xff] }
  0x1c   : > { %v437_v1 = vrot.slane %v435_v52, 1  ;;  %v440_v3 = vshll.u32 %v348_v57, 16  ;;  %v328_v4 = vunpack.c.l.b16 %v209_v54  ;;  %v431_v6 = vsel %vm359_vm0, %v426_v49, %v430_v50 }
  0x1d   : > { %v543_v7 = vshll.u32 %v1299_v53, 16  ;;  %v390_v8 = vor.u32 %v389_v55, %v385_v51  ;;  %v394_v9 = vrot.slane %v392_v56, 1  ;;  %v357_v10 = vpack.c.b16 %v340_v58, %v340_v58 }
  0x1e   : > { %v335_v11 = vunpack.c.l.b16 %v216_v62  ;;  %v399_v12 = vshll.u32 %v1304_v60, 16  ;;  %v481_v13 = vshrl.u32 %v1307_v61, 16  ;;  %v483_v14 = vshll.u32 %v1307_v61, 16 }
  0x1f   : > { %v438_v17 = vor.u32 %v437_v1, %v433_v63  ;;  %v442_v18 = vrot.slane %v440_v3, 1  ;;  %v345_v19 = vpack.c.b16 %v328_v4, %v328_v4  ;;  %v541_v22 = vshrl.u32 %v1299_v53, 16 }
  0x20   : > { %v352_v20 = vpack.c.b16 %v335_v11, %v335_v11  ;;  %v545_v23 = vrot.slane %v543_v7, 1  ;;  %v485_v24 = vrot.slane %v483_v14, 1  ;;  %v395_v26 = vsel %vm359_vm0, %v390_v8, %v394_v9 }
  0x21   : > { %590 = vrot.lane.b32.xlu0 %v527_v59, %s1220_s18  ;;  %v548_v27 = vshll.u32 %v357_v10, 16  ;;  %v397_v28 = vshrl.u32 %v1304_v60, 16  ;;  %v401_v32 = vrot.slane %v399_v12, 1  ;;  %v339_v34 = vunpack.c.l.b16 %v220_v21  ;;  %v1352_v12 = vld [vmem:[%s1256_s17 + $0x54] sm:$0xff] }
  0x22   : > { %574 = vrot.lane.b32.xlu1 %v431_v6, %s1220_s18  ;;  %v488_v30 = vshll.u32 %v352_v20, 16  ;;  %v486_v33 = vor.u32 %v485_v24, %v481_v13  ;;  %v531_v35 = vshll.u32 %v1318_v16, 16  ;;  %v443_v37 = vsel %vm359_vm0, %v438_v17, %v442_v18  ;;  %v213_v6 = vld [vmem:[%s1256_s17 + $0x5c] sm:$0x1] }
  0x23   : > { %v404_v39 = vshll.u32 %v345_v19, 16  ;;  %v529_v41 = vshrl.u32 %v1318_v16, 16  ;;  %v337_v45 = vunpack.c.l.b16 %v218_v25  ;;  %v356_v46 = vpack.c.b16 %v339_v34, %v339_v34 }
  0x24   : > { %v490_v40 = vrot.slane %v488_v30, 1  ;;  %v533_v47 = vrot.slane %v531_v35, 1  ;;  %v333_v48 = vunpack.c.l.b16 %v214_v31  ;;  %v546_v49 = vor.u32 %v545_v23, %v541_v22 }
  0x25   : > { %v550_v50 = vrot.slane %v548_v27, 1  ;;  %v536_v52 = vshll.u32 %v356_v46, 16  ;;  %v459_v55 = vshll.u32 %v1329_v36, 16  ;;  %v336_v56 = vunpack.c.l.b16 %v217_v43 }
  0x26   : > { %v491_v51 = vsel %vm359_vm0, %v486_v33, %v490_v40  ;;  %v350_v54 = vpack.c.b16 %v333_v48, %v333_v48  ;;  %v402_v57 = vor.u32 %v401_v32, %v397_v28  ;;  %v406_v58 = vrot.slane %v404_v39, 1  ;;  %v210_v32 = vld [vmem:[%s1256_s17 + $0x38] sm:$0x1]  ;;  %v1366_v40 = vld [vmem:[%s1256_s17 + $0x30] sm:$0xff] }
  0x27   : > { %584 = vrot.lane.b32.xlu2 %v491_v51, %s1220_s18  ;;  %v534_v59 = vor.u32 %v533_v47, %v529_v41  ;;  %v495_v62 = vshll.u32 %v1334_v42, 16  ;;  %v354_v63 = vpack.c.b16 %v337_v45, %v337_v45  ;;  %v507_v1 = vshll.u32 %v1338_v44, 16 }
  0x28   : > { %v538_v3 = vrot.slane %v536_v52, 1  ;;  %v353_v4 = vpack.c.b16 %v336_v56, %v336_v56  ;;  %v551_v7 = vsel %vm359_vm0, %v546_v49, %v550_v50  ;;  %v457_v8 = vshrl.u32 %v1329_v36, 16 }
  0x29   : > { %568 = vrot.lane.b32.xlu0 %v395_v26, %s1220_s18  ;;  %v461_v9 = vrot.slane %v459_v55, 1  ;;  %v464_v10 = vshll.u32 %v350_v54, 16  ;;  %v493_v11 = vshrl.u32 %v1334_v42, 16  ;;  %v497_v14 = vrot.slane %v495_v62, 1 }
  0x2a   : > { %576 = vrot.lane.b32.xlu1 %v443_v37, %s1220_s18  ;;  %v539_v13 = vsel %vm359_vm0, %v534_v59, %v538_v3  ;;  %v500_v17 = vshll.u32 %v353_v4, 16  ;;  %v332_v18 = vunpack.c.l.b16 %v213_v6  ;;  %v407_v19 = vsel %vm359_vm0, %v402_v57, %v406_v58  ;;  %v206_v57 = vld [vmem:[%s1256_s17 + $0x8] sm:$0x1]  ;;  %v1380_v58 = vld [vmem:[%s1256_s17] sm:$0xff] }
  0x2b   : > { %v505_v20 = vshrl.u32 %v1338_v44, 16  ;;  %v509_v21 = vrot.slane %v507_v1, 1  ;;  %v512_v22 = vshll.u32 %v354_v63, 16  ;;  %v462_v23 = vor.u32 %v461_v9, %v457_v8  ;;  %v222_v9 = vld [vmem:[%s1256_s17 + $0xc8] sm:$0x1] }
  0x2c   : > { %v447_v24 = vshll.u32 %v1352_v12, 16  ;;  %v466_v25 = vrot.slane %v464_v10, 1  ;;  %v498_v26 = vor.u32 %v497_v14, %v493_v11  ;;  %v502_v27 = vrot.slane %v500_v17, 1  ;;  %v1388_v10 = vld [vmem:[%s1256_s17 + $0xc0] sm:$0xff] }
  0x2d   : > { %v349_v28 = vpack.c.b16 %v332_v18, %v332_v18  ;;  %v510_v30 = vor.u32 %v509_v21, %v505_v20  ;;  %v514_v31 = vrot.slane %v512_v22, 1  ;;  %v445_v33 = vshrl.u32 %v1352_v12, 16 }
  0x2e   : > { %v449_v34 = vrot.slane %v447_v24, 1  ;;  %v467_v35 = vsel %vm359_vm0, %v462_v23, %v466_v25  ;;  %v503_v37 = vsel %vm359_vm0, %v498_v26, %v502_v27  ;;  %v329_v41 = vunpack.c.l.b16 %v210_v32  ;;  %v1187_v32 = vld [vmem:[%s1639_s1 + $0x18] sm:$0xff] }
  0x2f   : > { %592 = vrot.lane.b32.xlu2 %v539_v13, %s1220_s18  ;;  %v452_v39 = vshll.u32 %v349_v28, 16  ;;  %v515_v43 = vsel %vm359_vm0, %v510_v30, %v514_v31  ;;  %v411_v48 = vshll.u32 %v1366_v40, 16  ;;  %v409_v50 = vshrl.u32 %v1366_v40, 16  ;;  %1189 = vmatpush.bf16.msra.mxu2 %v1187_v32 }
  0x30   : > { %v450_v45 = vor.u32 %v449_v34, %v445_v33  ;;  %v346_v47 = vpack.c.b16 %v329_v41, %v329_v41  ;;  %v325_v59 = vunpack.c.l.b16 %v206_v57  ;;  %v363_v63 = vshll.u32 %v1380_v58, 16  ;;  %1188 = vmatpush.bf16.msra.mxu1 %v1187_v32  ;;  %1190 = vmatpush.bf16.msra.mxu3 %v1187_v32  ;;  %v1185_v41 = vld [vmem:[%s1639_s1 + $0x8] sm:$0xff] }
  0x31   : > { %594 = vrot.lane.b32.xlu0 %v551_v7, %s1220_s18  ;;  %v454_v46 = vrot.slane %v452_v39, 1  ;;  %v413_v51 = vrot.slane %v411_v48, 1  ;;  %v361_v1 = vshrl.u32 %v1380_v58, 16  ;;  %v341_v11 = vunpack.c.l.b16 %v222_v9  ;;  %787 = vmatpush.bf16.msra.mxu0 %v1187_v32 }
  0x32   : > { %570 = vrot.lane.b32.xlu1 %v407_v19, %s1220_s18  ;;  %v416_v52 = vshll.u32 %v346_v47, 16  ;;  %v342_v62 = vpack.c.b16 %v325_v59, %v325_v59  ;;  %v365_v3 = vrot.slane %v363_v63, 1  ;;  %v555_v14 = vshll.u32 %v1388_v10, 16 }
  0x33   : > { %v455_v49 = vsel %vm359_vm0, %v450_v45, %v454_v46  ;;  %v414_v54 = vor.u32 %v413_v51, %v409_v50  ;;  %v358_v13 = vpack.c.b16 %v341_v11, %v341_v11  ;;  %v553_v18 = vshrl.u32 %v1388_v10, 16 }
  0x34   : > { %v418_v55 = vrot.slane %v416_v52, 1  ;;  %v368_v4 = vshll.u32 %v342_v62, 16  ;;  %v366_v6 = vor.u32 %v365_v3, %v361_v1  ;;  %v557_v19 = vrot.slane %v555_v14, 1 }
  0x35   : > { %v560_v20 = vshll.u32 %v358_v13, 16 }
  0x36   : > { %v419_v56 = vsel %vm359_vm0, %v414_v54, %v418_v55  ;;  %v370_v7 = vrot.slane %v368_v4, 1  ;;  %v558_v24 = vor.u32 %v557_v19, %v553_v18 }
  0x37   : > { %586 = vrot.lane.b32.xlu2 %v503_v37, %s1220_s18  ;;  %v562_v25 = vrot.slane %v560_v20, 1 }
  0x38   : > { %v371_v8 = vsel %vm359_vm0, %v366_v6, %v370_v7 }
  0x39   : > { %580 = vrot.lane.b32.xlu0 %v467_v35, %s1220_s18  ;;  %v563_v26 = vsel %vm359_vm0, %v558_v24, %v562_v25 }
  0x3a   : > { %588 = vrot.lane.b32.xlu1 %v515_v43, %s1220_s18 }
  0x3f   : > { %578 = vrot.lane.b32.xlu2 %v455_v49, %s1220_s18 }
  0x42   : > { %564 = vrot.lane.b32.xlu1 %v371_v8, %s1220_s18 }
  0x47   : > { %572 = vrot.lane.b32.xlu2 %v419_v56, %s1220_s18 }
  0x81   : > { %v585_v17 = vpop.permute.xlu2 %584 }
  0x89   : > { %v593_v27 = vpop.permute.xlu2 %592 }
  0x8a   : > { %v1424_v34 = vsel %vm598_vm1, %v1318_v16, %v593_v27 }
  0x8b   : > { %v583_v21 = vpop.permute.xlu0 %582 }
  0x8c   : > { %v567_v22 = vpop.permute.xlu1 %566  ;;  %v1394_v23 = vsel %vm598_vm1, %v1259_v0, %v583_v21 }
  0x8d   : > { %665 = vrot.lane.b32.xlu2 %v1394_v23, %s1221_s19  ;;  %v1420_v33 = vsel %vm598_vm1, %v1263_v2, %v567_v22  ;;  %v1184_v2 = vld [vmem:[%s1639_s1] sm:$0xff] }
  0x91   : > { %v587_v39 = vpop.permute.xlu2 %586 }
  0x92   : > { %v1448_v43 = vsel %vm598_vm1, %v1334_v42, %v587_v39 }
  0x93   : > { %v591_v28 = vpop.permute.xlu0 %590 }
  0x94   : > { %v575_v30 = vpop.permute.xlu1 %574  ;;  %v1401_v31 = vsel %vm598_vm1, %v1267_v5, %v591_v28  ;;  %v1186_v5 = vld [vmem:[%s1639_s1 + $0x10] sm:$0xff] }
  0x95   : > { %596 = vrot.lane.b32.xlu2 %v563_v26, %s1220_s18  ;;  %673 = vrot.lane.b32.xlu0 %v1401_v31, %s1221_s19  ;;  %v1408_v0 = vsel %vm598_vm1, %v1276_v15, %v575_v30  ;;  %v1531_v30 = vld [vmem:[%s1640_s2] ss:$0 sm:$0xff] }
  0x96   : > { %657 = vrot.lane.b32.xlu1 %v1408_v0, %s1221_s19  ;;  %1192 = vmatpush.bf16.msra.mxu2 %v1186_v5 }
  0x97   : > { %1191 = vmatpush.bf16.msra.mxu1 %v1186_v5  ;;  %1193 = vmatpush.bf16.msra.mxu3 %v1186_v5 }
  0x98   : > { %788 = vmatpush.bf16.msra.mxu0 %v1186_v5 }
  0x9a   : > { %1195 = vmatpush.bf16.msra.mxu2 %v1185_v41 }
  0x9b   : > { %v569_v15 = vpop.permute.xlu0 %568  ;;  %1194 = vmatpush.bf16.msra.mxu1 %v1185_v41  ;;  %1196 = vmatpush.bf16.msra.mxu3 %v1185_v41 }
  0x9c   : > { %v577_v35 = vpop.permute.xlu1 %576  ;;  %v1428_v37 = vsel %vm598_vm1, %v1282_v29, %v569_v15  ;;  %v1444_v29 = vsel %vm598_vm1, %v1307_v61, %v585_v17  ;;  %789 = vmatpush.bf16.msra.mxu0 %v1185_v41  ;;  %v579_v61 = vpop.permute.xlu2 %578 }
  0x9d   : > { %651 = vrot.lane.b32.xlu2 %v1428_v37, %s1221_s19  ;;  %649 = vrot.lane.b32.xlu0 %v1420_v33, %s1221_s19  ;;  %v612_v42 = vsel %vm598_vm1, %v1287_v38, %v577_v35 }
  0x9e   : > { %675 = vrot.lane.b32.xlu1 %v1424_v34, %s1221_s19  ;;  %1198 = vmatpush.bf16.msra.mxu2 %v1184_v2 }
  0x9f   : > { %1197 = vmatpush.bf16.msra.mxu1 %v1184_v2  ;;  %1199 = vmatpush.bf16.msra.mxu3 %v1184_v2 }
  0xa0   : > { %790 = vmatpush.bf16.msra.mxu0 %v1184_v2 }
  0xa3   : > { %v595_v16 = vpop.permute.xlu0 %594 }
  0xa4   : > { %v571_v45 = vpop.permute.xlu1 %570  ;;  %v1452_v46 = vsel %vm598_vm1, %v1299_v53, %v595_v16  ;;  %v1464_v53 = vsel %vm598_vm1, %v1352_v12, %v579_v61  ;;  %v573_v49 = vpop.permute.xlu2 %572 }
  0xa5   : > { %677 = vrot.lane.b32.xlu2 %v1452_v46, %s1221_s19  ;;  %667 = vrot.lane.b32.xlu0 %v1444_v29, %s1221_s19  ;;  %v606_v38 = vsel %vm598_vm1, %v1304_v60, %v571_v45  ;;  %v608_v51 = vsel %vm598_vm1, %v1366_v40, %v573_v49 }
  0xa6   : > { %669 = vrot.lane.b32.xlu1 %v1448_v43, %s1221_s19 }
  0xab   : > { %v581_v50 = vpop.permute.xlu0 %580 }
  0xac   : > { %v589_v47 = vpop.permute.xlu1 %588  ;;  %v616_v12 = vsel %vm598_vm1, %v1329_v36, %v581_v50 }
  0xad   : > { %659 = vrot.lane.b32.xlu0 %v612_v42, %s1221_s19  ;;  %v624_v48 = vsel %vm598_vm1, %v1338_v44, %v589_v47 }
  0xae   : > { %671 = vrot.lane.b32.xlu2 %v624_v48, %s1221_s19  ;;  %661 = vrot.lane.b32.xlu1 %v1464_v53, %s1221_s19 }
  0xb4   : > { %v565_v40 = vpop.permute.xlu1 %564 }
  0xb5   : > { %653 = vrot.lane.b32.xlu0 %v606_v38, %s1221_s19  ;;  %v600_v59 = vsel %vm598_vm1, %v1380_v58, %v565_v40 }
  0xb6   : > { %663 = vrot.lane.b32.xlu2 %v616_v12, %s1221_s19  ;;  %655 = vrot.lane.b32.xlu1 %v608_v51, %s1221_s19 }
  0xe7   : > { %v666_v44 = vpop.permute.xlu2 %665 }
  0xe8   : > { %v699_v52 = vsel %vm681_vm2, %v616_v12, %v666_v44 }
  0xe9   : > { %1156 = vmatmul.msk.bf16.vlgmr.msra.gmra.mxu2 %vm750_vm3, %v699_v52 }
  0xef   : > { %v597_v60 = vpop.permute.xlu2 %596 }
  0xf0   : > { %v632_v36 = vsel %vm598_vm1, %v1388_v10, %v597_v60 }
  0xf1   : > { %679 = vrot.lane.b32.xlu0 %v632_v36, %s1221_s19 }
  0xf7   : > { %v652_v7 = vpop.permute.xlu2 %651 }
  0xf8   : > { %v685_v58 = vsel %vm681_vm2, %v1420_v33, %v652_v7 }
  0xff   : > { %v678_v11 = vpop.permute.xlu2 %677 }
 0x100   : > { %v711_v14 = vsel %vm681_vm2, %v1424_v34, %v678_v11 }
 0x107   : > { %v674_v54 = vpop.permute.xlu0 %673 }
 0x108   : > { %v658_v55 = vpop.permute.xlu1 %657  ;;  %v707_v56 = vsel %vm681_vm2, %v624_v48, %v674_v54  ;;  %v672_v21 = vpop.permute.xlu2 %671 }
 0x109   : > { %v691_v57 = vsel %vm681_vm2, %v608_v51, %v658_v55  ;;  %1160 = vmatmul.msk.bf16.vlgmr.msra.gmra.mxu3 %vm750_vm3, %v707_v56  ;;  %v705_v22 = vsel %vm681_vm2, %v1448_v43, %v672_v21 }
 0x10a   : > { %1152 = vmatmul.msk.bf16.vlgmr.msra.gmra.mxu1 %vm750_vm3, %v691_v57 }
 0x10f   : > { %v650_v62 = vpop.permute.xlu0 %649 }
 0x110   : > { %v683_v63 = vsel %vm681_vm2, %v600_v59, %v650_v62  ;;  %v676_v1 = vpop.permute.xlu1 %675 }
 0x111   : > { %1148 = vmatmul.msk.bf16.vlgmr.msra.gmra.mxu0 %vm750_vm3, %v683_v63  ;;  %v709_v6 = vsel %vm681_vm2, %v1401_v31, %v676_v1 }
 0x117   : > { %v668_v3 = vpop.permute.xlu0 %667 }
 0x118   : > { %v701_v4 = vsel %vm681_vm2, %v1394_v23, %v668_v3  ;;  %v670_v10 = vpop.permute.xlu1 %669  ;;  %v664_v23 = vpop.permute.xlu2 %663 }
 0x119   : > { %1157 = vmatmul.msk.bf16.gmra.mxu2 %vm750_vm3, %v701_v4  ;;  %1161 = vmatmul.msk.bf16.gmra.mxu3 %vm750_vm3, %v709_v6  ;;  %v703_v13 = vsel %vm681_vm2, %v1444_v29, %v670_v10  ;;  %v697_v26 = vsel %vm681_vm2, %v1464_v53, %v664_v23 }
 0x11f   : > { %v660_v8 = vpop.permute.xlu0 %659 }
 0x120   : > { %v693_v9 = vsel %vm681_vm2, %v1408_v0, %v660_v8  ;;  %v662_v17 = vpop.permute.xlu1 %661 }
 0x121   : > { %1149 = vmatmul.msk.bf16.gmra.mxu0 %vm750_vm3, %v685_v58  ;;  %1153 = vmatmul.msk.bf16.gmra.mxu1 %vm750_vm3, %v693_v9  ;;  %v695_v20 = vsel %vm681_vm2, %v612_v42, %v662_v17 }
 0x127   : > { %v654_v18 = vpop.permute.xlu0 %653 }
 0x128   : > { %v687_v19 = vsel %vm681_vm2, %v1428_v37, %v654_v18  ;;  %v656_v24 = vpop.permute.xlu1 %655 }
 0x129   : > { %1158 = vmatmul.msk.bf16.gmra.mxu2 %vm750_vm3, %v703_v13  ;;  %1162 = vmatmul.msk.bf16.gmra.mxu3 %vm750_vm3, %v711_v14  ;;  %v689_v25 = vsel %vm681_vm2, %v606_v38, %v656_v24 }
 0x131   : > { %1150 = vmatmul.msk.bf16.gmra.mxu0 %vm750_vm3, %v687_v19  ;;  %1154 = vmatmul.msk.bf16.gmra.mxu1 %vm750_vm3, %v695_v20 }
 0x139   : > { %1159 = vmatmul.msk.bf16.gmra.mxu2 %vm750_vm3, %v705_v22 }
 0x141   : > { %1151 = vmatmul.msk.bf16.gmra.mxu0 %vm750_vm3, %v689_v25  ;;  %1155 = vmatmul.msk.bf16.gmra.mxu1 %vm750_vm3, %v697_v26 }
 0x163   : > { %v680_v27 = vpop.permute.xlu0 %679 }
 0x164   : > { %v713_v28 = vsel %vm681_vm2, %v1452_v46, %v680_v27 }
 0x165   : > { %1163 = vmatmul.msk.bf16.gmra.mxu3 %vm750_vm3, %v713_v28 }
 0x16c   : > { %v832_v31 = vpop.f32.mrf.mxu2 }
 0x16d   : > { %v833_v0 = vadd.f32 %v1531_v30, %v832_v31 }
 0x16f   : > { %v888_v32 = vmul.f32 0.2, %v833_v0 }
 0x171   : > { %v920_v5 = vmax.f32 %v833_v0, %v888_v32 }
 0x173   : > { %v952_v33 = vpack.c.bf16 %v920_v5, %v920_v5 }
 0x174   : > { %v834_v15 = vpop.f32.mrf.mxu2 }
 0x175   : > { %985 = vst.msk [vmem:[%s1538_s6 + $0x40] sm:$0xf] %vm968_vm4, %v952_v33  ;;  %v835_v34 = vadd.f32 %v1531_v30, %v834_v15 }
 0x177   : > { %v889_v35 = vmul.f32 0.2, %v835_v34 }
 0x179   : > { %v921_v37 = vmax.f32 %v835_v34, %v889_v35 }
 0x17b   : > { %v953_v39 = vpack.c.bf16 %v921_v37, %v921_v37 }
 0x17d   : > { %986 = vst.msk [vmem:[%s1538_s6 + $0x44] sm:$0xf] %vm968_vm4, %v953_v39 }
 0x187   : > { %v812_v41 = vpop.f32.mrf.mxu1 }
 0x188   : > { %v813_v2 = vadd.f32 %v1531_v30, %v812_v41 }
 0x18a   : > { %v880_v29 = vmul.f32 0.2, %v813_v2 }
 0x18c   : > { %v912_v16 = vmax.f32 %v813_v2, %v880_v29  ;;  %v852_v43 = vpop.f32.mrf.mxu3 }
 0x18d   : > { %v853_v45 = vadd.f32 %v1531_v30, %v852_v43 }
 0x18e   : > { %v944_v46 = vpack.c.bf16 %v912_v16, %v912_v16  ;;  %v792_v61 = vpop.f32.mrf.mxu0 }
 0x18f   : > { %v896_v42 = vmul.f32 0.2, %v853_v45  ;;  %v793_v53 = vadd.f32 %v1531_v30, %v792_v61  ;;  %v814_v47 = vpop.f32.mrf.mxu1 }
 0x190   : > { %977 = vst.msk [vmem:[%s1538_s6 + $0x20] sm:$0xf] %vm968_vm4, %v944_v46  ;;  %v815_v48 = vadd.f32 %v1531_v30, %v814_v47 }
 0x191   : > { %v928_v49 = vmax.f32 %v853_v45, %v896_v42  ;;  %v872_v50 = vmul.f32 0.2, %v793_v53 }
 0x192   : > { %v881_v38 = vmul.f32 0.2, %v815_v48 }
 0x193   : > { %v960_v12 = vpack.c.bf16 %v928_v49, %v928_v49  ;;  %v904_v51 = vmax.f32 %v793_v53, %v872_v50 }
 0x194   : > { %v913_v44 = vmax.f32 %v815_v48, %v881_v38  ;;  %v854_v52 = vpop.f32.mrf.mxu3 }
 0x195   : > { %993 = vst.msk [vmem:[%s1538_s6 + $0x60] sm:$0xf] %vm968_vm4, %v960_v12  ;;  %v936_v60 = vpack.c.bf16 %v904_v51, %v904_v51  ;;  %v855_v36 = vadd.f32 %v1531_v30, %v854_v52 }
 0x196   : > { %v945_v40 = vpack.c.bf16 %v913_v44, %v913_v44  ;;  %v794_v54 = vpop.f32.mrf.mxu0 }
 0x197   : > { %969 = vst.msk [vmem:[%s1538_s6] sm:$0xf] %vm968_vm4, %v936_v60  ;;  %v897_v55 = vmul.f32 0.2, %v855_v36  ;;  %v795_v56 = vadd.f32 %v1531_v30, %v794_v54 }
 0x198   : > { %978 = vst.msk [vmem:[%s1538_s6 + $0x24] sm:$0xf] %vm968_vm4, %v945_v40 }
 0x199   : > { %v929_v57 = vmax.f32 %v855_v36, %v897_v55  ;;  %v873_v59 = vmul.f32 0.2, %v795_v56 }
 0x19b   : > { %v961_v62 = vpack.c.bf16 %v929_v57, %v929_v57  ;;  %v905_v63 = vmax.f32 %v795_v56, %v873_v59 }
 0x19c   : > { %v837_v1 = vpop.f32.mrf.mxu2  ;;  %v857_v3 = vpop.f32.mrf.mxu3 }
 0x19d   : > { %994 = vst.msk [vmem:[%s1538_s6 + $0x64] sm:$0xf] %vm968_vm4, %v961_v62  ;;  %v937_v4 = vpack.c.bf16 %v905_v63, %v905_v63  ;;  %v838_v6 = vadd.f32 %v1531_v30, %v837_v1  ;;  %v858_v7 = vadd.f32 %v1531_v30, %v857_v3 }
 0x19e   : > { %v797_v8 = vpop.f32.mrf.mxu0  ;;  %v817_v58 = vpop.f32.mrf.mxu1 }
 0x19f   : > { %970 = vst.msk [vmem:[%s1538_s6 + $0x4] sm:$0xf] %vm968_vm4, %v937_v4  ;;  %v890_v9 = vmul.f32 0.2, %v838_v6  ;;  %v898_v10 = vmul.f32 0.2, %v858_v7  ;;  %v798_v11 = vadd.f32 %v1531_v30, %v797_v8  ;;  %v818_v13 = vadd.f32 %v1531_v30, %v817_v58 }
 0x1a1   : > { %v922_v14 = vmax.f32 %v838_v6, %v890_v9  ;;  %v930_v17 = vmax.f32 %v858_v7, %v898_v10  ;;  %v874_v18 = vmul.f32 0.2, %v798_v11  ;;  %v882_v19 = vmul.f32 0.2, %v818_v13 }
 0x1a3   : > { %v954_v20 = vpack.c.bf16 %v922_v14, %v922_v14  ;;  %v962_v21 = vpack.c.bf16 %v930_v17, %v930_v17  ;;  %v906_v22 = vmax.f32 %v798_v11, %v874_v18  ;;  %v914_v23 = vmax.f32 %v818_v13, %v882_v19 }
 0x1a4   : > { %v839_v24 = vpop.f32.mrf.mxu2  ;;  %v859_v25 = vpop.f32.mrf.mxu3 }
 0x1a5   : > { %987 = vst.msk [vmem:[%s1538_s6 + $0x48] sm:$0xf] %vm968_vm4, %v954_v20  ;;  %v938_v26 = vpack.c.bf16 %v906_v22, %v906_v22  ;;  %v946_v27 = vpack.c.bf16 %v914_v23, %v914_v23  ;;  %v840_v28 = vadd.f32 %v1531_v30, %v839_v24  ;;  %v860_v31 = vadd.f32 %v1531_v30, %v859_v25 }
 0x1a6   : > { %995 = vst.msk [vmem:[%s1538_s6 + $0x68] sm:$0xf] %vm968_vm4, %v962_v21  ;;  %v799_v0 = vpop.f32.mrf.mxu0  ;;  %v819_v32 = vpop.f32.mrf.mxu1 }
 0x1a7   : > { %971 = vst.msk [vmem:[%s1538_s6 + $0x8] sm:$0xf] %vm968_vm4, %v938_v26  ;;  %v891_v5 = vmul.f32 0.2, %v840_v28  ;;  %v899_v33 = vmul.f32 0.2, %v860_v31  ;;  %v800_v15 = vadd.f32 %v1531_v30, %v799_v0  ;;  %v820_v34 = vadd.f32 %v1531_v30, %v819_v32 }
 0x1a8   : > { %979 = vst.msk [vmem:[%s1538_s6 + $0x28] sm:$0xf] %vm968_vm4, %v946_v27 }
 0x1a9   : > { %v923_v35 = vmax.f32 %v840_v28, %v891_v5  ;;  %v931_v37 = vmax.f32 %v860_v31, %v899_v33  ;;  %v875_v39 = vmul.f32 0.2, %v800_v15  ;;  %v883_v41 = vmul.f32 0.2, %v820_v34 }
 0x1ab   : > { %v955_v2 = vpack.c.bf16 %v923_v35, %v923_v35  ;;  %v963_v29 = vpack.c.bf16 %v931_v37, %v931_v37  ;;  %v907_v16 = vmax.f32 %v800_v15, %v875_v39  ;;  %v915_v43 = vmax.f32 %v820_v34, %v883_v41 }
 0x1ac   : > { %v842_v45 = vpop.f32.mrf.mxu2  ;;  %v862_v46 = vpop.f32.mrf.mxu3 }
 0x1ad   : > { %988 = vst.msk [vmem:[%s1538_s6 + $0x4c] sm:$0xf] %vm968_vm4, %v955_v2  ;;  %v939_v61 = vpack.c.bf16 %v907_v16, %v907_v16  ;;  %v947_v42 = vpack.c.bf16 %v915_v43, %v915_v43  ;;  %v843_v53 = vadd.f32 %v1531_v30, %v842_v45  ;;  %v863_v47 = vadd.f32 %v1531_v30, %v862_v46 }
 0x1ae   : > { %996 = vst.msk [vmem:[%s1538_s6 + $0x6c] sm:$0xf] %vm968_vm4, %v963_v29  ;;  %v802_v48 = vpop.f32.mrf.mxu0  ;;  %v822_v49 = vpop.f32.mrf.mxu1 }
 0x1af   : > { %972 = vst.msk [vmem:[%s1538_s6 + $0xc] sm:$0xf] %vm968_vm4, %v939_v61  ;;  %v892_v50 = vmul.f32 0.2, %v843_v53  ;;  %v900_v38 = vmul.f32 0.2, %v863_v47  ;;  %v803_v12 = vadd.f32 %v1531_v30, %v802_v48  ;;  %v823_v51 = vadd.f32 %v1531_v30, %v822_v49 }
 0x1b0   : > { %980 = vst.msk [vmem:[%s1538_s6 + $0x2c] sm:$0xf] %vm968_vm4, %v947_v42 }
 0x1b1   : > { %v924_v44 = vmax.f32 %v843_v53, %v892_v50  ;;  %v932_v52 = vmax.f32 %v863_v47, %v900_v38  ;;  %v876_v60 = vmul.f32 0.2, %v803_v12  ;;  %v884_v36 = vmul.f32 0.2, %v823_v51 }
 0x1b3   : > { %v956_v40 = vpack.c.bf16 %v924_v44, %v924_v44  ;;  %v964_v54 = vpack.c.bf16 %v932_v52, %v932_v52  ;;  %v908_v55 = vmax.f32 %v803_v12, %v876_v60  ;;  %v916_v56 = vmax.f32 %v823_v51, %v884_v36 }
 0x1b4   : > { %v844_v57 = vpop.f32.mrf.mxu2  ;;  %v864_v59 = vpop.f32.mrf.mxu3 }
 0x1b5   : > { %989 = vst.msk [vmem:[%s1538_s6 + $0x50] sm:$0xf] %vm968_vm4, %v956_v40  ;;  %v940_v62 = vpack.c.bf16 %v908_v55, %v908_v55  ;;  %v948_v63 = vpack.c.bf16 %v916_v56, %v916_v56  ;;  %v845_v1 = vadd.f32 %v1531_v30, %v844_v57  ;;  %v865_v3 = vadd.f32 %v1531_v30, %v864_v59 }
 0x1b6   : > { %997 = vst.msk [vmem:[%s1538_s6 + $0x70] sm:$0xf] %vm968_vm4, %v964_v54  ;;  %v804_v4 = vpop.f32.mrf.mxu0  ;;  %v824_v6 = vpop.f32.mrf.mxu1 }
 0x1b7   : > { %973 = vst.msk [vmem:[%s1538_s6 + $0x10] sm:$0xf] %vm968_vm4, %v940_v62  ;;  %v893_v7 = vmul.f32 0.2, %v845_v1  ;;  %v901_v8 = vmul.f32 0.2, %v865_v3  ;;  %v805_v58 = vadd.f32 %v1531_v30, %v804_v4  ;;  %v825_v9 = vadd.f32 %v1531_v30, %v824_v6 }
 0x1b8   : > { %981 = vst.msk [vmem:[%s1538_s6 + $0x30] sm:$0xf] %vm968_vm4, %v948_v63 }
 0x1b9   : > { %v925_v10 = vmax.f32 %v845_v1, %v893_v7  ;;  %v933_v11 = vmax.f32 %v865_v3, %v901_v8  ;;  %v877_v13 = vmul.f32 0.2, %v805_v58  ;;  %v885_v14 = vmul.f32 0.2, %v825_v9 }
 0x1bb   : > { %v957_v17 = vpack.c.bf16 %v925_v10, %v925_v10  ;;  %v965_v18 = vpack.c.bf16 %v933_v11, %v933_v11  ;;  %v909_v19 = vmax.f32 %v805_v58, %v877_v13  ;;  %v917_v20 = vmax.f32 %v825_v9, %v885_v14 }
 0x1bc   : > { %v847_v21 = vpop.f32.mrf.mxu2 }
 0x1bd   : > { %990 = vst.msk [vmem:[%s1538_s6 + $0x54] sm:$0xf] %vm968_vm4, %v957_v17  ;;  %v941_v22 = vpack.c.bf16 %v909_v19, %v909_v19  ;;  %v949_v23 = vpack.c.bf16 %v917_v20, %v917_v20  ;;  %v848_v24 = vadd.f32 %v1531_v30, %v847_v21 }
 0x1be   : > { %998 = vst.msk [vmem:[%s1538_s6 + $0x74] sm:$0xf] %vm968_vm4, %v965_v18  ;;  %v807_v25 = vpop.f32.mrf.mxu0  ;;  %v827_v26 = vpop.f32.mrf.mxu1 }
 0x1bf   : > { %974 = vst.msk [vmem:[%s1538_s6 + $0x14] sm:$0xf] %vm968_vm4, %v941_v22  ;;  %v894_v27 = vmul.f32 0.2, %v848_v24  ;;  %v808_v28 = vadd.f32 %v1531_v30, %v807_v25  ;;  %v828_v31 = vadd.f32 %v1531_v30, %v827_v26 }
 0x1c0   : > { %982 = vst.msk [vmem:[%s1538_s6 + $0x34] sm:$0xf] %vm968_vm4, %v949_v23 }
 0x1c1   : > { %v926_v0 = vmax.f32 %v848_v24, %v894_v27  ;;  %v878_v32 = vmul.f32 0.2, %v808_v28  ;;  %v886_v5 = vmul.f32 0.2, %v828_v31 }
 0x1c3   : > { %v958_v33 = vpack.c.bf16 %v926_v0, %v926_v0  ;;  %v910_v15 = vmax.f32 %v808_v28, %v878_v32  ;;  %v918_v34 = vmax.f32 %v828_v31, %v886_v5 }
 0x1c4   : > { %v849_v35 = vpop.f32.mrf.mxu2 }
 0x1c5   : > { %991 = vst.msk [vmem:[%s1538_s6 + $0x58] sm:$0xf] %vm968_vm4, %v958_v33  ;;  %v942_v37 = vpack.c.bf16 %v910_v15, %v910_v15  ;;  %v950_v39 = vpack.c.bf16 %v918_v34, %v918_v34  ;;  %v850_v41 = vadd.f32 %v1531_v30, %v849_v35 }
 0x1c6   : > { %v809_v2 = vpop.f32.mrf.mxu0  ;;  %v829_v29 = vpop.f32.mrf.mxu1 }
 0x1c7   : > { %975 = vst.msk [vmem:[%s1538_s6 + $0x18] sm:$0xf] %vm968_vm4, %v942_v37  ;;  %v895_v16 = vmul.f32 0.2, %v850_v41  ;;  %v810_v43 = vadd.f32 %v1531_v30, %v809_v2  ;;  %v830_v45 = vadd.f32 %v1531_v30, %v829_v29 }
 0x1c8   : > { %983 = vst.msk [vmem:[%s1538_s6 + $0x38] sm:$0xf] %vm968_vm4, %v950_v39 }
 0x1c9   : > { %v927_v46 = vmax.f32 %v850_v41, %v895_v16  ;;  %v879_v61 = vmul.f32 0.2, %v810_v43  ;;  %v887_v42 = vmul.f32 0.2, %v830_v45 }
 0x1cb   : > { %v959_v53 = vpack.c.bf16 %v927_v46, %v927_v46  ;;  %v911_v47 = vmax.f32 %v810_v43, %v879_v61  ;;  %v919_v48 = vmax.f32 %v830_v45, %v887_v42 }
 0x1cd   : > { %992 = vst.msk [vmem:[%s1538_s6 + $0x5c] sm:$0xf] %vm968_vm4, %v959_v53  ;;  %v943_v49 = vpack.c.bf16 %v911_v47, %v911_v47  ;;  %v951_v50 = vpack.c.bf16 %v919_v48, %v919_v48 }
 0x1cf   : > { %976 = vst.msk [vmem:[%s1538_s6 + $0x1c] sm:$0xf] %vm968_vm4, %v943_v49 }
 0x1d0   : > { %984 = vst.msk [vmem:[%s1538_s6 + $0x3c] sm:$0xf] %vm968_vm4, %v951_v50 }
 0x1e8   : > { %v867_v38 = vpop.f32.mrf.mxu3 }
 0x1e9   : > { %v868_v12 = vadd.f32 %v1531_v30, %v867_v38 }
 0x1eb   : > { %v902_v51 = vmul.f32 0.2, %v868_v12 }
 0x1ed   : > { %v934_v44 = vmax.f32 %v868_v12, %v902_v51 }
 0x1ef   : > { %v966_v52 = vpack.c.bf16 %v934_v44, %v934_v44 }
 0x1f0   : > { %v869_v60 = vpop.f32.mrf.mxu3 }
 0x1f1   : > { %999 = vst.msk [vmem:[%s1538_s6 + $0x78] sm:$0xf] %vm968_vm4, %v966_v52  ;;  %v870_v36 = vadd.f32 %v1531_v30, %v869_v60 }
 0x1f3   : > { %v903_v40 = vmul.f32 0.2, %v870_v36 }
 0x1f5   : > { %v935_v54 = vmax.f32 %v870_v36, %v903_v40 }
 0x1f7   : > { %v967_v55 = vpack.c.bf16 %v935_v54, %v935_v54 }
 0x1f9   : > { %1000 = vst.msk [vmem:[%s1538_s6 + $0x7c] sm:$0xf] %vm968_vm4, %v967_v55 }
 0x1fa PF: > { %s13_s12 = sadd.s32 1, %s1218_s12  }
 0x1fb   : > { %p10_p4 = scmp.ge.s32.totalorder %s13_s12, 4  }
 0x1fd   :  { %12 = sbr.rel (!%p10_p4) target bundleno = 1 (0x1), region = 62 }

// kernel: nlayer_discriminator.6
= control target key start
LH: loop header
LB: loop body
LE: loop exit
PB: predicated region body
PF: predicated region fallthrough
CT: control target
= control target key end

     0   :  { %s803_s9 = smov 0   ;;  %s997_s0 = inlined_call_operand.vmem [shape: bf16[2,9,9,32], index: 0, kind: input, shape index: {}]   ;;  %s998_s1 = inlined_call_operand.vmem [shape: bf16[128,16], index: 1, kind: input, shape index: {}]   ;;  %s999_s2 = inlined_call_operand.vmem [shape: bf16[2,8,8,16], index: 2, kind: output, shape index: {}]  }
   0x1 LB: > { %s645_s10 = sadd.s32 4294967295, %s784_s9   ;;  %p649_p0 = scmp.ge.s32.totalorder %s784_s9, 1  ;;  %s784_s9 = sphi %s803_s9, %s12_s9  }
   0x2   : > { %p112_p1 = scmp.lt.s32.totalorder %s784_s9, 3 }
   0x4   : > { %p113_p2 = pnand %p649_p0, %p112_p1 }
   0x5   : > { %p134_p3 = scmp.lt.s32.totalorder (!%p113_p2), %s645_s10, 1  ;;  %s786_s15 = smov (!%p113_p2), 32  }
   0x6   : > { %116 = sbr.rel (%p113_p2) target bundleno = 484 (0x1e4), region = 28  ;;  %s787_s16 = smov (!%p113_p2), 64  }
   0xb   : > { %s1001_s10 = smov (!%p134_p3, %s645_s10), 1  ;;  %vm288_vm0 = vcmask 261120   ;;  %vm340_vm1 = vcmask 523264   ;;  %vm474_vm2 = vcmask 130048   ;;  %vm581_vm6 = vcmask 125952  }
   0xc   : > { %s765_s11 = smul.u32 72, %s1001_s10  ;;  %s723_s5 = sshll.u32 %s1001_s10, 5 }
   0xd   : > { %s143_s8 = scalar_lea.vmem %s999_s2, %s723_s5 }
   0xe   : > { %s817_s14 = scalar_lea.vmem %s997_s0, %s765_s11 }
   0xf   : > { %v675_v0 = vld [vmem:[%s817_s14 + $0x28] sm:$0xf]  ;;  %v729_v1 = vld [vmem:[%s817_s14 + $0x28] sm:$0x10]  ;;  %v679_v5 = vld [vmem:[%s817_s14 + $0x30] sm:$0xf] }
  0x10   : > { %v659_v2 = vld [vmem:[%s817_s14 + $0x8] sm:$0xf]  ;;  %v676_v3 = vor.u32 %v729_v1, %v675_v0  ;;  %v725_v4 = vld [vmem:[%s817_s14 + $0x8] sm:$0x10]  ;;  %v730_v6 = vld [vmem:[%s817_s14 + $0x30] sm:$0x10] }
  0x11   : > { %v660_v7 = vor.u32 %v725_v4, %v659_v2  ;;  %v680_v8 = vor.u32 %v730_v6, %v679_v5  ;;  %v663_v9 = vld [vmem:[%s817_s14 + $0x10] sm:$0xf]  ;;  %v726_v10 = vld [vmem:[%s817_s14 + $0x10] sm:$0x10]  ;;  %v687_v16 = vld [vmem:[%s817_s14 + $0x40] sm:$0xf] }
  0x12   : > { %v243_v11 = vshrl.u32 %v676_v3, 16  ;;  %v245_v12 = vshll.u32 %v676_v3, 16  ;;  %v664_v13 = vor.u32 %v726_v10, %v663_v9  ;;  %v732_v19 = vld [vmem:[%s817_s14 + $0x40] sm:$0x10]  ;;  %v667_v20 = vld [vmem:[%s817_s14 + $0x18] sm:$0xf] }
  0x13   : > { %v215_v14 = vshrl.u32 %v660_v7, 16  ;;  %v217_v15 = vshll.u32 %v660_v7, 16  ;;  %v252_v18 = vshll.u32 %v680_v8, 16  ;;  %v727_v23 = vld [vmem:[%s817_s14 + $0x18] sm:$0x10]  ;;  %v250_v30 = vshrl.u32 %v680_v8, 16 }
  0x14   : > { %v247_v17 = vrot.slane %v245_v12, 1  ;;  %v224_v22 = vshll.u32 %v664_v13, 16  ;;  %v671_v24 = vld [vmem:[%s817_s14 + $0x20] sm:$0xf]  ;;  %v683_v26 = vld [vmem:[%s817_s14 + $0x38] sm:$0xf]  ;;  %v688_v32 = vor.u32 %v732_v19, %v687_v16  ;;  %v668_v33 = vor.u32 %v727_v23, %v667_v20 }
  0x15   : > { %v219_v21 = vrot.slane %v217_v15, 1  ;;  %v731_v27 = vld [vmem:[%s817_s14 + $0x38] sm:$0x10]  ;;  %v728_v28 = vld [vmem:[%s817_s14 + $0x20] sm:$0x10]  ;;  %v254_v31 = vrot.slane %v252_v18, 1 }
  0x16   : > { %v248_v25 = vor.u32 %v247_v17, %v243_v11  ;;  %v672_v34 = vor.u32 %v728_v28, %v671_v24  ;;  %v222_v35 = vshrl.u32 %v664_v13, 16  ;;  %v226_v36 = vrot.slane %v224_v22, 1  ;;  %v655_v46 = vld [vmem:[%s817_s14] sm:$0xf]  ;;  %v724_v47 = vld [vmem:[%s817_s14] sm:$0x10] }
  0x17   : > { %v220_v29 = vor.u32 %v219_v21, %v215_v14  ;;  %v684_v37 = vor.u32 %v731_v27, %v683_v26  ;;  %v229_v38 = vshrl.u32 %v668_v33, 16  ;;  %v231_v39 = vshll.u32 %v668_v33, 16  ;;  %v149_v0 = vld [vmem:[%s817_s14 + $0x28] sm:$0xf]  ;;  %v148_v7 = vld [vmem:[%s817_s14 + $0x20] sm:$0xf] }
  0x18   : > { %280 = vrot.lane.b32.xlu1 %v248_v25, %s786_s15  ;;  %v255_v40 = vor.u32 %v254_v31, %v250_v30  ;;  %v266_v41 = vshll.u32 %v688_v32, 16  ;;  %v238_v43 = vshll.u32 %v672_v34, 16  ;;  %v227_v44 = vor.u32 %v226_v36, %v222_v35  ;;  %v145_v1 = vld [vmem:[%s817_s14 + $0x8] sm:$0xf]  ;;  %v150_v8 = vld [vmem:[%s817_s14 + $0x30] sm:$0xf] }
  0x19   : > { %272 = vrot.lane.b32.xlu0 %v220_v29, %s786_s15  ;;  %v233_v42 = vrot.slane %v231_v39, 1  ;;  %v259_v45 = vshll.u32 %v684_v37, 16  ;;  %v264_v49 = vshrl.u32 %v688_v32, 16  ;;  %v236_v51 = vshrl.u32 %v672_v34, 16  ;;  %v146_v9 = vld [vmem:[%s817_s14 + $0x10] sm:$0xf] }
  0x1a   : > { %v268_v50 = vrot.slane %v266_v41, 1  ;;  %v240_v52 = vrot.slane %v238_v43, 1  ;;  %v656_v53 = vor.u32 %v724_v47, %v655_v46  ;;  %v257_v54 = vshrl.u32 %v684_v37, 16  ;;  %v147_v15 = vld [vmem:[%s817_s14 + $0x18] sm:$0xf]  ;;  %v739_v24 = vld [vmem:[%s998_s1 + $0x30] sm:$0xff] }
  0x1b   : > { %v234_v48 = vor.u32 %v233_v42, %v229_v38  ;;  %v261_v55 = vrot.slane %v259_v45, 1  ;;  %v151_v16 = vld [vmem:[%s817_s14 + $0x38] sm:$0xf]  ;;  %v152_v21 = vld [vmem:[%s817_s14 + $0x40] sm:$0xf]  ;;  %v738_v25 = vld [vmem:[%s998_s1 + $0x28] sm:$0xff] }
  0x1c   : > { %v269_v56 = vor.u32 %v268_v50, %v264_v49  ;;  %v241_v57 = vor.u32 %v240_v52, %v236_v51  ;;  %v210_v58 = vshll.u32 %v656_v53, 16  ;;  %v208_v60 = vshrl.u32 %v656_v53, 16  ;;  %v740_v23 = vld [vmem:[%s998_s1 + $0x38] sm:$0xff]  ;;  %v737_v26 = vld [vmem:[%s998_s1 + $0x20] sm:$0xff]  ;;  %v735_v28 = vld [vmem:[%s998_s1 + $0x10] sm:$0xff] }
  0x1d   : > { %276 = vrot.lane.b32.xlu2 %v234_v48, %s786_s15  ;;  %v262_v59 = vor.u32 %v261_v55, %v257_v54  ;;  %445 = vmatpush.bf16.msra.mxu0 %v740_v23  ;;  %v736_v27 = vld [vmem:[%s998_s1 + $0x18] sm:$0xff]  ;;  %v734_v29 = vld [vmem:[%s998_s1 + $0x8] sm:$0xff]  ;;  %v733_v30 = vld [vmem:[%s998_s1] sm:$0xff] }
  0x1e   : > { %v212_v61 = vrot.slane %v210_v58, 1  ;;  %742 = vmatpush.bf16.msra.mxu2 %v740_v23  ;;  %741 = vmatpush.bf16.msra.mxu1 %v740_v23  ;;  %v144_v33 = vld [vmem:[%s817_s14] sm:$0xf] }
  0x1f   : > { %743 = vmatpush.bf16.msra.mxu3 %v740_v23 }
  0x20   : > { %282 = vrot.lane.b32.xlu1 %v255_v40, %s786_s15  ;;  %v213_v62 = vor.u32 %v212_v61, %v208_v60 }
  0x21   : > { %274 = vrot.lane.b32.xlu0 %v227_v44, %s786_s15  ;;  %446 = vmatpush.bf16.msra.mxu0 %v739_v24 }
  0x22   : > { %745 = vmatpush.bf16.msra.mxu2 %v739_v24  ;;  %744 = vmatpush.bf16.msra.mxu1 %v739_v24 }
  0x23   : > { %746 = vmatpush.bf16.msra.mxu3 %v739_v24 }
  0x25   : > { %278 = vrot.lane.b32.xlu2 %v241_v57, %s786_s15  ;;  %447 = vmatpush.bf16.msra.mxu0 %v738_v25 }
  0x26   : > { %748 = vmatpush.bf16.msra.mxu2 %v738_v25  ;;  %747 = vmatpush.bf16.msra.mxu1 %v738_v25 }
  0x27   : > { %749 = vmatpush.bf16.msra.mxu3 %v738_v25 }
  0x28   : > { %286 = vrot.lane.b32.xlu1 %v269_v56, %s786_s15 }
  0x29   : > { %284 = vrot.lane.b32.xlu0 %v262_v59, %s786_s15  ;;  %448 = vmatpush.bf16.msra.mxu0 %v737_v26 }
  0x2a   : > { %751 = vmatpush.bf16.msra.mxu2 %v737_v26  ;;  %750 = vmatpush.bf16.msra.mxu1 %v737_v26 }
  0x2b   : > { %752 = vmatpush.bf16.msra.mxu3 %v737_v26 }
  0x2d   : > { %270 = vrot.lane.b32.xlu2 %v213_v62, %s786_s15  ;;  %449 = vmatpush.bf16.msra.mxu0 %v736_v27 }
  0x2e   : > { %754 = vmatpush.bf16.msra.mxu2 %v736_v27  ;;  %753 = vmatpush.bf16.msra.mxu1 %v736_v27 }
  0x2f   : > { %755 = vmatpush.bf16.msra.mxu3 %v736_v27 }
  0x31   : > { %450 = vmatpush.bf16.msra.mxu0 %v735_v28 }
  0x32   : > { %757 = vmatpush.bf16.msra.mxu2 %v735_v28  ;;  %756 = vmatpush.bf16.msra.mxu1 %v735_v28 }
  0x33   : > { %758 = vmatpush.bf16.msra.mxu3 %v735_v28 }
  0x35   : > { %451 = vmatpush.bf16.msra.mxu0 %v734_v29 }
  0x36   : > { %760 = vmatpush.bf16.msra.mxu2 %v734_v29  ;;  %759 = vmatpush.bf16.msra.mxu1 %v734_v29 }
  0x37   : > { %761 = vmatpush.bf16.msra.mxu3 %v734_v29 }
  0x39   : > { %452 = vmatpush.bf16.msra.mxu0 %v733_v30 }
  0x3a   : > { %763 = vmatpush.bf16.msra.mxu2 %v733_v30  ;;  %762 = vmatpush.bf16.msra.mxu1 %v733_v30 }
  0x3b   : > { %764 = vmatpush.bf16.msra.mxu3 %v733_v30 }
  0x77   : > { %v277_v63 = vpop.permute.xlu2 %276 }
  0x78   : > { %v874_v17 = vsel %vm288_vm0, %v147_v15, %v277_v63 }
  0x7f   : > { %v279_v6 = vpop.permute.xlu2 %278 }
  0x80   : > { %v860_v10 = vsel %vm288_vm0, %v148_v7, %v279_v6 }
  0x87   : > { %v271_v31 = vpop.permute.xlu2 %270 }
  0x88   : > { %v291_v35 = vsel %vm288_vm0, %v144_v33, %v271_v31 }
  0x8a   : > { %v281_v2 = vpop.permute.xlu1 %280 }
  0x8b   : > { %v273_v3 = vpop.permute.xlu0 %272  ;;  %v849_v4 = vsel %vm288_vm0, %v149_v0, %v281_v2 }
  0x8c   : > { %v852_v5 = vsel %vm288_vm0, %v145_v1, %v273_v3  ;;  %332 = vrot.lane.b32.xlu2 %v849_v4, %s787_s16 }
  0x8d   : > { %324 = vrot.lane.b32.xlu0 %v852_v5, %s787_s16 }
  0x92   : > { %v283_v11 = vpop.permute.xlu1 %282 }
  0x93   : > { %v275_v12 = vpop.permute.xlu0 %274  ;;  %v863_v13 = vsel %vm288_vm0, %v150_v8, %v283_v11 }
  0x94   : > { %v866_v14 = vsel %vm288_vm0, %v146_v9, %v275_v12  ;;  %330 = vrot.lane.b32.xlu2 %v860_v10, %s787_s16 }
  0x95   : > { %326 = vrot.lane.b32.xlu1 %v866_v14, %s787_s16  ;;  %334 = vrot.lane.b32.xlu0 %v863_v13, %s787_s16 }
  0x9a   : > { %v287_v20 = vpop.permute.xlu1 %286 }
  0x9b   : > { %v285_v18 = vpop.permute.xlu0 %284  ;;  %v315_v22 = vsel %vm288_vm0, %v152_v21, %v287_v20 }
  0x9c   : > { %v877_v19 = vsel %vm288_vm0, %v151_v16, %v285_v18 }
  0x9d   : > { %328 = vrot.lane.b32.xlu1 %v874_v17, %s787_s16  ;;  %336 = vrot.lane.b32.xlu0 %v877_v19, %s787_s16 }
  0xa5   : > { %338 = vrot.lane.b32.xlu1 %v315_v22, %s787_s16 }
  0xe6   : > { %v333_v34 = vpop.permute.xlu2 %332 }
  0xe7   : > { %v350_v36 = vsel %vm340_vm1, %v860_v10, %v333_v34 }
  0xe8   : > { %v385_v42 = vunpack.c.l.b16 %v350_v36 }
  0xee   : > { %v331_v46 = vpop.permute.xlu2 %330 }
  0xef   : > { %v348_v49 = vsel %vm340_vm1, %v874_v17, %v331_v46 }
  0xf0   : > { %v384_v52 = vunpack.c.l.b16 %v348_v49 }
  0xff   : > { %v325_v32 = vpop.permute.xlu0 %324 }
 0x100   : > { %v342_v37 = vsel %vm340_vm1, %v291_v35, %v325_v32 }
 0x101   : > { %v381_v43 = vunpack.c.l.b16 %v342_v37 }
 0x107   : > { %v327_v38 = vpop.permute.xlu1 %326  ;;  %v335_v39 = vpop.permute.xlu0 %334 }
 0x108   : > { %v344_v40 = vsel %vm340_vm1, %v852_v5, %v327_v38  ;;  %v352_v41 = vsel %vm340_vm1, %v849_v4, %v335_v39 }
 0x109   : > { %v382_v44 = vunpack.c.l.b16 %v344_v40  ;;  %v386_v45 = vunpack.c.l.b16 %v352_v41 }
 0x10b   : > { %v389_v47 = vpack.c.b16 %v382_v44, %v381_v43  ;;  %v391_v48 = vpack.c.b16 %v386_v45, %v385_v42 }
 0x10d   : > { %453 = vmatmul.bf16.vlgmr.msra.gmra.mxu0 %v389_v47  ;;  %463 = vmatmul.bf16.vlgmr.msra.gmra.mxu2 %v391_v48 }
 0x10f   : > { %v329_v50 = vpop.permute.xlu1 %328  ;;  %v337_v54 = vpop.permute.xlu0 %336 }
 0x110   : > { %v346_v51 = vsel %vm340_vm1, %v866_v14, %v329_v50  ;;  %v354_v56 = vsel %vm340_vm1, %v863_v13, %v337_v54 }
 0x111   : > { %v383_v53 = vunpack.c.l.b16 %v346_v51  ;;  %v387_v59 = vunpack.c.l.b16 %v354_v56 }
 0x113   : > { %v390_v55 = vpack.c.b16 %v384_v52, %v383_v53 }
 0x115   : > { %458 = vmatmul.bf16.vlgmr.msra.gmra.mxu1 %v390_v55 }
 0x117   : > { %v339_v57 = vpop.permute.xlu1 %338 }
 0x118   : > { %v356_v58 = vsel %vm340_vm1, %v877_v19, %v339_v57 }
 0x119   : > { %v388_v60 = vunpack.c.l.b16 %v356_v58 }
 0x11b   : > { %v392_v61 = vpack.c.b16 %v388_v60, %v387_v59 }
 0x11d   : > { %468 = vmatmul.bf16.vlgmr.msra.gmra.mxu3 %v392_v61 }
 0x18a   : > { %v924_v62 = vpop.f32.mrf.mxu0 }
 0x18b   : > { %v497_v1 = vmul.f32 %v924_v62, %v924_v62  ;;  %v475_v5 = vsel %vm474_vm2, %v924_v62, 0.0 }
 0x18d   : > { %v505_v8 = vsel %vm474_vm2, %v497_v1, 0.0 }
 0x190   : > { %v936_v4 = vpop.f32.mrf.mxu2 }
 0x191   : > { %v501_v19 = vmul.f32 %v936_v4, %v936_v4  ;;  %v482_v23 = vsel %vm474_vm2, %v936_v4, 0.0 }
 0x192   : > { %v926_v63 = vpop.f32.mrf.mxu0  ;;  %v928_v0 = vpop.f32.mrf.mxu1 }
 0x193   : > { %v476_v2 = vsel %vm474_vm2, %v926_v63, 0.0  ;;  %v498_v3 = vmul.f32 %v926_v63, %v926_v63  ;;  %v499_v9 = vmul.f32 %v928_v0, %v928_v0  ;;  %v478_v11 = vsel %vm474_vm2, %v928_v0, 0.0 }
 0x194   : > { %v477_v7 = vadd.f32 %v476_v2, %v475_v5  ;;  %v512_v26 = vsel %vm474_vm2, %v501_v19, 0.0 }
 0x195   : > { %v506_v6 = vsel %vm474_vm2, %v498_v3, 0.0  ;;  %v508_v14 = vsel %vm474_vm2, %v499_v9, 0.0 }
 0x196   : > { %v507_v10 = vadd.f32 %v506_v6, %v505_v8  ;;  %v479_v12 = vadd.f32 %v478_v11, %v477_v7 }
 0x198   : > { %v509_v17 = vadd.f32 %v508_v14, %v507_v10  ;;  %v956_v21 = vpop.f32.mrf.mxu2 }
 0x199   : > { %v502_v27 = vmul.f32 %v956_v21, %v956_v21  ;;  %v484_v29 = vsel %vm474_vm2, %v956_v21, 0.0 }
 0x19a   : > { %v946_v13 = vpop.f32.mrf.mxu1 }
 0x19b   : > { %v480_v15 = vsel %vm474_vm2, %v946_v13, 0.0  ;;  %v500_v16 = vmul.f32 %v946_v13, %v946_v13  ;;  %v514_v32 = vsel %vm474_vm2, %v502_v27, 0.0 }
 0x19c   : > { %v481_v18 = vadd.f32 %v480_v15, %v479_v12 }
 0x19d   : > { %v510_v20 = vsel %vm474_vm2, %v500_v16, 0.0 }
 0x19e   : > { %v511_v22 = vadd.f32 %v510_v20, %v509_v17  ;;  %v483_v24 = vadd.f32 %v482_v23, %v481_v18 }
 0x1a0   : > { %v960_v25 = vpop.f32.mrf.mxu3  ;;  %v513_v28 = vadd.f32 %v512_v26, %v511_v22  ;;  %v485_v31 = vadd.f32 %v484_v29, %v483_v24 }
 0x1a1   : > { %v503_v30 = vmul.f32 %v960_v25, %v960_v25  ;;  %v486_v33 = vsel %vm474_vm2, %v960_v25, 0.0 }
 0x1a2   : > { %v515_v34 = vadd.f32 %v514_v32, %v513_v28  ;;  %v487_v36 = vadd.f32 %v486_v33, %v485_v31 }
 0x1a3   : > { %v516_v35 = vsel %vm474_vm2, %v503_v30, 0.0 }
 0x1a4   : > { %v517_v40 = vadd.f32 %v516_v35, %v515_v34 }
 0x1a8   : > { %v471_v37 = vpop.f32.mrf.mxu3 }
 0x1a9   : > { %v488_v38 = vsel %vm474_vm2, %v471_v37, 0.0  ;;  %v504_v39 = vmul.f32 %v471_v37, %v471_v37 }
 0x1aa   : > { %v489_v41 = vadd.f32 %v488_v38, %v487_v36 }
 0x1ab   : > { %v518_v42 = vsel %vm474_vm2, %v504_v39, 0.0 }
 0x1ac   : > { %v490_v43 = vrot.slane %v489_v41, 4  ;;  %v519_v44 = vadd.f32 %v518_v42, %v517_v40 }
 0x1ae   : > { %v491_v45 = vadd.f32 %v490_v43, %v489_v41  ;;  %v520_v46 = vrot.slane %v519_v44, 4 }
 0x1b0   : > { %v492_v47 = vrot.slane %v491_v45, 2  ;;  %v521_v48 = vadd.f32 %v520_v46, %v519_v44 }
 0x1b2   : > { %v493_v49 = vadd.f32 %v492_v47, %v491_v45  ;;  %v522_v50 = vrot.slane %v521_v48, 2 }
 0x1b4   : > { %v494_v51 = vrot.slane %v493_v49, 1  ;;  %v523_v52 = vadd.f32 %v522_v50, %v521_v48 }
 0x1b6   : > { %v495_v53 = vadd.f32 %v494_v51, %v493_v49  ;;  %v524_v54 = vrot.slane %v523_v52, 1 }
 0x1b8   : > { %v496_v55 = vmul.f32 0.015625, %v495_v53  ;;  %v525_v56 = vadd.f32 %v524_v54, %v523_v52 }
 0x1ba   : > { %v526_v57 = vmul.f32 0.015625, %v525_v56  ;;  %v527_v58 = vmul.f32 %v496_v55, %v496_v55  ;;  %v530_v7 = vsub.f32 %v924_v62, %v496_v55  ;;  %v531_v8 = vsub.f32 %v926_v63, %v496_v55 }
 0x1bb   : > { %v532_v10 = vsub.f32 %v928_v0, %v496_v55  ;;  %v533_v11 = vsub.f32 %v946_v13, %v496_v55  ;;  %v534_v12 = vsub.f32 %v936_v4, %v496_v55  ;;  %v535_v14 = vsub.f32 %v956_v21, %v496_v55 }
 0x1bc   : > { %v528_v59 = vsub.f32 %v526_v57, %v527_v58  ;;  %v536_v15 = vsub.f32 %v960_v25, %v496_v55  ;;  %v537_v16 = vsub.f32 %v471_v37, %v496_v55 }
 0x1be   : > { %v529_v60 = vmax.f32 %v528_v59, 0.0 }
 0x1c0   : > { %v538_v61 = vadd.f32 1e-05, %v529_v60 }
 0x1c2   : > { %776 = vrsqrt.f32 %v538_v61  ;;  %vm545_vm4 = vweird.f32 %v538_v61 }
 0x1c8   : > { %v777_v1 = vpop.eup %776 }
 0x1c9   : > { %v540_v2 = vmul.f32 %v777_v1, %v538_v61  ;;  %vm546_vm3 = vweird.f32 %v777_v1 }
 0x1ca   : > { %vm547_vm5 = vmor %vm545_vm4, %vm546_vm3 }
 0x1cb   : > { %v541_v3 = vmul.f32 %v777_v1, %v540_v2 }
 0x1cd   : > { %v542_v5 = vmul.f32 0.5, %v541_v3 }
 0x1cf   : > { %v543_v6 = vsub.f32 1.5, %v542_v5 }
 0x1d1   : > { %v544_v9 = vmul.f32 %v777_v1, %v543_v6 }
 0x1d3   : > { %v548_v17 = vsel %vm547_vm5, %v777_v1, %v544_v9 }
 0x1d4   : > { %v549_v62 = vmul.f32 %v548_v17, %v530_v7  ;;  %v550_v18 = vmul.f32 %v548_v17, %v531_v8  ;;  %v551_v63 = vmul.f32 %v548_v17, %v532_v10  ;;  %v552_v19 = vmul.f32 %v548_v17, %v533_v11 }
 0x1d5   : > { %v553_v20 = vmul.f32 %v548_v17, %v534_v12  ;;  %v554_v22 = vmul.f32 %v548_v17, %v535_v14  ;;  %v555_v0 = vmul.f32 %v548_v17, %v536_v15  ;;  %v556_v23 = vmul.f32 %v548_v17, %v537_v16 }
 0x1d6   : > { %v557_v13 = vmul.f32 0.2, %v549_v62  ;;  %v558_v24 = vmul.f32 0.2, %v550_v18  ;;  %v559_v4 = vmul.f32 0.2, %v551_v63 }
 0x1d7   : > { %v560_v26 = vmul.f32 0.2, %v552_v19  ;;  %v561_v21 = vmul.f32 0.2, %v553_v20  ;;  %v562_v27 = vmul.f32 0.2, %v554_v22 }
 0x1d8   : > { %v563_v28 = vmul.f32 0.2, %v555_v0  ;;  %v564_v25 = vmul.f32 0.2, %v556_v23  ;;  %v565_v29 = vmax.f32 %v549_v62, %v557_v13  ;;  %v566_v30 = vmax.f32 %v550_v18, %v558_v24 }
 0x1d9   : > { %v567_v31 = vmax.f32 %v551_v63, %v559_v4  ;;  %v568_v32 = vmax.f32 %v552_v19, %v560_v26  ;;  %v569_v33 = vmax.f32 %v553_v20, %v561_v21  ;;  %v570_v34 = vmax.f32 %v554_v22, %v562_v27 }
 0x1da   : > { %v571_v35 = vmax.f32 %v555_v0, %v563_v28  ;;  %v573_v36 = vpack.c.bf16 %v565_v29, %v565_v29  ;;  %v574_v37 = vpack.c.bf16 %v566_v30, %v566_v30  ;;  %v572_v38 = vmax.f32 %v556_v23, %v564_v25 }
 0x1db   : > { %v575_v39 = vpack.c.bf16 %v567_v31, %v567_v31  ;;  %v576_v40 = vpack.c.bf16 %v568_v32, %v568_v32  ;;  %v577_v41 = vpack.c.bf16 %v569_v33, %v569_v33  ;;  %v578_v42 = vpack.c.bf16 %v570_v34, %v570_v34 }
 0x1dc   : > { %582 = vst.msk [vmem:[%s143_s8] sm:$0xf] %vm581_vm6, %v573_v36  ;;  %v579_v43 = vpack.c.bf16 %v571_v35, %v571_v35  ;;  %v580_v44 = vpack.c.bf16 %v572_v38, %v572_v38 }
 0x1dd   : > { %583 = vst.msk [vmem:[%s143_s8 + $0x4] sm:$0xf] %vm581_vm6, %v574_v37 }
 0x1de   : > { %584 = vst.msk [vmem:[%s143_s8 + $0x8] sm:$0xf] %vm581_vm6, %v575_v39 }
 0x1df   : > { %585 = vst.msk [vmem:[%s143_s8 + $0xc] sm:$0xf] %vm581_vm6, %v576_v40 }
 0x1e0   : > { %586 = vst.msk [vmem:[%s143_s8 + $0x10] sm:$0xf] %vm581_vm6, %v577_v41 }
 0x1e1   : > { %587 = vst.msk [vmem:[%s143_s8 + $0x14] sm:$0xf] %vm581_vm6, %v578_v42 }
 0x1e2   : > { %588 = vst.msk [vmem:[%s143_s8 + $0x18] sm:$0xf] %vm581_vm6, %v579_v43 }
 0x1e3   : > { %589 = vst.msk [vmem:[%s143_s8 + $0x1c] sm:$0xf] %vm581_vm6, %v580_v44 }
 0x1e4 PF: > { %s12_s9 = sadd.s32 1, %s784_s9  }
 0x1e5   : > { %p9_p4 = scmp.ge.s32.totalorder %s12_s9, 4  }
 0x1e7   :  { %11 = sbr.rel (!%p9_p4) target bundleno = 1 (0x1), region = 58 }

// kernel: nlayer_discriminator.7
= control target key start
LH: loop header
LB: loop body
LE: loop exit
PB: predicated region body
PF: predicated region fallthrough
CT: control target
= control target key end

     0   :  { %s656_s9 = smov 0   ;;  %s746_s0 = inlined_call_operand.vmem [shape: bf16[2,5,5,64], index: 0, kind: input, shape index: {}]   ;;  %s747_s1 = inlined_call_operand.vmem [shape: bf16[256,32], index: 1, kind: input, shape index: {}]   ;;  %s748_s2 = inlined_call_operand.vmem [shape: bf16[2,4,4,32], index: 2, kind: output, shape index: {}]  }
   0x1 LB: > { %s529_s10 = sadd.s32 4294967295, %s638_s9   ;;  %p533_p0 = scmp.ge.s32.totalorder %s638_s9, 1  ;;  %s638_s9 = sphi %s656_s9, %s12_s9  }
   0x2   : > { %p112_p1 = scmp.lt.s32.totalorder %s638_s9, 3 }
   0x4   : > { %p113_p2 = pnand %p533_p0, %p112_p1 }
   0x5   : > { %p134_p3 = scmp.lt.s32.totalorder (!%p113_p2), %s529_s10, 1  ;;  %s640_s27 = smov (!%p113_p2), 64  }
   0x6   : > { %116 = sbr.rel (%p113_p2) target bundleno = 353 (0x161), region = 28 }
   0xb   : > { %v611_v0 = vld [vmem:[%s747_s1 + $0x38] sm:$0xff]  ;;  %s750_s10 = smov (!%p134_p3, %s529_s10), 1  ;;  %v610_v2 = vld [vmem:[%s747_s1 + $0x30] sm:$0xff]  ;;  %v609_v4 = vld [vmem:[%s747_s1 + $0x28] sm:$0xff]  ;;  %vm214_vm0 = vcmask 523264   ;;  %vm238_vm1 = vcmask 1041408  }
   0xc   : > { %v619_v1 = vld [vmem:[%s747_s1 + $0x78] sm:$0xff]  ;;  %386 = vmatpush.bf16.msra.mxu0 %v611_v0  ;;  %v618_v3 = vld [vmem:[%s747_s1 + $0x70] sm:$0xff]  ;;  %s620_s19 = smul.u32 20, %s750_s10  ;;  %v617_v5 = vld [vmem:[%s747_s1 + $0x68] sm:$0xff]  ;;  %vm414_vm2 = vcmask 261120   ;;  %vm469_vm6 = vcmask 254976  }
   0xd   : > { %400 = vmatpush.bf16.msra.mxu1 %v619_v1  ;;  %v608_v41 = vld [vmem:[%s747_s1 + $0x20] sm:$0xff]  ;;  %v607_v43 = vld [vmem:[%s747_s1 + $0x18] sm:$0xff]  ;;  %v606_v45 = vld [vmem:[%s747_s1 + $0x10] sm:$0xff] }
   0xe   : > { %s682_s22 = scalar_lea.vmem %s746_s0, %s620_s19  ;;  %v616_v42 = vld [vmem:[%s747_s1 + $0x60] sm:$0xff]  ;;  %v615_v44 = vld [vmem:[%s747_s1 + $0x58] sm:$0xff]  ;;  %v614_v46 = vld [vmem:[%s747_s1 + $0x50] sm:$0xff] }
   0xf   : > { %v152_v6 = vld [vmem:[%s682_s22 + $0xc] sm:$0x7]  ;;  %v150_v7 = vld [vmem:[%s682_s22 + $0x4] sm:$0x7]  ;;  %v153_v8 = vld [vmem:[%s682_s22 + $0x10] sm:$0x7] }
  0x10   : > { %387 = vmatpush.bf16.msra.mxu0 %v610_v2  ;;  %v162_v9 = vunpack.c.l.b16 %v152_v6  ;;  %v160_v10 = vunpack.c.l.b16 %v150_v7  ;;  %v163_v11 = vunpack.c.l.b16 %v153_v8  ;;  %v151_v12 = vld [vmem:[%s682_s22 + $0x8] sm:$0x7]  ;;  %v149_v13 = vld [vmem:[%s682_s22] sm:$0x7]  ;;  %v145_v51 = vld [vmem:[%s682_s22 + $0x4] sm:$0x3] }
  0x11   : > { %401 = vmatpush.bf16.msra.mxu1 %v618_v3  ;;  %v161_v14 = vunpack.c.l.b16 %v151_v12  ;;  %v159_v15 = vunpack.c.l.b16 %v149_v13  ;;  %v605_v47 = vld [vmem:[%s747_s1 + $0x8] sm:$0xff]  ;;  %v604_v49 = vld [vmem:[%s747_s1] sm:$0xff]  ;;  %v148_v62 = vld [vmem:[%s682_s22 + $0x10] sm:$0x3] }
  0x12   : > { %v167_v16 = vpack.c.b16 %v162_v9, %v162_v9  ;;  %v165_v17 = vpack.c.b16 %v160_v10, %v160_v10  ;;  %v168_v18 = vpack.c.b16 %v163_v11, %v163_v11  ;;  %v613_v48 = vld [vmem:[%s747_s1 + $0x48] sm:$0xff]  ;;  %v612_v50 = vld [vmem:[%s747_s1 + $0x40] sm:$0xff] }
  0x13   : > { %v166_v19 = vpack.c.b16 %v161_v14, %v161_v14  ;;  %v164_v20 = vpack.c.b16 %v159_v15, %v159_v15  ;;  %v144_v53 = vld [vmem:[%s682_s22] sm:$0x3]  ;;  %v147_v58 = vld [vmem:[%s682_s22 + $0xc] sm:$0x3]  ;;  %v146_v63 = vld [vmem:[%s682_s22 + $0x8] sm:$0x3] }
  0x14   : > { %388 = vmatpush.bf16.msra.mxu0 %v609_v4  ;;  %v191_v21 = vshrl.u32 %v167_v16, 16  ;;  %v193_v22 = vshll.u32 %v167_v16, 16  ;;  %v177_v23 = vshrl.u32 %v165_v17, 16  ;;  %v179_v24 = vshll.u32 %v165_v17, 16  ;;  %s603_s22 = sshll.u32 %s750_s10, 3 }
  0x15   : > { %402 = vmatpush.bf16.msra.mxu1 %v617_v5  ;;  %v200_v25 = vshll.u32 %v168_v18, 16  ;;  %v186_v26 = vshll.u32 %v166_v19, 16  ;;  %v170_v29 = vshrl.u32 %v164_v20, 16  ;;  %v172_v30 = vshll.u32 %v164_v20, 16  ;;  %s143_s25 = scalar_lea.vmem %s748_s2, %s603_s22 }
  0x16   : > { %v195_v27 = vrot.slane %v193_v22, 1  ;;  %v181_v28 = vrot.slane %v179_v24, 1  ;;  %v198_v34 = vshrl.u32 %v168_v18, 16  ;;  %v184_v36 = vshrl.u32 %v166_v19, 16 }
  0x17   : > { %v174_v33 = vrot.slane %v172_v30, 1  ;;  %v202_v35 = vrot.slane %v200_v25, 1  ;;  %v188_v37 = vrot.slane %v186_v26, 1 }
  0x18   : > { %v196_v31 = vor.u32 %v195_v27, %v191_v21  ;;  %v182_v32 = vor.u32 %v181_v28, %v177_v23  ;;  %389 = vmatpush.bf16.msra.mxu0 %v608_v41 }
  0x19   : > { %v175_v38 = vor.u32 %v174_v33, %v170_v29  ;;  %v203_v39 = vor.u32 %v202_v35, %v198_v34  ;;  %v189_v40 = vor.u32 %v188_v37, %v184_v36  ;;  %403 = vmatpush.bf16.msra.mxu1 %v616_v42 }
  0x1a   : > { %210 = vrot.lane.b32.xlu1 %v196_v31, %s640_s27  ;;  %206 = vrot.lane.b32.xlu0 %v182_v32, %s640_s27 }
  0x1b   : > { %204 = vrot.lane.b32.xlu2 %v175_v38, %s640_s27 }
  0x1c   : > { %390 = vmatpush.bf16.msra.mxu0 %v607_v43 }
  0x1d   : > { %404 = vmatpush.bf16.msra.mxu1 %v615_v44 }
  0x20   : > { %391 = vmatpush.bf16.msra.mxu0 %v606_v45 }
  0x21   : > { %405 = vmatpush.bf16.msra.mxu1 %v614_v46 }
  0x22   : > { %212 = vrot.lane.b32.xlu1 %v203_v39, %s640_s27  ;;  %208 = vrot.lane.b32.xlu0 %v189_v40, %s640_s27 }
  0x24   : > { %392 = vmatpush.bf16.msra.mxu0 %v605_v47 }
  0x25   : > { %406 = vmatpush.bf16.msra.mxu1 %v613_v48 }
  0x28   : > { %393 = vmatpush.bf16.msra.mxu0 %v604_v49 }
  0x29   : > { %407 = vmatpush.bf16.msra.mxu1 %v612_v50 }
  0x75   : > { %v205_v52 = vpop.permute.xlu2 %204 }
  0x76   : > { %v217_v57 = vsel %vm214_vm0, %v144_v53, %v205_v52 }
  0x8c   : > { %v211_v54 = vpop.permute.xlu1 %210  ;;  %v207_v55 = vpop.permute.xlu0 %206 }
  0x8d   : > { %v220_v56 = vsel %vm214_vm0, %v145_v51, %v207_v55  ;;  %v226_v61 = vsel %vm214_vm0, %v147_v58, %v211_v54 }
  0x8e   : > { %v234_v59 = vrot.slane %v220_v56, 6  ;;  %v236_v0 = vrot.slane %v226_v61, 6 }
  0x90   : > { %v240_v60 = vsel %vm238_vm1, %v217_v57, %v234_v59 }
  0x91   : > { %279 = vst [vmem:[#allocation1] ss:$4 sm:$0xff] %v240_v60 }
  0x94   : > { %v213_v1 = vpop.permute.xlu1 %212  ;;  %v209_v2 = vpop.permute.xlu0 %208 }
  0x95   : > { %v229_v3 = vsel %vm214_vm0, %v148_v62, %v213_v1  ;;  %v223_v4 = vsel %vm214_vm0, %v146_v63, %v209_v2 }
  0x96   : > { %v237_v5 = vrot.slane %v229_v3, 6  ;;  %v235_v6 = vrot.slane %v223_v4, 6  ;;  %v244_v7 = vsel %vm238_vm1, %v223_v4, %v236_v0 }
  0x97   : > { %283 = vst [vmem:[#allocation1 + $0x2] ss:$4 sm:$0xff] %v244_v7 }
  0x98   : > { %v246_v8 = vsel %vm238_vm1, %v226_v61, %v237_v5  ;;  %v242_v9 = vsel %vm238_vm1, %v220_v56, %v235_v6 }
  0x99   : > { %285 = vst [vmem:[#allocation1 + $0x3] ss:$4 sm:$0xff] %v246_v8 }
  0x9a   : > { %281 = vst [vmem:[#allocation1 + $0x1] ss:$4 sm:$0xff] %v242_v9 }
  0xa1   : > { %v286_v10 = vld.sshfl [vmem:[#allocation1] sm:$0xff pattern:$0x73625140]  ;;  %v287_v11 = vld.sshfl [vmem:[#allocation1 + $0x8] sm:$0xff pattern:$0x73625140] }
  0xa2   : > { %394 = vmatmul.bf16.vlgmr.msra.gmra.mxu0 %v286_v10  ;;  %408 = vmatmul.bf16.vlgmr.msra.gmra.mxu1 %v287_v11 }
 0x11f   : > { %v395_v12 = vpop.f32.mrf.mxu0  ;;  %v409_v13 = vpop.f32.mrf.mxu1 }
 0x120   : > { %v410_v14 = vadd.f32 %v409_v13, %v395_v12 }
 0x122   : > { %v425_v17 = vmul.f32 %v410_v14, %v410_v14  ;;  %v415_v19 = vsel %vm414_vm2, %v410_v14, 0.0 }
 0x124   : > { %v427_v23 = vsel %vm414_vm2, %v425_v17, 0.0 }
 0x127   : > { %v397_v15 = vpop.f32.mrf.mxu0  ;;  %v411_v16 = vpop.f32.mrf.mxu1 }
 0x128   : > { %v412_v18 = vadd.f32 %v411_v16, %v397_v15 }
 0x12a   : > { %v416_v20 = vsel %vm414_vm2, %v412_v18, 0.0  ;;  %v426_v21 = vmul.f32 %v412_v18, %v412_v18 }
 0x12b   : > { %v417_v22 = vadd.f32 %v416_v20, %v415_v19 }
 0x12c   : > { %v428_v24 = vsel %vm414_vm2, %v426_v21, 0.0 }
 0x12d   : > { %v418_v25 = vrot.slane %v417_v22, 4  ;;  %v429_v26 = vadd.f32 %v428_v24, %v427_v23 }
 0x12f   : > { %v419_v27 = vadd.f32 %v418_v25, %v417_v22  ;;  %v430_v28 = vrot.slane %v429_v26, 4 }
 0x131   : > { %v420_v29 = vrot.slane %v419_v27, 2  ;;  %v431_v30 = vadd.f32 %v430_v28, %v429_v26 }
 0x133   : > { %v421_v31 = vadd.f32 %v420_v29, %v419_v27  ;;  %v432_v32 = vrot.slane %v431_v30, 2 }
 0x135   : > { %v422_v33 = vrot.slane %v421_v31, 1  ;;  %v433_v34 = vadd.f32 %v432_v32, %v431_v30 }
 0x137   : > { %v423_v35 = vadd.f32 %v422_v33, %v421_v31  ;;  %v434_v36 = vrot.slane %v433_v34, 1 }
 0x139   : > { %v424_v37 = vmul.f32 0.0625, %v423_v35  ;;  %v435_v38 = vadd.f32 %v434_v36, %v433_v34 }
 0x13b   : > { %v436_v39 = vmul.f32 0.0625, %v435_v38  ;;  %v437_v40 = vmul.f32 %v424_v37, %v424_v37  ;;  %v440_v50 = vsub.f32 %v410_v14, %v424_v37  ;;  %v441_v51 = vsub.f32 %v412_v18, %v424_v37 }
 0x13d   : > { %v438_v41 = vsub.f32 %v436_v39, %v437_v40 }
 0x13f   : > { %v439_v42 = vmax.f32 %v438_v41, 0.0 }
 0x141   : > { %v442_v43 = vadd.f32 1e-05, %v439_v42 }
 0x143   : > { %630 = vrsqrt.f32 %v442_v43  ;;  %vm449_vm4 = vweird.f32 %v442_v43 }
 0x149   : > { %v631_v44 = vpop.eup %630 }
 0x14a   : > { %v444_v45 = vmul.f32 %v631_v44, %v442_v43  ;;  %vm450_vm3 = vweird.f32 %v631_v44 }
 0x14b   : > { %vm451_vm5 = vmor %vm449_vm4, %vm450_vm3 }
 0x14c   : > { %v445_v46 = vmul.f32 %v631_v44, %v444_v45 }
 0x14e   : > { %v446_v47 = vmul.f32 0.5, %v445_v46 }
 0x150   : > { %v447_v48 = vsub.f32 1.5, %v446_v47 }
 0x152   : > { %v448_v49 = vmul.f32 %v631_v44, %v447_v48 }
 0x154   : > { %v452_v52 = vsel %vm451_vm5, %v631_v44, %v448_v49 }
 0x155   : > { %v453_v53 = vmul.f32 %v452_v52, %v440_v50  ;;  %v454_v54 = vmul.f32 %v452_v52, %v441_v51 }
 0x157   : > { %v455_v55 = vmul.f32 0.2, %v453_v53  ;;  %v456_v56 = vmul.f32 0.2, %v454_v54 }
 0x159   : > { %v457_v57 = vmax.f32 %v453_v53, %v455_v55  ;;  %v458_v58 = vmax.f32 %v454_v54, %v456_v56 }
 0x15b   : > { %v461_v59 = vrot.slane %v457_v57, 4  ;;  %v462_v60 = vrot.slane %v458_v58, 4  ;;  %v465_v61 = vpack.c.bf16 %v457_v57, %v457_v57  ;;  %v467_v62 = vpack.c.bf16 %v458_v58, %v458_v58 }
 0x15d   : > { %v466_v63 = vpack.c.bf16 %v461_v59, %v461_v59  ;;  %v468_v0 = vpack.c.bf16 %v462_v60, %v462_v60  ;;  %470 = vst.msk [vmem:[%s143_s25] sm:$0x3] %vm469_vm6, %v465_v61 }
 0x15e   : > { %472 = vst.msk [vmem:[%s143_s25 + $0x4] sm:$0x3] %vm469_vm6, %v467_v62 }
 0x15f   : > { %471 = vst.msk [vmem:[%s143_s25 + $0x2] sm:$0x3] %vm469_vm6, %v466_v63 }
 0x160   : > { %473 = vst.msk [vmem:[%s143_s25 + $0x6] sm:$0x3] %vm469_vm6, %v468_v0 }
 0x161 PF: > { %s12_s9 = sadd.s32 1, %s638_s9  }
 0x162   : > { %p9_p4 = scmp.ge.s32.totalorder %s12_s9, 4  }
 0x164   :  { %11 = sbr.rel (!%p9_p4) target bundleno = 1 (0x1), region = 61 }

// kernel: nlayer_discriminator.9
= control target key start
LH: loop header
LB: loop body
LE: loop exit
PB: predicated region body
PF: predicated region fallthrough
CT: control target
= control target key end

     0   :  { %s850_s0 = inlined_call_operand.vmem [shape: bf16[2,5,5,64], index: 0, kind: input, shape index: {}]   ;;  %s851_s1 = inlined_call_operand.vmem [shape: f32[1,1,1024], index: 1, kind: input, shape index: {}]   ;;  %s852_s2 = inlined_call_operand.<no memory space> [shape: f32[1,1], index: 2, kind: input, shape index: {}]   ;;  %s853_s3 = inlined_call_operand.hbm [shape: f32[2,2,2], index: 3, kind: output, shape index: {}]  }
   0x1   :  { %v8_v0 = vstv %s852_s2 }
   0x2   :  { %9 = vst [vmem:[#allocation2] sm:$0x1] %v8_v0 }
   0x3   :  { %10 = vsyncpa [#allocation4], 0 }
   0x4   :  { %12 = vsyncpa [#allocation4 + $0x1], 0  ;;  %s694_s14 = smov 0   ;;  %s696_s15 = smov 0  }
   0x5   :  { %s698_s16 = smov 0   ;;  %s700_s17 = smov 0  }
   0x6 LB: > { %s715_s2 = sadd.s32 4294967295, %s667_s17   ;;  %s551_s18 = sadd.s32 4294967294, %s667_s17   ;;  %s667_s17 = sphi %s700_s17, %s859_s17   ;;  %s663_s16 = sphi %s698_s16, %s858_s16   ;;  %s659_s15 = sphi %s696_s15, %s857_s15   ;;  %s655_s14 = sphi %s694_s14, %s856_s14  }
   0x7   : > { %s719_s19 = sadd.s32 1, %s667_s17   ;;  %s93_s20 = sadd.s32 1, %s663_s16 }
   0x8   : > { %s90_s21 = ssub.s32 %s667_s17, %s719_s19  ;;  %p103_p0 = scmp.ne.s32.totalorder %s663_s16, %s659_s15 }
   0x9   : > { %p91_p1 = scmp.eq.s32.totalorder %s90_s21, 0  ;;  %p104_p2 = scmp.eq.s32.totalorder %s715_s2, 1 }
   0xa   : > { %p109_p3 = scmp.ne.s32.totalorder %s659_s15, %s655_s14  ;;  %p110_p4 = scmp.eq.s32.totalorder %s551_s18, 1 }
   0xb   : > { %s730_s22 = scalar_select %p91_p1, %s663_s16, %s93_s20  }
   0xc   : > { %p732_p5 = por %p104_p2, %p103_p0  ;;  %p736_p6 = por %p110_p4, %p109_p3 }
   0xd   : > { %p554_p7 = scmp.ge.s32.totalorder %s667_s17, 1  ;;  %p142_p8 = scmp.lt.s32.totalorder %s667_s17, 3 }
   0xf   : > { %p143_p9 = pnand %p554_p7, %p142_p8 }
  0x10   : > { %p166_p10 = scmp.lt.s32.totalorder (!%p143_p9), %s715_s2, 1  ;;  %s669_s30 = smov (!%p143_p9), 64  }
  0x11   : > { %146 = sbr.rel (%p143_p9) target bundleno = 310 (0x136), region = 32  ;;  %s163_s6 = sand.u32 (!%p143_p9), 1, %s659_s15  }
  0x12   : > { %s555_s7 = sshll.u32 (!%p143_p9), %s163_s6, 1  ;;  %s558_s8 = sshll.u32 (!%p143_p9), %s715_s2, 1 }
  0x13   : > { %s487_s11 = scalar_lea.hbm (!%p143_p9), %s853_s3, %s558_s8  ;;  %s165_s12 = scalar_lea.vmem (!%p143_p9), [#allocation3], %s555_s7 }
  0x14   : > { %s489_s13 = sshll.u32 (!%p143_p9), %s165_s12, 4  ;;  %s491_s18 = sshll.u32 (!%p143_p9), %s487_s11, 4  ;;  %s490_s13 = int_to_ptr.vmem [resolvable:$true] %s489_s13  ;;  %s492_s18 = int_to_ptr.hbm [resolvable:$true] %s491_s18 }
  0x15   : > { %s619_s20 = sshra.s32 (!%p143_p9), %s492_s18, 4  ;;  %s625_s27 = scalar_lea.hbm (!%p143_p9), %s853_s3, 4  ;;  %s620_s20 = int_to_ptr.hbm [resolvable:$true] %s619_s20 }
  0x16   : > { %s167_s25 = scalar_select %p166_p10, %s715_s2, 1  ;;  %vm336_vm0 = vcmask 523264   ;;  %vm421_vm1 = vcmask 1041408   ;;  %vm471_vm2 = vcmask 1041409   ;;  %vm474_vm3 = vcmask 9216  }
  0x17   : > { %s477_s2 = scalar_lea.sflag [#allocation4], %s163_s6  ;;  %s621_s21 = scalar_lea.hbm %s620_s20, 2 }
  0x18   : > { %s561_s26 = smul.u32 20, %s167_s25  ;;  %p622_p11 = scmp.ne.s32.totalorder %s620_s20, %s621_s21 }
  0x19   : > { %p626_p0 = scmp.lt.s32.totalorder %s620_s20, %s853_s3  ;;  %p627_p1 = scmp.lt.s32.totalorder %s625_s27, %s621_s21 }
  0x1a   : > { %s747_s29 = scalar_lea.vmem %s850_s0, %s561_s26  ;;  %p623_p12 = pnand %p622_p11, %p732_p5 }
  0x1b   : > { %v186_v1 = vld [vmem:[%s747_s29] sm:$0x6]  ;;  %v187_v3 = vld [vmem:[%s747_s29 + $0x4] sm:$0x6]  ;;  %v179_v8 = vld [vmem:[%s747_s29 + $0xc] sm:$0x3]  ;;  %p628_p2 = por %p627_p1, %p626_p0 }
  0x1c   : > { %v176_v2 = vld [vmem:[%s747_s29] sm:$0x3]  ;;  %v276_v4 = vunpack.c.l.b16 %v186_v1  ;;  %v277_v6 = vunpack.c.l.b16 %v187_v3  ;;  %v177_v7 = vld [vmem:[%s747_s29 + $0x4] sm:$0x3]  ;;  %v189_v13 = vld [vmem:[%s747_s29 + $0xc] sm:$0x6]  ;;  %v199_v16 = vunpack.c.l.b16 %v179_v8  ;;  %p624_p13 = pneg %p623_p12 }
  0x1d   : > { %v196_v5 = vunpack.c.l.b16 %v176_v2  ;;  %v197_v9 = vunpack.c.l.b16 %v177_v7  ;;  %v178_v14 = vld [vmem:[%s747_s29 + $0x8] sm:$0x3]  ;;  %v279_v23 = vunpack.c.l.b16 %v189_v13  ;;  %v190_v38 = vld [vmem:[%s747_s29 + $0x10] sm:$0x6] }
  0x1e   : > { %v281_v10 = vpack.c.b16 %v276_v4, %v276_v4  ;;  %v282_v12 = vpack.c.b16 %v277_v6, %v277_v6  ;;  %v198_v24 = vunpack.c.l.b16 %v178_v14  ;;  %v188_v29 = vld [vmem:[%s747_s29 + $0x8] sm:$0x6]  ;;  %v204_v34 = vpack.c.b16 %v199_v16, %v199_v16  ;;  %v180_v44 = vld [vmem:[%s747_s29 + $0x10] sm:$0x3]  ;;  %p629_p3 = pnand %p628_p2, %p624_p13 }
  0x1f   : > { %v201_v11 = vpack.c.b16 %v196_v5, %v196_v5  ;;  %v202_v15 = vpack.c.b16 %v197_v9, %v197_v9  ;;  %v284_v35 = vpack.c.b16 %v279_v23, %v279_v23  ;;  %v278_v40 = vunpack.c.l.b16 %v188_v29  ;;  %v775_v23 = vld [vmem:[%s851_s1] sm:$0xff]  ;;  %v184_v29 = vld [vmem:[%s747_s29 + $0xc] sm:$0x2] }
  0x20   : > { %v287_v17 = vshrl.u32 %v281_v10, 16  ;;  %v290_v18 = vshll.u32 %v281_v10, 16  ;;  %v295_v21 = vshrl.u32 %v282_v12, 16  ;;  %v298_v22 = vshll.u32 %v282_v12, 16  ;;  %v181_v12 = vld [vmem:[%s747_s29] sm:$0x2] }
  0x21   : > { %v207_v19 = vshrl.u32 %v201_v11, 16  ;;  %v209_v20 = vshll.u32 %v201_v11, 16  ;;  %v216_v28 = vshll.u32 %v202_v15, 16  ;;  %v214_v33 = vshrl.u32 %v202_v15, 16  ;;  %v183_v15 = vld [vmem:[%s747_s29 + $0x8] sm:$0x2] }
  0x22   : > { %v289_v25 = vrot.slane %v287_v17, 1  ;;  %v292_v26 = vrot.slane %v290_v18, 2  ;;  %v297_v32 = vrot.slane %v295_v21, 1  ;;  %v300_v36 = vrot.slane %v298_v22, 2  ;;  %v182_v17 = vld [vmem:[%s747_s29 + $0x4] sm:$0x2] }
  0x23   : > { %v211_v27 = vrot.slane %v209_v20, 1  ;;  %v218_v37 = vrot.slane %v216_v28, 1  ;;  %v203_v39 = vpack.c.b16 %v198_v24, %v198_v24  ;;  %v283_v43 = vpack.c.b16 %v278_v40, %v278_v40  ;;  %v171_v24 = vld [vmem:[%s747_s29] sm:$0x1] }
  0x24   : > { %v293_v30 = vor.u32 %v292_v26, %v289_v25  ;;  %v230_v45 = vshll.u32 %v204_v34, 16  ;;  %v311_v46 = vshrl.u32 %v284_v35, 16  ;;  %v280_v47 = vunpack.c.l.b16 %v190_v38 }
  0x25   : > { %v212_v31 = vor.u32 %v211_v27, %v207_v19  ;;  %v221_v41 = vshrl.u32 %v203_v39, 16  ;;  %v223_v42 = vshll.u32 %v203_v39, 16  ;;  %v301_v48 = vor.u32 %v300_v36, %v297_v32  ;;  %v604_v19 = vld [vmem:[#allocation2] ss:$0 sm:$0xff] }
  0x26   : > { %326 = vrot.lane.b32.xlu1 %v293_v30, %s669_s30  ;;  %v219_v49 = vor.u32 %v218_v37, %v214_v33  ;;  %v314_v50 = vshll.u32 %v284_v35, 16  ;;  %v303_v52 = vshrl.u32 %v283_v43, 16  ;;  %v306_v53 = vshll.u32 %v283_v43, 16  ;;  %v173_v33 = vld [vmem:[%s747_s29 + $0x8] sm:$0x1] }
  0x27   : > { %241 = vrot.lane.b32.xlu0 %v212_v31, %s669_s30  ;;  %v225_v51 = vrot.slane %v223_v42, 1  ;;  %v200_v54 = vunpack.c.l.b16 %v180_v44  ;;  %v228_v56 = vshrl.u32 %v204_v34, 16  ;;  %v232_v57 = vrot.slane %v230_v45, 1  ;;  %v172_v44 = vld [vmem:[%s747_s29 + $0x4] sm:$0x1] }
  0x28   : > { %v313_v58 = vrot.slane %v311_v46, 1  ;;  %v316_v59 = vrot.slane %v314_v50, 2  ;;  %v285_v60 = vpack.c.b16 %v280_v47, %v280_v47  ;;  %v305_v61 = vrot.slane %v303_v52, 1 }
  0x29   : > { %v226_v55 = vor.u32 %v225_v51, %v221_v41  ;;  %v308_v62 = vrot.slane %v306_v53, 2  ;;  %v205_v63 = vpack.c.b16 %v200_v54, %v200_v54  ;;  %v233_v0 = vor.u32 %v232_v57, %v228_v56  ;;  %v185_v53 = vld [vmem:[%s747_s29 + $0x10] sm:$0x2] }
  0x2a   : > { %v317_v1 = vor.u32 %v316_v59, %v313_v58  ;;  %v319_v2 = vshrl.u32 %v285_v60, 16  ;;  %v322_v3 = vshll.u32 %v285_v60, 16  ;;  %v256_v13 = vunpack.c.l.b16 %v181_v12 }
  0x2b   : > { %245 = vrot.lane.b32.xlu2 %v226_v55, %s669_s30  ;;  %v309_v4 = vor.u32 %v308_v62, %v305_v61  ;;  %v237_v5 = vshll.u32 %v205_v63, 16  ;;  %v235_v8 = vshrl.u32 %v205_v63, 16  ;;  %v258_v18 = vunpack.c.l.b16 %v183_v15  ;;  %v175_v63 = vld [vmem:[%s747_s29 + $0x10] sm:$0x1] }
  0x2c   : > { %v321_v6 = vrot.slane %v319_v2, 1  ;;  %v324_v7 = vrot.slane %v322_v3, 2  ;;  %v261_v16 = vpack.c.b16 %v256_v13, %v256_v13  ;;  %v670_v20 = vmov 0  }
  0x2d   : > { %v239_v9 = vrot.slane %v237_v5, 1  ;;  %603 = vset.pattern.permute.xlu0 %v670_v20  ;;  %v257_v22 = vunpack.c.l.b16 %v182_v17  ;;  %v263_v25 = vpack.c.b16 %v258_v18, %v258_v18  ;;  %v390_v30 = vperm.slane %v775_v23, 1 }
  0x2e   : > { %328 = vrot.lane.b32.xlu1 %v301_v48, %s669_s30  ;;  %v325_v10 = vor.u32 %v324_v7, %v321_v6  ;;  %v266_v21 = vrot.slane %v261_v16, 1  ;;  %v389_v36 = vperm.slane %v775_v23, 0  ;;  %v259_v39 = vunpack.c.l.b16 %v184_v29  ;;  %v174_v16 = vld [vmem:[%s747_s29 + $0xc] sm:$0x1] }
  0x2f   : > { %243 = vrot.lane.b32.xlu0 %v219_v49, %s669_s30  ;;  %v240_v11 = vor.u32 %v239_v9, %v235_v8  ;;  %v262_v34 = vpack.c.b16 %v257_v22, %v257_v22  ;;  %v268_v38 = vrot.slane %v263_v25, 1  ;;  %v391_v46 = vperm.slane %v775_v23, 2 }
  0x30   : > { %v393_v47 = vperm.slane %v775_v23, 4  ;;  %v264_v49 = vpack.c.b16 %v259_v39, %v259_v39  ;;  %v392_v50 = vperm.slane %v775_v23, 3  ;;  %v394_v56 = vperm.slane %v775_v23, 5 }
  0x31   : > { %v267_v41 = vrot.slane %v262_v34, 1  ;;  %v260_v3 = vunpack.c.l.b16 %v185_v53  ;;  %v396_v20 = vperm.slane %v775_v23, 7 }
  0x32   : > { %v269_v2 = vrot.slane %v264_v49, 1 }
  0x33   : > { %330 = vrot.lane.b32.xlu2 %v309_v4, %s669_s30 }
  0x36   : > { %332 = vrot.lane.b32.xlu1 %v317_v1, %s669_s30 }
  0x37   : > { %247 = vrot.lane.b32.xlu0 %v233_v0, %s669_s30 }
  0x3b   : > { %249 = vrot.lane.b32.xlu2 %v240_v11, %s669_s30 }
  0x3f   : > { %334 = vrot.lane.b32.xlu0 %v325_v10, %s669_s30 }
  0x47   : > { %460 = vperm.xlu0 %603, %v604_v19   ;;  %v395_v19 = vperm.slane %v775_v23, 6 }
  0x85   : > { %v246_v14 = vpop.permute.xlu2 %245 }
  0x86   : > { %v347_v40 = vsel %vm336_vm0, %v173_v33, %v246_v14 }
  0x87   : > { %v381_v48 = vunpack.c.l.bf16 %v347_v40 }
  0x89   : > { %v409_v0 = vmul.f32 %v393_v47, %v381_v48  ;;  %v415_v1 = vmul.f32 %v391_v46, %v381_v48 }
  0x8b   : > { %v442_v22 = vsel %vm421_vm1, %v415_v1, 0.0 }
  0x8d   : > { %v331_v26 = vpop.permute.xlu2 %330 }
  0x8e   : > { %v367_v45 = vsel %vm336_vm0, %v268_v38, %v331_v26 }
  0x8f   : > { %v382_v57 = vunpack.c.l.bf16 %v367_v45 }
  0x91   : > { %v410_v9 = vmul.f32 %v394_v56, %v382_v57  ;;  %v416_v10 = vmul.f32 %v392_v50, %v382_v57 }
  0x93   : > { %v444_v33 = vsel %vm421_vm1, %v416_v10, 0.0 }
  0x95   : > { %v250_v62 = vpop.permute.xlu2 %249 }
  0x96   : > { %v355_v11 = vsel %vm336_vm0, %v175_v63, %v250_v62 }
  0x97   : > { %v385_v26 = vunpack.c.l.bf16 %v355_v11 }
  0x98   : > { %v327_v27 = vpop.permute.xlu1 %326 }
  0x99   : > { %v242_v28 = vpop.permute.xlu0 %241  ;;  %v359_v31 = vsel %vm336_vm0, %v266_v21, %v327_v27  ;;  %v429_v21 = vsel %vm421_vm1, %v409_v0, 0.0  ;;  %v265_v27 = vpack.c.b16 %v260_v3, %v260_v3 }
  0x9a   : > { %v339_v32 = vsel %vm336_vm0, %v171_v24, %v242_v28  ;;  %v378_v35 = vunpack.c.l.bf16 %v359_v31 }
  0x9b   : > { %v377_v37 = vunpack.c.l.bf16 %v339_v32  ;;  %v431_v32 = vsel %vm421_vm1, %v410_v9, 0.0 }
  0x9c   : > { %v406_v42 = vmul.f32 %v390_v30, %v378_v35 }
  0x9d   : > { %v405_v43 = vmul.f32 %v389_v36, %v377_v37 }
  0x9e   : > { %v423_v58 = vsel %vm421_vm1, %v406_v42, 0.0  ;;  %v270_v42 = vrot.slane %v265_v27, 1 }
  0x9f   : > { %v422_v59 = vsel %vm421_vm1, %v405_v43, 0.0 }
  0xa0   : > { %v329_v51 = vpop.permute.xlu1 %328  ;;  %v424_v8 = vadd.f32 %v423_v58, %v422_v59 }
  0xa1   : > { %v244_v52 = vpop.permute.xlu0 %243  ;;  %v363_v54 = vsel %vm336_vm0, %v267_v41, %v329_v51  ;;  %v419_v41 = vmul.f32 %v395_v19, %v385_v26 }
  0xa2   : > { %v343_v55 = vsel %vm336_vm0, %v172_v44, %v244_v52  ;;  %v380_v60 = vunpack.c.l.bf16 %v363_v54 }
  0xa3   : > { %v379_v61 = vunpack.c.l.bf16 %v343_v55  ;;  %v450_v55 = vsel %vm421_vm1, %v419_v41, 0.0 }
  0xa4   : > { %v408_v4 = vmul.f32 %v392_v50, %v380_v60  ;;  %v414_v5 = vmul.f32 %v390_v30, %v380_v60  ;;  %v467_v60 = vlaneseq }
  0xa5   : > { %v407_v6 = vmul.f32 %v391_v46, %v379_v61  ;;  %v413_v7 = vmul.f32 %v389_v36, %v379_v61 }
  0xa6   : > { %v427_v12 = vsel %vm421_vm1, %v408_v4, 0.0  ;;  %v440_v13 = vsel %vm421_vm1, %v414_v5, 0.0  ;;  %v468_v63 = vand.u32 127, %v467_v60 }
  0xa7   : > { %v425_v14 = vsel %vm421_vm1, %v407_v6, 0.0  ;;  %v439_v15 = vsel %vm421_vm1, %v413_v7, 0.0 }
  0xa8   : > { %v426_v17 = vadd.f32 %v425_v14, %v424_v8  ;;  %v441_v18 = vadd.f32 %v440_v13, %v439_v15  ;;  %v333_v25 = vpop.permute.xlu1 %332 }
  0xa9   : > { %v248_v24 = vpop.permute.xlu0 %247  ;;  %v371_v31 = vsel %vm336_vm0, %v269_v2, %v333_v25 }
  0xaa   : > { %v428_v28 = vadd.f32 %v427_v12, %v426_v17  ;;  %v443_v29 = vadd.f32 %v442_v22, %v441_v18  ;;  %v351_v30 = vsel %vm336_vm0, %v174_v16, %v248_v24  ;;  %v384_v23 = vunpack.c.l.bf16 %v371_v31 }
  0xab   : > { %v383_v34 = vunpack.c.l.bf16 %v351_v30 }
  0xac   : > { %v430_v35 = vadd.f32 %v429_v21, %v428_v28  ;;  %v412_v38 = vmul.f32 %v396_v20, %v384_v23  ;;  %v418_v39 = vmul.f32 %v394_v56, %v384_v23  ;;  %v445_v40 = vadd.f32 %v444_v33, %v443_v29 }
  0xad   : > { %v411_v36 = vmul.f32 %v395_v19, %v383_v34  ;;  %v417_v37 = vmul.f32 %v393_v47, %v383_v34 }
  0xae   : > { %v432_v43 = vadd.f32 %v431_v32, %v430_v35  ;;  %v448_v45 = vsel %vm421_vm1, %v418_v39, 0.0  ;;  %v435_v48 = vsel %vm421_vm1, %v412_v38, 0.0 }
  0xaf   : > { %v446_v44 = vsel %vm421_vm1, %v417_v37, 0.0  ;;  %v433_v46 = vsel %vm421_vm1, %v411_v36, 0.0 }
  0xb0   : > { %v447_v49 = vadd.f32 %v446_v44, %v445_v40  ;;  %v434_v50 = vadd.f32 %v433_v46, %v432_v43 }
  0xb1   : > { %v335_v51 = vpop.permute.xlu0 %334 }
  0xb2   : > { %v375_v47 = vsel %vm336_vm0, %v270_v42, %v335_v51  ;;  %v436_v52 = vadd.f32 %v435_v48, %v434_v50  ;;  %v449_v53 = vadd.f32 %v448_v45, %v447_v49 }
  0xb3   : > { %v386_v54 = vunpack.c.l.bf16 %v375_v47 }
  0xb4   : > { %437 = vadd.xlane.f32.xlu1 %v436_v52  ;;  %v451_v57 = vadd.f32 %v450_v55, %v449_v53 }
  0xb5   : > { %v420_v56 = vmul.f32 %v396_v20, %v386_v54 }
  0xb7   : > { %v452_v58 = vsel %vm421_vm1, %v420_v56, 0.0 }
  0xb8   : > { %v453_v59 = vadd.f32 %v452_v58, %v451_v57 }
  0xb9   : > { %v461_v61 = vpop.permute.xlu0 %460 }
  0xba   : > { %454 = vadd.xlane.f32.xlu2 %v453_v59 }
 0x127   : > { %v438_v62 = vpop.xlane.xlu1 %437 }
 0x128   : > { %v463_v0 = vadd.f32 %v461_v61, %v438_v62 }
 0x12a   : > { %v469_v3 = vperm.slane %v463_v0, %v468_v63 }
 0x12d   : > { %v455_v1 = vpop.xlane.xlu2 %454 }
 0x12e   : > { %v464_v2 = vadd.f32 %v461_v61, %v455_v1 }
 0x130   : > { %v470_v4 = vperm.slane %v464_v2, %v468_v63 }
 0x132   : > { %v472_v5 = vsel %vm471_vm2, %v470_v4, %v469_v3 }
 0x133   : > { %475 = vst.msk [vmem:[%s165_s12] sm:$0x3] %vm474_vm3, %v472_v5 }
 0x134   : > { %632 = shalt.err (!%p629_p3)
}
 0x135   : > { %562 = dma.vmem_to_hbm [thread:$0]  (%p732_p5), %s490_s13, 32, %s492_s18, %s477_s2  }
 0x136 PF: > { %p568_p4 = scmp.ge.s32.totalorder %s667_s17, 2  ;;  %s503_s30 = sand.u32 1, %s655_s14  }
 0x137   : > { %s504_s4 = scalar_lea.sflag [#allocation4], %s503_s30 }
 0x138   : > { %p565_p7 = pnand %p568_p4, %p736_p6 }
 0x13a   : > { %p566_p8 = pneg %p565_p7 }
 0x13c   : > { %650 = dma.done.wait (%p566_p8), %s504_s4, 32  }
 0x13d   : > { %652 = vsyncadd (%p566_p8), %s504_s4, 4294967264  ;;  %p15_p9 = scmp.ge.s32.totalorder %s719_s19, 4   ;;  %s856_s14 = smov %s659_s15 }
 0x13e   : > { %s857_s15 = smov %s663_s16  ;;  %s858_s16 = smov %s730_s22 }
 0x13f   : > { %s859_s17 = smov %s719_s19  ;;  %17 = sbr.rel (!%p15_p9) target bundleno = 6 (0x6), region = 67 }
 0x144   :  { %510 = vsyncpa [#allocation4], 1 }
 0x145   :  { %512 = vsyncpa [#allocation4 + $0x1], 1 }

// kernel: nlayer_discriminator.8
= control target key start
LH: loop header
LB: loop body
LE: loop exit
PB: predicated region body
PF: predicated region fallthrough
CT: control target
= control target key end

     0   :  { %s1126_s9 = smov 0   ;;  %s1374_s0 = inlined_call_operand.vmem [shape: bf16[2,6,6,32], index: 0, kind: input, shape index: {}]   ;;  %s1375_s1 = inlined_call_operand.vmem [shape: bf16[512,64], index: 1, kind: input, shape index: {}]   ;;  %s1376_s2 = inlined_call_operand.vmem [shape: bf16[2,3,3,64], index: 2, kind: output, shape index: {}]  }
   0x1 LB: > { %s914_s10 = sadd.s32 4294967295, %s1106_s9   ;;  %p918_p0 = scmp.ge.s32.totalorder %s1106_s9, 1  ;;  %s1106_s9 = sphi %s1126_s9, %s12_s9  }
   0x2   : > { %p112_p1 = scmp.lt.s32.totalorder %s1106_s9, 3 }
   0x4   : > { %p113_p2 = pnand %p918_p0, %p112_p1 }
   0x5   : > { %p134_p3 = scmp.lt.s32.totalorder (!%p113_p2), %s914_s10, 1  ;;  %s1108_s15 = smov (!%p113_p2), 64  }
   0x6   : > { %116 = sbr.rel (%p113_p2) target bundleno = 423 (0x1a7), region = 28  ;;  %s1109_s16 = smov (!%p113_p2), 32  }
   0x7   : > { %s1110_s17 = smov (!%p113_p2), 96  }
   0xb   : > { %s1380_s10 = smov (!%p134_p3, %s914_s10), 1  ;;  %vm324_vm0 = vcmask 261120   ;;  %vm343_vm1 = vcmask 523264   ;;  %vm356_vm2 = vcmask 785408   ;;  %vm386_vm3 = vcmask 1042434  }
   0xc   : > { %s1085_s11 = smul.u32 24, %s1380_s10  ;;  %vm395_vm4 = vcmask 1043459   ;;  %vm383_vm5 = vcmask 1040384   ;;  %vm393_vm6 = vcmask 1041409   ;;  %vm390_vm7 = vcmask 1041408  }
   0xd   : > { %vm397_vm8 = vcmask 1042433   ;;  %vm774_vm9 = vcmask 516096   ;;  %s1086_s30 = smul.u32 6, %s1380_s10  ;;  %vm847_vm13 = vcmask 517120   ;;  %vm848_vm14 = vsmask.f32 1280 }
   0xe   : > { %s1140_s14 = scalar_lea.vmem %s1374_s0, %s1085_s11  ;;  %vm1356_vm15 = vmand %vm847_vm13, %vm848_vm14 }
   0xf   : > { %v153_v0 = vld [vmem:[%s1140_s14 + $0xc] sm:$0x6]  ;;  %v152_v1 = vld [vmem:[%s1140_s14 + $0x8] sm:$0x6]  ;;  %v1149_v6 = vld [vmem:[%s1140_s14 + $0x4] sm:$0x3]  ;;  %s1353_s5 = scalar_lea.vmem %s1376_s2, %s1086_s30 }
  0x10   : > { %v1145_v2 = vld [vmem:[%s1140_s14 + $0xc] sm:$0x3]  ;;  %v237_v3 = vunpack.c.l.b16 %v153_v0  ;;  %v236_v4 = vunpack.c.l.b16 %v152_v1  ;;  %v151_v7 = vld [vmem:[%s1140_s14 + $0x4] sm:$0x6]  ;;  %v1153_v8 = vld [vmem:[%s1140_s14 + $0x10] sm:$0x3]  ;;  %v163_v12 = vunpack.c.l.b16 %v1149_v6 }
  0x11   : > { %v165_v5 = vunpack.c.l.b16 %v1145_v2  ;;  %v1161_v13 = vld [vmem:[%s1140_s14 + $0x8] sm:$0x3]  ;;  %v154_v14 = vld [vmem:[%s1140_s14 + $0x10] sm:$0x6]  ;;  %v235_v15 = vunpack.c.l.b16 %v151_v7  ;;  %v166_v16 = vunpack.c.l.b16 %v1153_v8  ;;  %v1171_v28 = vld [vmem:[%s1140_s14] sm:$0x3] }
  0x12   : > { %v1155_v9 = vpack.c.b16 %v237_v3, %v237_v3  ;;  %v1157_v10 = vpack.c.b16 %v236_v4, %v236_v4  ;;  %v164_v17 = vunpack.c.l.b16 %v1161_v13  ;;  %v169_v21 = vpack.c.b16 %v163_v12, %v163_v12  ;;  %v1174_v32 = vld [vmem:[%s1140_s14 + $0x14] sm:$0x3] }
  0x13   : > { %v171_v11 = vpack.c.b16 %v165_v5, %v165_v5  ;;  %v241_v22 = vpack.c.b16 %v235_v15, %v235_v15  ;;  %v238_v23 = vunpack.c.l.b16 %v154_v14  ;;  %v172_v26 = vpack.c.b16 %v166_v16, %v166_v16  ;;  %v155_v47 = vld [vmem:[%s1140_s14 + $0x14] sm:$0x6] }
  0x14   : > { %v249_v18 = vrot.slane %v1155_v9, 1  ;;  %v248_v19 = vrot.slane %v1157_v10, 1  ;;  %v170_v27 = vpack.c.b16 %v164_v17, %v164_v17  ;;  %v182_v29 = vshrl.u32 %v169_v21, 16 }
  0x15   : > { %v198_v20 = vshll.u32 %v171_v11, 16  ;;  %v196_v24 = vshrl.u32 %v171_v11, 16  ;;  %v184_v30 = vshll.u32 %v169_v21, 16  ;;  %v247_v31 = vrot.slane %v241_v22, 1  ;;  %v150_v11 = vld [vmem:[%s1140_s14] sm:$0x6] }
  0x16   : > { %258 = vrot.lane.b32.xlu1 %v249_v18, %s1108_s15  ;;  %256 = vrot.lane.b32.xlu0 %v248_v19, %s1108_s15  ;;  %v244_v34 = vpack.c.b16 %v238_v23, %v238_v23  ;;  %v162_v35 = vunpack.c.l.b16 %v1171_v28  ;;  %v205_v37 = vshll.u32 %v172_v26, 16  ;;  %v191_v38 = vshll.u32 %v170_v27, 16 }
  0x17   : > { %v200_v25 = vrot.slane %v198_v20, 1  ;;  %v186_v33 = vrot.slane %v184_v30, 1  ;;  %254 = vrot.lane.b32.xlu2 %v247_v31, %s1108_s15  ;;  %v167_v39 = vunpack.c.l.b16 %v1174_v32  ;;  %v203_v42 = vshrl.u32 %v172_v26, 16 }
  0x18   : > { %v189_v43 = vshrl.u32 %v170_v27, 16  ;;  %v250_v44 = vrot.slane %v244_v34, 1  ;;  %v207_v45 = vrot.slane %v205_v37, 1  ;;  %v193_v46 = vrot.slane %v191_v38, 1 }
  0x19   : > { %v201_v36 = vor.u32 %v200_v25, %v196_v24  ;;  %v187_v40 = vor.u32 %v186_v33, %v182_v29  ;;  %v173_v41 = vpack.c.b16 %v167_v39, %v167_v39  ;;  %v168_v48 = vpack.c.b16 %v162_v35, %v162_v35  ;;  %v1060_v39 = vld [vmem:[%s1375_s1 + $0x38] sm:$0xff] }
  0x1a   : > { %v239_v50 = vunpack.c.l.b16 %v155_v47  ;;  %v208_v53 = vor.u32 %v207_v45, %v203_v42  ;;  %v194_v54 = vor.u32 %v193_v46, %v189_v43  ;;  %v273_v58 = vshrl.u32 %v241_v22, 16  ;;  %v1084_v42 = vld [vmem:[%s1375_s1 + $0xf8] sm:$0xff]  ;;  %717 = vmatpush.bf16.msra.mxu0 %v1060_v39  ;;  %v1059_v43 = vld [vmem:[%s1375_s1 + $0x30] sm:$0xff] }
  0x1b   : > { %v212_v49 = vshll.u32 %v173_v41, 16  ;;  %v210_v51 = vshrl.u32 %v173_v41, 16  ;;  %v177_v55 = vshll.u32 %v168_v48, 16  ;;  %v276_v59 = vshll.u32 %v241_v22, 16  ;;  %v1076_v41 = vld [vmem:[%s1375_s1 + $0xb8] sm:$0xff]  ;;  %759 = vmatpush.bf16.msra.mxu3 %v1084_v42  ;;  %v1075_v45 = vld [vmem:[%s1375_s1 + $0xb0] sm:$0xff] }
  0x1c   : > { %v245_v56 = vpack.c.b16 %v239_v50, %v239_v50  ;;  %v175_v60 = vshrl.u32 %v168_v48, 16  ;;  %v281_v63 = vshrl.u32 %v1157_v10, 16  ;;  %v275_v0 = vrot.slane %v273_v58, 1  ;;  %745 = vmatpush.bf16.msra.mxu2 %v1076_v41  ;;  %v1083_v46 = vld [vmem:[%s1375_s1 + $0xf0] sm:$0xff]  ;;  %v1058_v50 = vld [vmem:[%s1375_s1 + $0x28] sm:$0xff] }
  0x1d   : > { %v214_v52 = vrot.slane %v212_v49, 1  ;;  %v179_v61 = vrot.slane %v177_v55, 1  ;;  %v278_v1 = vrot.slane %v276_v59, 2  ;;  %v284_v4 = vshll.u32 %v1157_v10, 16  ;;  %v1065_v55 = vld [vmem:[%s1375_s1 + $0x60] sm:$0xff] }
  0x1e   : > { %222 = vrot.lane.b32.xlu1 %v201_v36, %s1109_s16  ;;  %218 = vrot.lane.b32.xlu0 %v187_v40, %s1109_s16  ;;  %v251_v62 = vrot.slane %v245_v56, 1  ;;  %v289_v5 = vshrl.u32 %v1155_v9, 16  ;;  %v292_v7 = vshll.u32 %v1155_v9, 16  ;;  %v297_v14 = vshrl.u32 %v244_v34, 16  ;;  %v1068_v40 = vld [vmem:[%s1375_s1 + $0x78] sm:$0xff] }
  0x1f   : > { %260 = vrot.lane.b32.xlu2 %v250_v44, %s1108_s15  ;;  %v215_v57 = vor.u32 %v214_v52, %v210_v51  ;;  %v180_v3 = vor.u32 %v179_v61, %v175_v60  ;;  %v279_v12 = vor.u32 %v278_v1, %v275_v0  ;;  %v300_v15 = vshll.u32 %v244_v34, 16  ;;  %731 = vmatpush.bf16.msra.mxu1 %v1068_v40  ;;  %v1067_v44 = vld [vmem:[%s1375_s1 + $0x70] sm:$0xff]  ;;  %v1066_v51 = vld [vmem:[%s1375_s1 + $0x68] sm:$0xff]  ;;  %v1056_v61 = vld [vmem:[%s1375_s1 + $0x18] sm:$0xff] }
  0x20   : > { %v283_v16 = vrot.slane %v281_v63, 1  ;;  %v286_v17 = vrot.slane %v284_v4, 2  ;;  %v291_v18 = vrot.slane %v289_v5, 1  ;;  %v294_v19 = vrot.slane %v292_v7, 2  ;;  %718 = vmatpush.bf16.msra.mxu0 %v1059_v43  ;;  %746 = vmatpush.bf16.msra.mxu2 %v1075_v45  ;;  %v1074_v52 = vld [vmem:[%s1375_s1 + $0xa8] sm:$0xff]  ;;  %v1072_v63 = vld [vmem:[%s1375_s1 + $0x98] sm:$0xff] }
  0x21   : > { %v234_v20 = vunpack.c.l.b16 %v150_v11  ;;  %v299_v10 = vrot.slane %v297_v14, 1  ;;  %v302_v21 = vrot.slane %v300_v15, 2  ;;  %v305_v9 = vshrl.u32 %v245_v56, 16  ;;  %760 = vmatpush.bf16.msra.mxu3 %v1083_v46  ;;  %v1080_v0 = vld [vmem:[%s1375_s1 + $0xd8] sm:$0xff]  ;;  %v1055_v1 = vld [vmem:[%s1375_s1 + $0x10] sm:$0xff]  ;;  %v1054_v14 = vld [vmem:[%s1375_s1 + $0x8] sm:$0xff] }
  0x22   : > { %v287_v22 = vor.u32 %v286_v17, %v283_v16  ;;  %v295_v23 = vor.u32 %v294_v19, %v291_v18  ;;  %v308_v24 = vshll.u32 %v245_v56, 16  ;;  %v1073_v56 = vld [vmem:[%s1375_s1 + $0xa0] sm:$0xff]  ;;  %v1071_v4 = vld [vmem:[%s1375_s1 + $0x90] sm:$0xff]  ;;  %v1062_v15 = vld [vmem:[%s1375_s1 + $0x48] sm:$0xff] }
  0x23   : > { %v240_v25 = vpack.c.b16 %v234_v20, %v234_v20  ;;  %v303_v26 = vor.u32 %v302_v21, %v299_v10  ;;  %v307_v30 = vrot.slane %v305_v9, 1  ;;  %732 = vmatpush.bf16.msra.mxu1 %v1067_v44  ;;  %v1079_v5 = vld [vmem:[%s1375_s1 + $0xd0] sm:$0xff]  ;;  %v1070_v16 = vld [vmem:[%s1375_s1 + $0x88] sm:$0xff]  ;;  %v1053_v18 = vld [vmem:[%s1375_s1] sm:$0xff] }
  0x24   : > { %v310_v31 = vrot.slane %v308_v24, 2  ;;  %719 = vmatpush.bf16.msra.mxu0 %v1058_v50  ;;  %747 = vmatpush.bf16.msra.mxu2 %v1074_v52  ;;  %v1078_v17 = vld [vmem:[%s1375_s1 + $0xc8] sm:$0xff]  ;;  %v1061_v19 = vld [vmem:[%s1375_s1 + $0x40] sm:$0xff] }
  0x25   : > { %v265_v27 = vshrl.u32 %v240_v25, 16  ;;  %v268_v29 = vshll.u32 %v240_v25, 16  ;;  %v246_v36 = vrot.slane %v240_v25, 1  ;;  %v1069_v20 = vld [vmem:[%s1375_s1 + $0x80] sm:$0xff] }
  0x26   : > { %224 = vrot.lane.b32.xlu1 %v208_v53, %s1109_s16  ;;  %220 = vrot.lane.b32.xlu0 %v194_v54, %s1109_s16  ;;  %v311_v35 = vor.u32 %v310_v31, %v307_v30  ;;  %v1082_v53 = vld [vmem:[%s1375_s1 + $0xe8] sm:$0xff]  ;;  %v1057_v54 = vld [vmem:[%s1375_s1 + $0x20] sm:$0xff] }
  0x27   : > { %226 = vrot.lane.b32.xlu2 %v215_v57, %s1109_s16  ;;  %v267_v33 = vrot.slane %v265_v27, 1  ;;  %v270_v34 = vrot.slane %v268_v29, 2  ;;  %733 = vmatpush.bf16.msra.mxu1 %v1066_v51  ;;  %v1081_v57 = vld [vmem:[%s1375_s1 + $0xe0] sm:$0xff] }
  0x28   : > { %761 = vmatpush.bf16.msra.mxu3 %v1082_v53  ;;  %720 = vmatpush.bf16.msra.mxu0 %v1057_v54  ;;  %v1077_v10 = vld [vmem:[%s1375_s1 + $0xc0] sm:$0xff] }
  0x29   : > { %v271_v37 = vor.u32 %v270_v34, %v267_v33  ;;  %748 = vmatpush.bf16.msra.mxu2 %v1073_v56 }
  0x2b   : > { %734 = vmatpush.bf16.msra.mxu1 %v1065_v55 }
  0x2c   : > { %762 = vmatpush.bf16.msra.mxu3 %v1081_v57  ;;  %721 = vmatpush.bf16.msra.mxu0 %v1056_v61 }
  0x2d   : > { %749 = vmatpush.bf16.msra.mxu2 %v1072_v63 }
  0x2e   : > { %262 = vrot.lane.b32.xlu0 %v251_v62, %s1108_s15  ;;  %216 = vrot.lane.b32.xlu1 %v180_v3, %s1109_s16  ;;  %v1064_v62 = vld [vmem:[%s1375_s1 + $0x58] sm:$0xff]  ;;  %v1063_v3 = vld [vmem:[%s1375_s1 + $0x50] sm:$0xff] }
  0x2f   : > { %314 = vrot.lane.b32.xlu2 %v279_v12, %s1110_s17  ;;  %735 = vmatpush.bf16.msra.mxu1 %v1064_v62 }
  0x30   : > { %763 = vmatpush.bf16.msra.mxu3 %v1080_v0  ;;  %722 = vmatpush.bf16.msra.mxu0 %v1055_v1 }
  0x31   : > { %750 = vmatpush.bf16.msra.mxu2 %v1071_v4 }
  0x33   : > { %736 = vmatpush.bf16.msra.mxu1 %v1063_v3 }
  0x34   : > { %764 = vmatpush.bf16.msra.mxu3 %v1079_v5  ;;  %723 = vmatpush.bf16.msra.mxu0 %v1054_v14 }
  0x35   : > { %751 = vmatpush.bf16.msra.mxu2 %v1070_v16 }
  0x36   : > { %316 = vrot.lane.b32.xlu0 %v287_v22, %s1110_s17  ;;  %318 = vrot.lane.b32.xlu1 %v295_v23, %s1110_s17 }
  0x37   : > { %320 = vrot.lane.b32.xlu2 %v303_v26, %s1110_s17  ;;  %737 = vmatpush.bf16.msra.mxu1 %v1062_v15 }
  0x38   : > { %765 = vmatpush.bf16.msra.mxu3 %v1078_v17  ;;  %724 = vmatpush.bf16.msra.mxu0 %v1053_v18 }
  0x39   : > { %752 = vmatpush.bf16.msra.mxu2 %v1069_v20 }
  0x3b   : > { %738 = vmatpush.bf16.msra.mxu1 %v1061_v19 }
  0x3c   : > { %766 = vmatpush.bf16.msra.mxu3 %v1077_v10 }
  0x3e   : > { %322 = vrot.lane.b32.xlu0 %v311_v35, %s1110_s17  ;;  %252 = vrot.lane.b32.xlu1 %v246_v36, %s1108_s15 }
  0x3f   : > { %312 = vrot.lane.b32.xlu2 %v271_v37, %s1110_s17 }
  0x71   : > { %v1194_v38 = vpop.permute.xlu2 %254 }
  0x79   : > { %v1220_v47 = vpop.permute.xlu2 %260 }
  0x81   : > { %v1250_v58 = vpop.permute.xlu2 %226 }
  0x82   : > { %v342_v46 = vsel %vm324_vm0, %v1174_v32, %v1250_v58 }
  0x88   : > { %v1222_v48 = vpop.permute.xlu1 %258  ;;  %v1224_v49 = vpop.permute.xlu0 %256 }
  0x89   : > { %v315_v12 = vpop.permute.xlu2 %314 }
  0x90   : > { %v223_v59 = vpop.permute.xlu1 %222  ;;  %v219_v60 = vpop.permute.xlu0 %218 }
  0x91   : > { %v321_v9 = vpop.permute.xlu2 %320  ;;  %v336_v25 = vsel %vm324_vm0, %v1145_v2, %v223_v59  ;;  %v330_v27 = vsel %vm324_vm0, %v1149_v6, %v219_v60 }
  0x92   : > { %v351_v31 = vsel %vm343_vm1, %v336_v25, %v1222_v48  ;;  %v347_v2 = vsel %vm343_vm1, %v330_v27, %v1194_v38 }
  0x93   : > { %v360_v37 = vsel %vm356_vm2, %v347_v2, %v315_v12 }
  0x94   : > { %v374_v51 = vrot.slane %v360_v37, 7 }
  0x98   : > { %v225_v7 = vpop.permute.xlu1 %224  ;;  %v221_v11 = vpop.permute.xlu0 %220 }
  0x99   : > { %v339_v23 = vsel %vm324_vm0, %v1153_v8, %v225_v7  ;;  %v333_v26 = vsel %vm324_vm0, %v1161_v13, %v221_v11  ;;  %v313_v48 = vpop.permute.xlu2 %312 }
  0x9a   : > { %v353_v24 = vsel %vm343_vm1, %v339_v23, %v1220_v47  ;;  %v349_v8 = vsel %vm343_vm1, %v333_v26, %v1224_v49 }
  0x9b   : > { %v366_v29 = vsel %vm356_vm2, %v353_v24, %v321_v9 }
  0x9c   : > { %v379_v34 = vrot.slane %v366_v29, 5  ;;  %v381_v56 = vrot.slane %v366_v29, 6 }
  0xa0   : > { %v263_v21 = vpop.permute.xlu0 %262  ;;  %v217_v22 = vpop.permute.xlu1 %216 }
  0xa1   : > { %v355_v52 = vsel %vm343_vm1, %v342_v46, %v263_v21  ;;  %v327_v53 = vsel %vm324_vm0, %v1171_v28, %v217_v22 }
  0xa8   : > { %v317_v30 = vpop.permute.xlu0 %316  ;;  %v319_v33 = vpop.permute.xlu1 %318 }
  0xa9   : > { %v362_v13 = vsel %vm356_vm2, %v349_v8, %v317_v30  ;;  %v364_v6 = vsel %vm356_vm2, %v351_v31, %v319_v33 }
  0xaa   : > { %v377_v35 = vrot.slane %v362_v13, 7  ;;  %v378_v36 = vrot.slane %v364_v6, 6  ;;  %v375_v42 = vrot.slane %v362_v13, 6  ;;  %v376_v43 = vrot.slane %v364_v6, 5 }
  0xab   : > { %v380_v47 = vrot.slane %v364_v6, 7 }
  0xac   : > { %v405_v39 = vsel %vm386_vm3, %v378_v36, %v379_v34  ;;  %v409_v40 = vsel %vm395_vm4, %v378_v36, %v379_v34  ;;  %v402_v41 = vsel %vm383_vm5, %v360_v37, %v377_v35  ;;  %v408_v38 = vsel %vm393_vm6, %v360_v37, %v377_v35 }
  0xad   : > { %v406_v44 = vsel %vm390_vm7, %v402_v41, %v405_v39  ;;  %v410_v45 = vsel %vm397_vm8, %v408_v38, %v409_v40  ;;  %v389_v58 = vsel %vm386_vm3, %v375_v42, %v376_v43  ;;  %v396_v62 = vsel %vm395_vm4, %v375_v42, %v376_v43 }
  0xae   : > { %v412_v49 = vrot.slane %v410_v45, 1  ;;  %v429_v50 = vunpack.i.h.s16 %v406_v44  ;;  %v414_v28 = vsel %vm383_vm5, %v362_v13, %v380_v47  ;;  %v420_v1 = vsel %vm393_vm6, %v362_v13, %v380_v47 }
  0xb0   : > { %v323_v54 = vpop.permute.xlu0 %322  ;;  %v253_v55 = vpop.permute.xlu1 %252  ;;  %v922_v60 = vpack.i.b16 %v412_v49, %v429_v50 }
  0xb1   : > { %v368_v57 = vsel %vm356_vm2, %v355_v52, %v323_v54  ;;  %v345_v59 = vsel %vm343_vm1, %v327_v53, %v253_v55 }
  0xb2   : > { %v382_v61 = vrot.slane %v368_v57, 5  ;;  %v358_v32 = vsel %vm356_vm2, %v345_v59, %v313_v48  ;;  %510 = vst [vmem:[#allocation1 + $0x2] ss:$9 sm:$0xff] %v922_v60 }
  0xb3   : > { %v385_v63 = vsel %vm383_vm5, %v358_v32, %v374_v51  ;;  %v394_v0 = vsel %vm393_vm6, %v358_v32, %v374_v51 }
  0xb4   : > { %v417_v3 = vsel %vm386_vm3, %v381_v56, %v382_v61  ;;  %v421_v4 = vsel %vm395_vm4, %v381_v56, %v382_v61  ;;  %v391_v5 = vsel %vm390_vm7, %v385_v63, %v389_v58  ;;  %v398_v7 = vsel %vm397_vm8, %v394_v0, %v396_v62 }
  0xb5   : > { %v400_v11 = vrot.slane %v398_v7, 1  ;;  %v418_v12 = vsel %vm390_vm7, %v414_v28, %v417_v3  ;;  %v422_v14 = vsel %vm397_vm8, %v420_v1, %v421_v4  ;;  %504 = vst [vmem:[#allocation1] ss:$9 sm:$0xff] %v391_v5 }
  0xb6   : > { %v424_v15 = vrot.slane %v422_v14, 1  ;;  %513 = vst [vmem:[#allocation1 + $0x3] ss:$9 sm:$0xff] %v418_v12 }
  0xb7   : > { %v921_v16 = vpack.i.b16 %v406_v44, %v400_v11  ;;  %v850_v11 = vld [vmem:[%s1353_s5] sm:$0x3] }
  0xb8   : > { %v433_v17 = vunpack.i.l.s16 %v424_v15 }
  0xb9   : > { %507 = vst [vmem:[#allocation1 + $0x1] ss:$9 sm:$0xff] %v921_v16 }
  0xba   : > { %516 = vst [vmem:[#allocation1 + $0x4] ss:$9 sm:$0xff] %v433_v17 }
  0xc1   : > { %v517_v18 = vld [vmem:[#allocation1] sm:$0xff]  ;;  %v518_v19 = vld [vmem:[#allocation1 + $0x9] sm:$0xff]  ;;  %v519_v20 = vld [vmem:[#allocation1 + $0x12] sm:$0xff] }
  0xc2   : > { %725 = vmatmul.bf16.vlgmr.msra.gmra.mxu0 %v517_v18  ;;  %739 = vmatmul.bf16.vlgmr.msra.gmra.mxu1 %v518_v19  ;;  %v520_v10 = vld [vmem:[#allocation1 + $0x1b] sm:$0xff] }
  0xc3   : > { %753 = vmatmul.bf16.vlgmr.msra.gmra.mxu2 %v519_v20  ;;  %767 = vmatmul.bf16.vlgmr.msra.gmra.mxu3 %v520_v10 }
 0x13f   : > { %v726_v21 = vpop.f32.mrf.mxu0  ;;  %v740_v22 = vpop.f32.mrf.mxu1 }
 0x140   : > { %v741_v24 = vadd.f32 %v740_v22, %v726_v21  ;;  %v853_v22 = vld [vmem:[%s1353_s5 + $0x2] sm:$0x3] }
 0x146   : > { %v754_v23 = vpop.f32.mrf.mxu2  ;;  %v768_v9 = vpop.f32.mrf.mxu3 }
 0x147   : > { %v755_v25 = vadd.f32 %v754_v23, %v741_v24  ;;  %v728_v26 = vpop.f32.mrf.mxu0  ;;  %v742_v27 = vpop.f32.mrf.mxu1 }
 0x148   : > { %v743_v8 = vadd.f32 %v742_v27, %v728_v26  ;;  %v856_v27 = vld [vmem:[%s1353_s5 + $0x4] sm:$0x3] }
 0x149   : > { %v769_v29 = vadd.f32 %v768_v9, %v755_v25 }
 0x14b   : > { %v784_v2 = vmul.f32 %v769_v29, %v769_v29  ;;  %v773_v6 = vsel %vm343_vm1, %v769_v29, 0.0 }
 0x14d   : > { %v786_v37 = vsel %vm343_vm1, %v784_v2, 0.0 }
 0x14e   : > { %v756_v30 = vpop.f32.mrf.mxu2  ;;  %v770_v33 = vpop.f32.mrf.mxu3 }
 0x14f   : > { %v757_v31 = vadd.f32 %v756_v30, %v743_v8 }
 0x151   : > { %v771_v13 = vadd.f32 %v770_v33, %v757_v31 }
 0x153   : > { %v775_v34 = vsel %vm774_vm9, %v771_v13, 0.0  ;;  %v785_v35 = vmul.f32 %v771_v13, %v771_v13 }
 0x154   : > { %v776_v36 = vadd.f32 %v775_v34, %v773_v6 }
 0x155   : > { %v787_v39 = vsel %vm774_vm9, %v785_v35, 0.0 }
 0x156   : > { %v777_v40 = vrot.slane %v776_v36, 4  ;;  %v788_v41 = vadd.f32 %v787_v39, %v786_v37 }
 0x158   : > { %v778_v38 = vadd.f32 %v777_v40, %v776_v36  ;;  %v789_v42 = vrot.slane %v788_v41, 4 }
 0x15a   : > { %v779_v43 = vrot.slane %v778_v38, 2  ;;  %v790_v44 = vadd.f32 %v789_v42, %v788_v41 }
 0x15c   : > { %v780_v45 = vadd.f32 %v779_v43, %v778_v38  ;;  %v791_v46 = vrot.slane %v790_v44, 2 }
 0x15e   : > { %v781_v47 = vrot.slane %v780_v45, 1  ;;  %v792_v48 = vadd.f32 %v791_v46, %v790_v44 }
 0x160   : > { %v782_v49 = vadd.f32 %v781_v47, %v780_v45  ;;  %v793_v50 = vrot.slane %v792_v48, 1 }
 0x162   : > { %v783_v51 = vmul.f32 0.11111111, %v782_v49  ;;  %v794_v52 = vadd.f32 %v793_v50, %v792_v48 }
 0x164   : > { %v795_v53 = vmul.f32 0.11111111, %v794_v52  ;;  %v796_v54 = vmul.f32 %v783_v51, %v783_v51  ;;  %v799_v63 = vsub.f32 %v769_v29, %v783_v51  ;;  %v800_v16 = vsub.f32 %v771_v13, %v783_v51 }
 0x166   : > { %v797_v55 = vsub.f32 %v795_v53, %v796_v54 }
 0x168   : > { %v798_v56 = vmax.f32 %v797_v55, 0.0 }
 0x16a   : > { %v801_v57 = vadd.f32 1e-05, %v798_v56 }
 0x16c   : > { %1098 = vrsqrt.f32 %v801_v57  ;;  %vm808_vm11 = vweird.f32 %v801_v57 }
 0x172   : > { %v1099_v59 = vpop.eup %1098 }
 0x173   : > { %v803_v60 = vmul.f32 %v1099_v59, %v801_v57  ;;  %vm809_vm10 = vweird.f32 %v1099_v59 }
 0x174   : > { %vm810_vm12 = vmor %vm808_vm11, %vm809_vm10 }
 0x175   : > { %v804_v61 = vmul.f32 %v1099_v59, %v803_v60 }
 0x177   : > { %v805_v32 = vmul.f32 0.5, %v804_v61 }
 0x179   : > { %v806_v58 = vsub.f32 1.5, %v805_v32 }
 0x17b   : > { %v807_v62 = vmul.f32 %v1099_v59, %v806_v58 }
 0x17d   : > { %v811_v0 = vsel %vm810_vm12, %v1099_v59, %v807_v62 }
 0x17e   : > { %v812_v28 = vmul.f32 %v811_v0, %v799_v63  ;;  %v813_v19 = vmul.f32 %v811_v0, %v800_v16 }
 0x180   : > { %v814_v1 = vmul.f32 0.2, %v812_v28  ;;  %v815_v10 = vmul.f32 0.2, %v813_v19 }
 0x182   : > { %v816_v3 = vmax.f32 %v812_v28, %v814_v1  ;;  %v817_v24 = vmax.f32 %v813_v19, %v815_v10 }
 0x184   : > { %v820_v4 = vrot.slane %v816_v3, 1  ;;  %v821_v5 = vrot.slane %v816_v3, 2  ;;  %827 = vst [vmem:[#allocation1] ss:$9 sm:$0xff] %v816_v3  ;;  %v822_v7 = vrot.slane %v816_v3, 3  ;;  %v823_v12 = vrot.slane %v816_v3, 4 }
 0x185   : > { %v824_v17 = vrot.slane %v816_v3, 5  ;;  %v825_v21 = vrot.slane %v816_v3, 6  ;;  %v826_v23 = vrot.slane %v816_v3, 7 }
 0x186   : > { %829 = vst [vmem:[#allocation1 + $0x1] ss:$9 sm:$0xff] %v820_v4 }
 0x187   : > { %831 = vst [vmem:[#allocation1 + $0x2] ss:$9 sm:$0xff] %v821_v5 }
 0x18e   : > { %v832_v14 = vld [vmem:[#allocation1] sm:$0xff] }
 0x18f   : > { %833 = vst [vmem:[#allocation1] ss:$9 sm:$0xff] %v822_v7  ;;  %v844_v18 = vpack.c.bf16 %v832_v14, %v832_v14 }
 0x190   : > { %834 = vst [vmem:[#allocation1 + $0x1] ss:$9 sm:$0xff] %v823_v12 }
 0x191   : > { %835 = vst [vmem:[#allocation1 + $0x2] ss:$9 sm:$0xff] %v824_v17  ;;  %v851_v20 = vsel %vm1356_vm15, %v844_v18, %v850_v11 }
 0x192   : > { %852 = vst [vmem:[%s1353_s5] sm:$0x3] %v851_v20 }
 0x198   : > { %v836_v9 = vld [vmem:[#allocation1] sm:$0xff] }
 0x199   : > { %837 = vst [vmem:[#allocation1] ss:$9 sm:$0xff] %v825_v21  ;;  %v845_v25 = vpack.c.bf16 %v836_v9, %v836_v9 }
 0x19a   : > { %838 = vst [vmem:[#allocation1 + $0x1] ss:$9 sm:$0xff] %v826_v23 }
 0x19b   : > { %839 = vst [vmem:[#allocation1 + $0x2] ss:$9 sm:$0xff] %v817_v24  ;;  %v854_v26 = vsel %vm1356_vm15, %v845_v25, %v853_v22 }
 0x19c   : > { %855 = vst [vmem:[%s1353_s5 + $0x2] sm:$0x3] %v854_v26 }
 0x1a2   : > { %v840_v29 = vld [vmem:[#allocation1] sm:$0xff] }
 0x1a3   : > { %v846_v8 = vpack.c.bf16 %v840_v29, %v840_v29 }
 0x1a5   : > { %v857_v30 = vsel %vm1356_vm15, %v846_v8, %v856_v27 }
 0x1a6   : > { %858 = vst [vmem:[%s1353_s5 + $0x4] sm:$0x3] %v857_v30 }
 0x1a7 PF: > { %s12_s9 = sadd.s32 1, %s1106_s9  }
 0x1a8   : > { %p9_p4 = scmp.ge.s32.totalorder %s12_s9, 4  }
 0x1aa   :  { %11 = sbr.rel (!%p9_p4) target bundleno = 1 (0x1), region = 64 }

</bundles_post_ra>
